<compile_context>
chip_gen: v7x
topology: tpu7x:2x2x1
jax: 0.10.0
libtpu: 0.0.40
codegen_flags: <defaults>
</compile_context>

<pallas_src>
import jax
import jax.numpy as jnp
from jax import lax
from jax.experimental import pallas as pl
from jax.experimental.pallas import tpu as pltpu

LANE = 128  # channel / lane padding target


def _round_up(x, m):
    return (x + m - 1) // m * m


# ----------------------------------------------------------------------------
# Pallas kernels
# ----------------------------------------------------------------------------

def conv_relu_pool_kernel(p0_ref, p1_ref, p2_ref, p3_ref, w_ref, b_ref, o_ref):
    """Fused conv (as matmul) + bias + ReLU + 2x2 max-pool.

    p{k}_ref: (Tm, Kp) bf16 im2col patches for pool-window offset k
              in {(0,0),(0,1),(1,0),(1,1)}; row m = pooled output pixel m.
    w_ref:    (Kp, 128) bf16   b_ref: (1, 128) f32   o_ref: (Tm, 128) bf16
    max_i(relu(conv_i + b)) == relu(max_i(conv_i) + b), so max first.
    """
    w = w_ref[...]
    s = jnp.dot(p0_ref[...], w, preferred_element_type=jnp.float32)
    s = jnp.maximum(s, jnp.dot(p1_ref[...], w, preferred_element_type=jnp.float32))
    s = jnp.maximum(s, jnp.dot(p2_ref[...], w, preferred_element_type=jnp.float32))
    s = jnp.maximum(s, jnp.dot(p3_ref[...], w, preferred_element_type=jnp.float32))
    o_ref[...] = jnp.maximum(s + b_ref[...], 0.0).astype(o_ref.dtype)


def gap_fc_kernel(x_ref, w_ref, b_ref, o_ref):
    """Global average pool (sum; 1/S folded into w) + final Linear.

    x_ref: (B, S, 128) bf16   w_ref: (128, 128) f32   b_ref: (1, 128) f32
    o_ref: (B, 128) f32 (real classes in the leading columns).
    """
    pooled = jnp.sum(x_ref[...].astype(jnp.float32), axis=1)        # (B, 128)
    o_ref[...] = (jnp.dot(pooled, w_ref[...], preferred_element_type=jnp.float32)
                  + b_ref[...]).astype(o_ref.dtype)


# ----------------------------------------------------------------------------
# pallas_call plumbing
# ----------------------------------------------------------------------------

def _pick_tile_m(mp):
    if mp <= 512:
        return _round_up(mp, 8)
    for cand in (512, 384, 256, 128):
        if mp % cand == 0:
            return cand
    return 256


def _fused_conv_pool_call(pats, w_mat, b_row):
    """pats: list of 4 (Mp, Kp) bf16 patch matrices -> (Mp, 128) bf16 pooled act."""
    mp, kp = pats[0].shape
    cout = w_mat.shape[1]                      # 128
    tm = _pick_tile_m(mp)
    mp_pad = _round_up(mp, tm)
    if mp_pad != mp:
        pats = [jnp.pad(p, ((0, mp_pad - mp), (0, 0))) for p in pats]
    grid = (mp_pad // tm,)
    p_spec = pl.BlockSpec((tm, kp), lambda m: (m, 0))
    out = pl.pallas_call(
        conv_relu_pool_kernel,
        out_shape=jax.ShapeDtypeStruct((mp_pad, cout), jnp.bfloat16),
        grid_spec=pltpu.PrefetchScalarGridSpec(
            num_scalar_prefetch=0,
            grid=grid,
            in_specs=[p_spec, p_spec, p_spec, p_spec,
                      pl.BlockSpec((kp, cout), lambda m: (0, 0)),
                      pl.BlockSpec((1, cout), lambda m: (0, 0))],
            out_specs=pl.BlockSpec((tm, cout), lambda m: (m, 0))),
        compiler_params=pltpu.CompilerParams(
            dimension_semantics=("parallel",)),
    )(*pats, w_mat, b_row)
    return out[:mp]


def conv1_relu_pool(x_nhwc, w_mat, b_row, kh=10, kw=10):
    """First layer: C_in=1, 10x10 kernel. Patches via one dilated_patches op."""
    b, h, w, c = x_nhwc.shape                  # c == 1
    ho, wo = h - kh + 1, w - kw + 1
    hp, wp = ho // 2, wo // 2
    mp = b * hp * wp
    kp = w_mat.shape[0]                        # 128 (K=100 zero-padded)
    k_real = c * kh * kw
    pats = []
    for dr in (0, 1):
        for dc in (0, 1):
            xs = x_nhwc[:, dr:dr + 2 * hp + kh - 2, dc:dc + 2 * wp + kw - 2, :]
            p = lax.conv_general_dilated_patches(
                xs, (kh, kw), (2, 2), 'VALID',
                dimension_numbers=('NHWC', 'HWIO', 'NHWC'))     # (B,hp,wp,100)
            p = p.reshape(mp, k_real)
            pats.append(jnp.pad(p, ((0, 0), (0, kp - k_real))))
    out = _fused_conv_pool_call(pats, w_mat, b_row)
    return out.reshape(b, hp, wp, LANE)


def conv2x2_relu_pool(x_nhwc, w_mat, b_row):
    """2x2-kernel layers on 128-padded activations; 4 strided-slice taps/offset."""
    b, h, w, c = x_nhwc.shape                  # c == 128 (padded)
    ho, wo = h - 1, w - 1
    hp, wp = ho // 2, wo // 2
    mp = b * hp * wp
    pats = []
    for dr in (0, 1):
        for dc in (0, 1):
            taps = []
            for i in range(2):
                for j in range(2):
                    r0, c0 = dr + i, dc + j
                    t = lax.slice(x_nhwc,
                                  (0, r0, c0, 0),
                                  (b, r0 + 2 * (hp - 1) + 1,
                                   c0 + 2 * (wp - 1) + 1, c),
                                  (1, 2, 2, 1))                 # (B,hp,wp,128)
                    taps.append(t)
            pats.append(jnp.concatenate(taps, axis=-1).reshape(mp, 4 * c))
    out = _fused_conv_pool_call(pats, w_mat, b_row)
    return out.reshape(b, hp, wp, LANE)


def global_avgpool_fc(x_nhwc, w_fc, b_fc):
    """AdaptiveAvgPool2d(1) + flatten + Linear, fused; lane-dense padded output."""
    b, h, w, c = x_nhwc.shape                  # c == 128 (all real after conv4)
    s = h * w
    n_cls = w_fc.shape[0]
    xr = x_nhwc.reshape(b, s, c)
    wm = jnp.pad(jnp.transpose(w_fc).astype(jnp.float32) / float(s),
                 ((0, 0), (0, LANE - n_cls)))                   # 1/S folded in
    bb = jnp.pad(b_fc.astype(jnp.float32), (0, LANE - n_cls)).reshape(1, LANE)
    out = pl.pallas_call(
        gap_fc_kernel,
        out_shape=jax.ShapeDtypeStruct((b, LANE), jnp.float32),
        in_specs=[pl.BlockSpec(memory_space=pltpu.MemorySpace.VMEM)] * 3,
        out_specs=pl.BlockSpec(memory_space=pltpu.MemorySpace.VMEM),
    )(xr, wm, bb)
    return out[:, :n_cls]


# ----------------------------------------------------------------------------
# Weight preprocessing (zero-pad to lane-dense matmul operands)
# ----------------------------------------------------------------------------

def _conv1_weight(w, bias):
    cout, cin, kh, kw = w.shape                              # (16, 1, 10, 10)
    wm = jnp.transpose(w, (1, 2, 3, 0)).reshape(cin * kh * kw, cout)  # k = i*kw+j
    wm = jnp.pad(wm, ((0, LANE - cin * kh * kw), (0, LANE - cout)))
    bb = jnp.pad(bias, (0, LANE - cout)).reshape(1, LANE).astype(jnp.float32)
    return wm.astype(jnp.bfloat16), bb


def _conv2x2_weight(w, bias):
    cout, cin, kh, kw = w.shape
    wt = jnp.transpose(w, (2, 3, 1, 0))                      # (kh, kw, cin, cout)
    wt = jnp.pad(wt, ((0, 0), (0, 0), (0, LANE - cin), (0, LANE - cout)))
    wm = wt.reshape(kh * kw * LANE, LANE)                    # row = (i*kw+j)*128 + c
    bb = jnp.pad(bias, (0, LANE - cout)).reshape(1, LANE).astype(jnp.float32)
    return wm.astype(jnp.bfloat16), bb


# ----------------------------------------------------------------------------
# Full forward pass (matches cnn.forward, eval mode)
# ----------------------------------------------------------------------------

@jax.jit
def cnn_forward(x_nchw, params):
    x = jnp.transpose(x_nchw, (0, 2, 3, 1)).astype(jnp.bfloat16)   # NCHW -> NHWC
    w1m, b1r = _conv1_weight(params["w1"], params["b1"])
    w2m, b2r = _conv2x2_weight(params["w2"], params["b2"])
    w3m, b3r = _conv2x2_weight(params["w3"], params["b3"])
    w4m, b4r = _conv2x2_weight(params["w4"], params["b4"])
    x = conv1_relu_pool(x, w1m, b1r)        # dropout1: identity (eval)
    x = conv2x2_relu_pool(x, w2m, b2r)      # dropout2: identity
    x = conv2x2_relu_pool(x, w3m, b3r)      # dropout3: identity
    x = conv2x2_relu_pool(x, w4m, b4r)      # dropout4: identity
    return global_avgpool_fc(x, params["w_fc"], params["b_fc"])    # (B, classes)


# ----------------------------------------------------------------------------
# Pure-JAX (lax) reference for validation
# ----------------------------------------------------------------------------

def reference_forward(x_nchw, params):
    hi = jax.lax.Precision.HIGHEST

    def conv(x, w, b):
        y = lax.conv_general_dilated(
            x, w, (1, 1), "VALID",
            dimension_numbers=("NCHW", "OIHW", "NCHW"), precision=hi)
        return jax.nn.relu(y + b[None, :, None, None])

    def pool(x):
        return lax.reduce_window(x, -jnp.inf, lax.max,
                                 (1, 1, 2, 2), (1, 1, 2, 2), "VALID")

    x = x_nchw
    x = pool(conv(x, params["w1"], params["b1"]))
    x = pool(conv(x, params["w2"], params["b2"]))
    x = pool(conv(x, params["w3"], params["b3"]))
    x = pool(conv(x, params["w4"], params["b4"]))
    x = jnp.mean(x, axis=(2, 3))                                 # (B, 128)
    return jnp.dot(x, params["w_fc"].T, precision=hi) + params["b_fc"]


# ----------------------------------------------------------------------------
# Main
# ----------------------------------------------------------------------------

def init_params(key):
    def init(k, shape, fan_in):
        return jax.random.normal(k, shape, jnp.float32) / jnp.sqrt(float(fan_in))

    ks = jax.random.split(key, 10)
    return {
        "w1": init(ks[0], (16, 1, 10, 10), 1 * 10 * 10),  "b1": init(ks[1], (16,), 100),
        "w2": init(ks[2], (32, 16, 2, 2), 16 * 2 * 2),    "b2": init(ks[3], (32,), 64),
        "w3": init(ks[4], (64, 32, 2, 2), 32 * 2 * 2),    "b3": init(ks[5], (64,), 128),
        "w4": init(ks[6], (128, 64, 2, 2), 64 * 2 * 2),   "b4": init(ks[7], (128,), 256),
        "w_fc": init(ks[8], (2, 128), 128),               "b_fc": init(ks[9], (2,), 128),
    }


if __name__ == "__main__":
    key = jax.random.PRNGKey(0)
    k_x, k_p = jax.random.split(key)

    # NCHW input like the PyTorch module; 58x58 so spatial shrinks to 2x2 pre-GAP.
    x = jax.random.normal(k_x, (2, 1, 58, 58), jnp.float32)
    params = init_params(k_p)

    logits = cnn_forward(x, params)
    logits = jax.block_until_ready(logits)

    ref = reference_forward(x, params)
    assert logits.shape == (2, 2), logits.shape
    # bf16 matmul operands (f32 accumulation) vs f32-HIGHEST reference -> wider tol.
    assert jnp.allclose(logits, ref, atol=6e-2, rtol=6e-2), (logits, ref)

    print("KERNEL_OK")
</pallas_src>

<mosaic_0001>
module attributes {stable_mosaic.version = 11 : i64} {
  func.func @conv_relu_pool_kernel(%arg0: i32, %arg1: memref<384x128xbf16, #tpu.memory_space<vmem>>, %arg2: memref<384x128xbf16, #tpu.memory_space<vmem>>, %arg3: memref<384x128xbf16, #tpu.memory_space<vmem>>, %arg4: memref<384x128xbf16, #tpu.memory_space<vmem>>, %arg5: memref<128x128xbf16, #tpu.memory_space<vmem>>, %arg6: memref<1x128xf32, #tpu.memory_space<vmem>>, %arg7: memref<384x128xbf16, #tpu.memory_space<vmem>>) attributes {dimension_semantics = [#tpu.dimension_semantics<parallel>], iteration_bounds = array<i64: 3>, scalar_prefetch = 0 : i64, scratch_operands = 0 : i64, tpu.core_type = #tpu.core_type<tc>, window_params = [{transform_indices = @transform_0, window_bounds = array<i64: 384, 128>}, {transform_indices = @transform_1, window_bounds = array<i64: 384, 128>}, {transform_indices = @transform_2, window_bounds = array<i64: 384, 128>}, {transform_indices = @transform_3, window_bounds = array<i64: 384, 128>}, {pipeline_mode = #tpu.pipeline_mode<synchronous>, transform_indices = @transform_4, window_bounds = array<i64: 128, 128>}, {pipeline_mode = #tpu.pipeline_mode<synchronous>, transform_indices = @transform_5, window_bounds = array<i64: 1, 128>}, {transform_indices = @transform_6, window_bounds = array<i64: 384, 128>}]} {
    %c0 = arith.constant 0 : index
    %c0_0 = arith.constant 0 : index
    %0 = vector.load %arg5[%c0, %c0_0] : memref<128x128xbf16, #tpu.memory_space<vmem>>, vector<128x128xbf16>
    %c0_1 = arith.constant 0 : index
    %c0_2 = arith.constant 0 : index
    %1 = vector.load %arg1[%c0_1, %c0_2] : memref<384x128xbf16, #tpu.memory_space<vmem>>, vector<384x128xbf16>
    %cst = arith.constant dense<0.000000e+00> : vector<384x128xf32>
    %2 = tpu.matmul %1, %0, %cst {dimension_numbers = #tpu.dot_dimension_numbers<[1], [0], [0], [1], [0, 0, 1, 1], [], []>} : vector<384x128xbf16>, vector<128x128xbf16>, vector<384x128xf32> -> vector<384x128xf32>
    %c0_3 = arith.constant 0 : index
    %c0_4 = arith.constant 0 : index
    %3 = vector.load %arg2[%c0_3, %c0_4] : memref<384x128xbf16, #tpu.memory_space<vmem>>, vector<384x128xbf16>
    %cst_5 = arith.constant dense<0.000000e+00> : vector<384x128xf32>
    %4 = tpu.matmul %3, %0, %cst_5 {dimension_numbers = #tpu.dot_dimension_numbers<[1], [0], [0], [1], [0, 0, 1, 1], [], []>} : vector<384x128xbf16>, vector<128x128xbf16>, vector<384x128xf32> -> vector<384x128xf32>
    %5 = arith.maximumf %2, %4 : vector<384x128xf32>
    %c0_6 = arith.constant 0 : index
    %c0_7 = arith.constant 0 : index
    %6 = vector.load %arg3[%c0_6, %c0_7] : memref<384x128xbf16, #tpu.memory_space<vmem>>, vector<384x128xbf16>
    %cst_8 = arith.constant dense<0.000000e+00> : vector<384x128xf32>
    %7 = tpu.matmul %6, %0, %cst_8 {dimension_numbers = #tpu.dot_dimension_numbers<[1], [0], [0], [1], [0, 0, 1, 1], [], []>} : vector<384x128xbf16>, vector<128x128xbf16>, vector<384x128xf32> -> vector<384x128xf32>
    %8 = arith.maximumf %5, %7 : vector<384x128xf32>
    %c0_9 = arith.constant 0 : index
    %c0_10 = arith.constant 0 : index
    %9 = vector.load %arg4[%c0_9, %c0_10] : memref<384x128xbf16, #tpu.memory_space<vmem>>, vector<384x128xbf16>
    %cst_11 = arith.constant dense<0.000000e+00> : vector<384x128xf32>
    %10 = tpu.matmul %9, %0, %cst_11 {dimension_numbers = #tpu.dot_dimension_numbers<[1], [0], [0], [1], [0, 0, 1, 1], [], []>} : vector<384x128xbf16>, vector<128x128xbf16>, vector<384x128xf32> -> vector<384x128xf32>
    %11 = arith.maximumf %8, %10 : vector<384x128xf32>
    %c0_12 = arith.constant 0 : index
    %c0_13 = arith.constant 0 : index
    %12 = vector.load %arg6[%c0_12, %c0_13] : memref<1x128xf32, #tpu.memory_space<vmem>>, vector<1x128xf32>
    %13 = vector.broadcast %12 : vector<1x128xf32> to vector<384x128xf32>
    %14 = arith.addf %11, %13 : vector<384x128xf32>
    %cst_14 = arith.constant 0.000000e+00 : f32
    %15 = vector.broadcast %cst_14 : f32 to vector<384x128xf32>
    %16 = arith.maximumf %14, %15 : vector<384x128xf32>
    %17 = arith.truncf %16 : vector<384x128xf32> to vector<384x128xbf16>
    %c0_15 = arith.constant 0 : index
    %c0_16 = arith.constant 0 : index
    %18 = vector.load %arg7[%c0_15, %c0_16] : memref<384x128xbf16, #tpu.memory_space<vmem>>, vector<384x128xbf16>
    tpu.vector_store %arg7[%c0_15, %c0_16], %17 {strides = array<i32>} : memref<384x128xbf16, #tpu.memory_space<vmem>>, vector<384x128xbf16>,
    return
  }
  func.func @transform_0(%arg0: i32) -> (i32, i32) {
    %c0_i32 = arith.constant 0 : i32
    %c0_i32_0 = arith.constant 0 : i32
    return %arg0, %c0_i32 : i32, i32
  }
  func.func @transform_1(%arg0: i32) -> (i32, i32) {
    %c0_i32 = arith.constant 0 : i32
    %c0_i32_0 = arith.constant 0 : i32
    return %arg0, %c0_i32 : i32, i32
  }
  func.func @transform_2(%arg0: i32) -> (i32, i32) {
    %c0_i32 = arith.constant 0 : i32
    %c0_i32_0 = arith.constant 0 : i32
    return %arg0, %c0_i32 : i32, i32
  }
  func.func @transform_3(%arg0: i32) -> (i32, i32) {
    %c0_i32 = arith.constant 0 : i32
    %c0_i32_0 = arith.constant 0 : i32
    return %arg0, %c0_i32 : i32, i32
  }
  func.func @transform_4(%arg0: i32) -> (i32, i32) {
    %c0_i32 = arith.constant 0 : i32
    %c0_i32_0 = arith.constant 0 : i32
    %c0_i32_1 = arith.constant 0 : i32
    return %c0_i32, %c0_i32_0 : i32, i32
  }
  func.func @transform_5(%arg0: i32) -> (i32, i32) {
    %c0_i32 = arith.constant 0 : i32
    %c0_i32_0 = arith.constant 0 : i32
    %c0_i32_1 = arith.constant 0 : i32
    return %c0_i32, %c0_i32_0 : i32, i32
  }
  func.func @transform_6(%arg0: i32) -> (i32, i32) {
    %c0_i32 = arith.constant 0 : i32
    %c0_i32_0 = arith.constant 0 : i32
    return %arg0, %c0_i32 : i32, i32
  }
}

module attributes {stable_mosaic.version = 11 : i64} {
  func.func @conv_relu_pool_kernel(%arg0: i32, %arg1: memref<248x512xbf16, #tpu.memory_space<vmem>>, %arg2: memref<248x512xbf16, #tpu.memory_space<vmem>>, %arg3: memref<248x512xbf16, #tpu.memory_space<vmem>>, %arg4: memref<248x512xbf16, #tpu.memory_space<vmem>>, %arg5: memref<512x128xbf16, #tpu.memory_space<vmem>>, %arg6: memref<1x128xf32, #tpu.memory_space<vmem>>, %arg7: memref<248x128xbf16, #tpu.memory_space<vmem>>) attributes {dimension_semantics = [#tpu.dimension_semantics<parallel>], iteration_bounds = array<i64: 1>, scalar_prefetch = 0 : i64, scratch_operands = 0 : i64, tpu.core_type = #tpu.core_type<tc>, window_params = [{transform_indices = @transform_0, window_bounds = array<i64: 248, 512>}, {transform_indices = @transform_1, window_bounds = array<i64: 248, 512>}, {transform_indices = @transform_2, window_bounds = array<i64: 248, 512>}, {transform_indices = @transform_3, window_bounds = array<i64: 248, 512>}, {pipeline_mode = #tpu.pipeline_mode<synchronous>, transform_indices = @transform_4, window_bounds = array<i64: 512, 128>}, {pipeline_mode = #tpu.pipeline_mode<synchronous>, transform_indices = @transform_5, window_bounds = array<i64: 1, 128>}, {transform_indices = @transform_6, window_bounds = array<i64: 248, 128>}]} {
    %c0 = arith.constant 0 : index
    %c0_0 = arith.constant 0 : index
    %0 = vector.load %arg5[%c0, %c0_0] : memref<512x128xbf16, #tpu.memory_space<vmem>>, vector<512x128xbf16>
    %c0_1 = arith.constant 0 : index
    %c0_2 = arith.constant 0 : index
    %1 = vector.load %arg1[%c0_1, %c0_2] : memref<248x512xbf16, #tpu.memory_space<vmem>>, vector<248x512xbf16>
    %cst = arith.constant dense<0.000000e+00> : vector<248x128xf32>
    %2 = tpu.matmul %1, %0, %cst {dimension_numbers = #tpu.dot_dimension_numbers<[1], [0], [0], [1], [0, 0, 1, 1], [], []>} : vector<248x512xbf16>, vector<512x128xbf16>, vector<248x128xf32> -> vector<248x128xf32>
    %c0_3 = arith.constant 0 : index
    %c0_4 = arith.constant 0 : index
    %3 = vector.load %arg2[%c0_3, %c0_4] : memref<248x512xbf16, #tpu.memory_space<vmem>>, vector<248x512xbf16>
    %cst_5 = arith.constant dense<0.000000e+00> : vector<248x128xf32>
    %4 = tpu.matmul %3, %0, %cst_5 {dimension_numbers = #tpu.dot_dimension_numbers<[1], [0], [0], [1], [0, 0, 1, 1], [], []>} : vector<248x512xbf16>, vector<512x128xbf16>, vector<248x128xf32> -> vector<248x128xf32>
    %5 = arith.maximumf %2, %4 : vector<248x128xf32>
    %c0_6 = arith.constant 0 : index
    %c0_7 = arith.constant 0 : index
    %6 = vector.load %arg3[%c0_6, %c0_7] : memref<248x512xbf16, #tpu.memory_space<vmem>>, vector<248x512xbf16>
    %cst_8 = arith.constant dense<0.000000e+00> : vector<248x128xf32>
    %7 = tpu.matmul %6, %0, %cst_8 {dimension_numbers = #tpu.dot_dimension_numbers<[1], [0], [0], [1], [0, 0, 1, 1], [], []>} : vector<248x512xbf16>, vector<512x128xbf16>, vector<248x128xf32> -> vector<248x128xf32>
    %8 = arith.maximumf %5, %7 : vector<248x128xf32>
    %c0_9 = arith.constant 0 : index
    %c0_10 = arith.constant 0 : index
    %9 = vector.load %arg4[%c0_9, %c0_10] : memref<248x512xbf16, #tpu.memory_space<vmem>>, vector<248x512xbf16>
    %cst_11 = arith.constant dense<0.000000e+00> : vector<248x128xf32>
    %10 = tpu.matmul %9, %0, %cst_11 {dimension_numbers = #tpu.dot_dimension_numbers<[1], [0], [0], [1], [0, 0, 1, 1], [], []>} : vector<248x512xbf16>, vector<512x128xbf16>, vector<248x128xf32> -> vector<248x128xf32>
    %11 = arith.maximumf %8, %10 : vector<248x128xf32>
    %c0_12 = arith.constant 0 : index
    %c0_13 = arith.constant 0 : index
    %12 = vector.load %arg6[%c0_12, %c0_13] : memref<1x128xf32, #tpu.memory_space<vmem>>, vector<1x128xf32>
    %13 = vector.broadcast %12 : vector<1x128xf32> to vector<248x128xf32>
    %14 = arith.addf %11, %13 : vector<248x128xf32>
    %cst_14 = arith.constant 0.000000e+00 : f32
    %15 = vector.broadcast %cst_14 : f32 to vector<248x128xf32>
    %16 = arith.maximumf %14, %15 : vector<248x128xf32>
    %17 = arith.truncf %16 : vector<248x128xf32> to vector<248x128xbf16>
    %c0_15 = arith.constant 0 : index
    %c0_16 = arith.constant 0 : index
    %18 = vector.load %arg7[%c0_15, %c0_16] : memref<248x128xbf16, #tpu.memory_space<vmem>>, vector<248x128xbf16>
    tpu.vector_store %arg7[%c0_15, %c0_16], %17 {strides = array<i32>} : memref<248x128xbf16, #tpu.memory_space<vmem>>, vector<248x128xbf16>,
    return
  }
  func.func @transform_0(%arg0: i32) -> (i32, i32) {
    %c0_i32 = arith.constant 0 : i32
    %c0_i32_0 = arith.constant 0 : i32
    return %arg0, %c0_i32 : i32, i32
  }
  func.func @transform_1(%arg0: i32) -> (i32, i32) {
    %c0_i32 = arith.constant 0 : i32
    %c0_i32_0 = arith.constant 0 : i32
    return %arg0, %c0_i32 : i32, i32
  }
  func.func @transform_2(%arg0: i32) -> (i32, i32) {
    %c0_i32 = arith.constant 0 : i32
    %c0_i32_0 = arith.constant 0 : i32
    return %arg0, %c0_i32 : i32, i32
  }
  func.func @transform_3(%arg0: i32) -> (i32, i32) {
    %c0_i32 = arith.constant 0 : i32
    %c0_i32_0 = arith.constant 0 : i32
    return %arg0, %c0_i32 : i32, i32
  }
  func.func @transform_4(%arg0: i32) -> (i32, i32) {
    %c0_i32 = arith.constant 0 : i32
    %c0_i32_0 = arith.constant 0 : i32
    %c0_i32_1 = arith.constant 0 : i32
    return %c0_i32, %c0_i32_0 : i32, i32
  }
  func.func @transform_5(%arg0: i32) -> (i32, i32) {
    %c0_i32 = arith.constant 0 : i32
    %c0_i32_0 = arith.constant 0 : i32
    %c0_i32_1 = arith.constant 0 : i32
    return %c0_i32, %c0_i32_0 : i32, i32
  }
  func.func @transform_6(%arg0: i32) -> (i32, i32) {
    %c0_i32 = arith.constant 0 : i32
    %c0_i32_0 = arith.constant 0 : i32
    return %arg0, %c0_i32 : i32, i32
  }
}

module attributes {stable_mosaic.version = 11 : i64} {
  func.func @conv_relu_pool_kernel(%arg0: i32, %arg1: memref<56x512xbf16, #tpu.memory_space<vmem>>, %arg2: memref<56x512xbf16, #tpu.memory_space<vmem>>, %arg3: memref<56x512xbf16, #tpu.memory_space<vmem>>, %arg4: memref<56x512xbf16, #tpu.memory_space<vmem>>, %arg5: memref<512x128xbf16, #tpu.memory_space<vmem>>, %arg6: memref<1x128xf32, #tpu.memory_space<vmem>>, %arg7: memref<56x128xbf16, #tpu.memory_space<vmem>>) attributes {dimension_semantics = [#tpu.dimension_semantics<parallel>], iteration_bounds = array<i64: 1>, scalar_prefetch = 0 : i64, scratch_operands = 0 : i64, tpu.core_type = #tpu.core_type<tc>, window_params = [{transform_indices = @transform_0, window_bounds = array<i64: 56, 512>}, {transform_indices = @transform_1, window_bounds = array<i64: 56, 512>}, {transform_indices = @transform_2, window_bounds = array<i64: 56, 512>}, {transform_indices = @transform_3, window_bounds = array<i64: 56, 512>}, {pipeline_mode = #tpu.pipeline_mode<synchronous>, transform_indices = @transform_4, window_bounds = array<i64: 512, 128>}, {pipeline_mode = #tpu.pipeline_mode<synchronous>, transform_indices = @transform_5, window_bounds = array<i64: 1, 128>}, {transform_indices = @transform_6, window_bounds = array<i64: 56, 128>}]} {
    %c0 = arith.constant 0 : index
    %c0_0 = arith.constant 0 : index
    %0 = vector.load %arg5[%c0, %c0_0] : memref<512x128xbf16, #tpu.memory_space<vmem>>, vector<512x128xbf16>
    %c0_1 = arith.constant 0 : index
    %c0_2 = arith.constant 0 : index
    %1 = vector.load %arg1[%c0_1, %c0_2] : memref<56x512xbf16, #tpu.memory_space<vmem>>, vector<56x512xbf16>
    %cst = arith.constant dense<0.000000e+00> : vector<56x128xf32>
    %2 = tpu.matmul %1, %0, %cst {dimension_numbers = #tpu.dot_dimension_numbers<[1], [0], [0], [1], [0, 0, 1, 1], [], []>} : vector<56x512xbf16>, vector<512x128xbf16>, vector<56x128xf32> -> vector<56x128xf32>
    %c0_3 = arith.constant 0 : index
    %c0_4 = arith.constant 0 : index
    %3 = vector.load %arg2[%c0_3, %c0_4] : memref<56x512xbf16, #tpu.memory_space<vmem>>, vector<56x512xbf16>
    %cst_5 = arith.constant dense<0.000000e+00> : vector<56x128xf32>
    %4 = tpu.matmul %3, %0, %cst_5 {dimension_numbers = #tpu.dot_dimension_numbers<[1], [0], [0], [1], [0, 0, 1, 1], [], []>} : vector<56x512xbf16>, vector<512x128xbf16>, vector<56x128xf32> -> vector<56x128xf32>
    %5 = arith.maximumf %2, %4 : vector<56x128xf32>
    %c0_6 = arith.constant 0 : index
    %c0_7 = arith.constant 0 : index
    %6 = vector.load %arg3[%c0_6, %c0_7] : memref<56x512xbf16, #tpu.memory_space<vmem>>, vector<56x512xbf16>
    %cst_8 = arith.constant dense<0.000000e+00> : vector<56x128xf32>
    %7 = tpu.matmul %6, %0, %cst_8 {dimension_numbers = #tpu.dot_dimension_numbers<[1], [0], [0], [1], [0, 0, 1, 1], [], []>} : vector<56x512xbf16>, vector<512x128xbf16>, vector<56x128xf32> -> vector<56x128xf32>
    %8 = arith.maximumf %5, %7 : vector<56x128xf32>
    %c0_9 = arith.constant 0 : index
    %c0_10 = arith.constant 0 : index
    %9 = vector.load %arg4[%c0_9, %c0_10] : memref<56x512xbf16, #tpu.memory_space<vmem>>, vector<56x512xbf16>
    %cst_11 = arith.constant dense<0.000000e+00> : vector<56x128xf32>
    %10 = tpu.matmul %9, %0, %cst_11 {dimension_numbers = #tpu.dot_dimension_numbers<[1], [0], [0], [1], [0, 0, 1, 1], [], []>} : vector<56x512xbf16>, vector<512x128xbf16>, vector<56x128xf32> -> vector<56x128xf32>
    %11 = arith.maximumf %8, %10 : vector<56x128xf32>
    %c0_12 = arith.constant 0 : index
    %c0_13 = arith.constant 0 : index
    %12 = vector.load %arg6[%c0_12, %c0_13] : memref<1x128xf32, #tpu.memory_space<vmem>>, vector<1x128xf32>
    %13 = vector.broadcast %12 : vector<1x128xf32> to vector<56x128xf32>
    %14 = arith.addf %11, %13 : vector<56x128xf32>
    %cst_14 = arith.constant 0.000000e+00 : f32
    %15 = vector.broadcast %cst_14 : f32 to vector<56x128xf32>
    %16 = arith.maximumf %14, %15 : vector<56x128xf32>
    %17 = arith.truncf %16 : vector<56x128xf32> to vector<56x128xbf16>
    %c0_15 = arith.constant 0 : index
    %c0_16 = arith.constant 0 : index
    %18 = vector.load %arg7[%c0_15, %c0_16] : memref<56x128xbf16, #tpu.memory_space<vmem>>, vector<56x128xbf16>
    tpu.vector_store %arg7[%c0_15, %c0_16], %17 {strides = array<i32>} : memref<56x128xbf16, #tpu.memory_space<vmem>>, vector<56x128xbf16>,
    return
  }
  func.func @transform_0(%arg0: i32) -> (i32, i32) {
    %c0_i32 = arith.constant 0 : i32
    %c0_i32_0 = arith.constant 0 : i32
    return %arg0, %c0_i32 : i32, i32
  }
  func.func @transform_1(%arg0: i32) -> (i32, i32) {
    %c0_i32 = arith.constant 0 : i32
    %c0_i32_0 = arith.constant 0 : i32
    return %arg0, %c0_i32 : i32, i32
  }
  func.func @transform_2(%arg0: i32) -> (i32, i32) {
    %c0_i32 = arith.constant 0 : i32
    %c0_i32_0 = arith.constant 0 : i32
    return %arg0, %c0_i32 : i32, i32
  }
  func.func @transform_3(%arg0: i32) -> (i32, i32) {
    %c0_i32 = arith.constant 0 : i32
    %c0_i32_0 = arith.constant 0 : i32
    return %arg0, %c0_i32 : i32, i32
  }
  func.func @transform_4(%arg0: i32) -> (i32, i32) {
    %c0_i32 = arith.constant 0 : i32
    %c0_i32_0 = arith.constant 0 : i32
    %c0_i32_1 = arith.constant 0 : i32
    return %c0_i32, %c0_i32_0 : i32, i32
  }
  func.func @transform_5(%arg0: i32) -> (i32, i32) {
    %c0_i32 = arith.constant 0 : i32
    %c0_i32_0 = arith.constant 0 : i32
    %c0_i32_1 = arith.constant 0 : i32
    return %c0_i32, %c0_i32_0 : i32, i32
  }
  func.func @transform_6(%arg0: i32) -> (i32, i32) {
    %c0_i32 = arith.constant 0 : i32
    %c0_i32_0 = arith.constant 0 : i32
    return %arg0, %c0_i32 : i32, i32
  }
}

module attributes {stable_mosaic.version = 11 : i64} {
  func.func @conv_relu_pool_kernel(%arg0: i32, %arg1: memref<8x512xbf16, #tpu.memory_space<vmem>>, %arg2: memref<8x512xbf16, #tpu.memory_space<vmem>>, %arg3: memref<8x512xbf16, #tpu.memory_space<vmem>>, %arg4: memref<8x512xbf16, #tpu.memory_space<vmem>>, %arg5: memref<512x128xbf16, #tpu.memory_space<vmem>>, %arg6: memref<1x128xf32, #tpu.memory_space<vmem>>, %arg7: memref<8x128xbf16, #tpu.memory_space<vmem>>) attributes {dimension_semantics = [#tpu.dimension_semantics<parallel>], iteration_bounds = array<i64: 1>, scalar_prefetch = 0 : i64, scratch_operands = 0 : i64, tpu.core_type = #tpu.core_type<tc>, window_params = [{transform_indices = @transform_0, window_bounds = array<i64: 8, 512>}, {transform_indices = @transform_1, window_bounds = array<i64: 8, 512>}, {transform_indices = @transform_2, window_bounds = array<i64: 8, 512>}, {transform_indices = @transform_3, window_bounds = array<i64: 8, 512>}, {pipeline_mode = #tpu.pipeline_mode<synchronous>, transform_indices = @transform_4, window_bounds = array<i64: 512, 128>}, {pipeline_mode = #tpu.pipeline_mode<synchronous>, transform_indices = @transform_5, window_bounds = array<i64: 1, 128>}, {transform_indices = @transform_6, window_bounds = array<i64: 8, 128>}]} {
    %c0 = arith.constant 0 : index
    %c0_0 = arith.constant 0 : index
    %0 = vector.load %arg5[%c0, %c0_0] : memref<512x128xbf16, #tpu.memory_space<vmem>>, vector<512x128xbf16>
    %c0_1 = arith.constant 0 : index
    %c0_2 = arith.constant 0 : index
    %1 = vector.load %arg1[%c0_1, %c0_2] : memref<8x512xbf16, #tpu.memory_space<vmem>>, vector<8x512xbf16>
    %cst = arith.constant dense<0.000000e+00> : vector<8x128xf32>
    %2 = tpu.matmul %1, %0, %cst {dimension_numbers = #tpu.dot_dimension_numbers<[1], [0], [0], [1], [0, 0, 1, 1], [], []>} : vector<8x512xbf16>, vector<512x128xbf16>, vector<8x128xf32> -> vector<8x128xf32>
    %c0_3 = arith.constant 0 : index
    %c0_4 = arith.constant 0 : index
    %3 = vector.load %arg2[%c0_3, %c0_4] : memref<8x512xbf16, #tpu.memory_space<vmem>>, vector<8x512xbf16>
    %cst_5 = arith.constant dense<0.000000e+00> : vector<8x128xf32>
    %4 = tpu.matmul %3, %0, %cst_5 {dimension_numbers = #tpu.dot_dimension_numbers<[1], [0], [0], [1], [0, 0, 1, 1], [], []>} : vector<8x512xbf16>, vector<512x128xbf16>, vector<8x128xf32> -> vector<8x128xf32>
    %5 = arith.maximumf %2, %4 : vector<8x128xf32>
    %c0_6 = arith.constant 0 : index
    %c0_7 = arith.constant 0 : index
    %6 = vector.load %arg3[%c0_6, %c0_7] : memref<8x512xbf16, #tpu.memory_space<vmem>>, vector<8x512xbf16>
    %cst_8 = arith.constant dense<0.000000e+00> : vector<8x128xf32>
    %7 = tpu.matmul %6, %0, %cst_8 {dimension_numbers = #tpu.dot_dimension_numbers<[1], [0], [0], [1], [0, 0, 1, 1], [], []>} : vector<8x512xbf16>, vector<512x128xbf16>, vector<8x128xf32> -> vector<8x128xf32>
    %8 = arith.maximumf %5, %7 : vector<8x128xf32>
    %c0_9 = arith.constant 0 : index
    %c0_10 = arith.constant 0 : index
    %9 = vector.load %arg4[%c0_9, %c0_10] : memref<8x512xbf16, #tpu.memory_space<vmem>>, vector<8x512xbf16>
    %cst_11 = arith.constant dense<0.000000e+00> : vector<8x128xf32>
    %10 = tpu.matmul %9, %0, %cst_11 {dimension_numbers = #tpu.dot_dimension_numbers<[1], [0], [0], [1], [0, 0, 1, 1], [], []>} : vector<8x512xbf16>, vector<512x128xbf16>, vector<8x128xf32> -> vector<8x128xf32>
    %11 = arith.maximumf %8, %10 : vector<8x128xf32>
    %c0_12 = arith.constant 0 : index
    %c0_13 = arith.constant 0 : index
    %12 = vector.load %arg6[%c0_12, %c0_13] : memref<1x128xf32, #tpu.memory_space<vmem>>, vector<1x128xf32>
    %13 = vector.broadcast %12 : vector<1x128xf32> to vector<8x128xf32>
    %14 = arith.addf %11, %13 : vector<8x128xf32>
    %cst_14 = arith.constant 0.000000e+00 : f32
    %15 = vector.broadcast %cst_14 : f32 to vector<8x128xf32>
    %16 = arith.maximumf %14, %15 : vector<8x128xf32>
    %17 = arith.truncf %16 : vector<8x128xf32> to vector<8x128xbf16>
    %c0_15 = arith.constant 0 : index
    %c0_16 = arith.constant 0 : index
    %18 = vector.load %arg7[%c0_15, %c0_16] : memref<8x128xbf16, #tpu.memory_space<vmem>>, vector<8x128xbf16>
    tpu.vector_store %arg7[%c0_15, %c0_16], %17 {strides = array<i32>} : memref<8x128xbf16, #tpu.memory_space<vmem>>, vector<8x128xbf16>,
    return
  }
  func.func @transform_0(%arg0: i32) -> (i32, i32) {
    %c0_i32 = arith.constant 0 : i32
    %c0_i32_0 = arith.constant 0 : i32
    return %arg0, %c0_i32 : i32, i32
  }
  func.func @transform_1(%arg0: i32) -> (i32, i32) {
    %c0_i32 = arith.constant 0 : i32
    %c0_i32_0 = arith.constant 0 : i32
    return %arg0, %c0_i32 : i32, i32
  }
  func.func @transform_2(%arg0: i32) -> (i32, i32) {
    %c0_i32 = arith.constant 0 : i32
    %c0_i32_0 = arith.constant 0 : i32
    return %arg0, %c0_i32 : i32, i32
  }
  func.func @transform_3(%arg0: i32) -> (i32, i32) {
    %c0_i32 = arith.constant 0 : i32
    %c0_i32_0 = arith.constant 0 : i32
    return %arg0, %c0_i32 : i32, i32
  }
  func.func @transform_4(%arg0: i32) -> (i32, i32) {
    %c0_i32 = arith.constant 0 : i32
    %c0_i32_0 = arith.constant 0 : i32
    %c0_i32_1 = arith.constant 0 : i32
    return %c0_i32, %c0_i32_0 : i32, i32
  }
  func.func @transform_5(%arg0: i32) -> (i32, i32) {
    %c0_i32 = arith.constant 0 : i32
    %c0_i32_0 = arith.constant 0 : i32
    %c0_i32_1 = arith.constant 0 : i32
    return %c0_i32, %c0_i32_0 : i32, i32
  }
  func.func @transform_6(%arg0: i32) -> (i32, i32) {
    %c0_i32 = arith.constant 0 : i32
    %c0_i32_0 = arith.constant 0 : i32
    return %arg0, %c0_i32 : i32, i32
  }
}

module attributes {stable_mosaic.version = 11 : i64} {
  func.func @gap_fc_kernel(%arg0: memref<2x4x128xbf16, #tpu.memory_space<vmem>>, %arg1: memref<128x128xf32, #tpu.memory_space<vmem>>, %arg2: memref<1x128xf32, #tpu.memory_space<vmem>>, %arg3: memref<2x128xf32, #tpu.memory_space<vmem>>) attributes {dimension_semantics = [], scalar_prefetch = 0 : i64, scratch_operands = 0 : i64, tpu.core_type = #tpu.core_type<tc>} {
    %c0 = arith.constant 0 : index
    %c0_0 = arith.constant 0 : index
    %c0_1 = arith.constant 0 : index
    %0 = vector.load %arg0[%c0, %c0_0, %c0_1] : memref<2x4x128xbf16, #tpu.memory_space<vmem>>, vector<2x4x128xbf16>
    %1 = arith.extf %0 : vector<2x4x128xbf16> to vector<2x4x128xf32>
    %cst = arith.constant dense<0.000000e+00> : vector<2x128xf32>
    %2 = vector.multi_reduction <add>, %1, %cst [1] : vector<2x4x128xf32> to vector<2x128xf32>
    %c0_2 = arith.constant 0 : index
    %c0_3 = arith.constant 0 : index
    %3 = vector.load %arg1[%c0_2, %c0_3] : memref<128x128xf32, #tpu.memory_space<vmem>>, vector<128x128xf32>
    %cst_4 = arith.constant dense<0.000000e+00> : vector<2x128xf32>
    %4 = tpu.matmul %2, %3, %cst_4 {dimension_numbers = #tpu.dot_dimension_numbers<[1], [0], [0], [1], [0, 0, 1, 1], [], []>} : vector<2x128xf32>, vector<128x128xf32>, vector<2x128xf32> -> vector<2x128xf32>
    %c0_5 = arith.constant 0 : index
    %c0_6 = arith.constant 0 : index
    %5 = vector.load %arg2[%c0_5, %c0_6] : memref<1x128xf32, #tpu.memory_space<vmem>>, vector<1x128xf32>
    %6 = vector.broadcast %5 : vector<1x128xf32> to vector<2x128xf32>
    %7 = arith.addf %4, %6 : vector<2x128xf32>
    %c0_7 = arith.constant 0 : index
    %c0_8 = arith.constant 0 : index
    %8 = vector.load %arg3[%c0_7, %c0_8] : memref<2x128xf32, #tpu.memory_space<vmem>>, vector<2x128xf32>
    tpu.vector_store %arg3[%c0_7, %c0_8], %7 {strides = array<i32>} : memref<2x128xf32, #tpu.memory_space<vmem>>, vector<2x128xf32>,
    return
  }
}

</mosaic_0001>

<bundles_post_ra>
// kernel: cnn_forward.5
= control target key start
LH: loop header
LB: loop body
LE: loop exit
PB: predicated region body
PF: predicated region fallthrough
CT: control target
= control target key end

     0   :  { %s3528_s21 = smov 0   ;;  %s4270_s0 = inlined_call_operand.vmem [shape: bf16[1152,128], index: 0, kind: input, shape index: {}]   ;;  %s4271_s1 = inlined_call_operand.vmem [shape: bf16[1152,128], index: 1, kind: input, shape index: {}]   ;;  %s4272_s2 = inlined_call_operand.vmem [shape: bf16[1152,128], index: 2, kind: input, shape index: {}]   ;;  %s4273_s3 = inlined_call_operand.vmem [shape: bf16[1152,128], index: 3, kind: input, shape index: {}]   ;;  %s4274_s4 = inlined_call_operand.vmem [shape: bf16[128,128], index: 4, kind: input, shape index: {}]   ;;  %s4275_s5 = inlined_call_operand.vmem [shape: f32[1,128], index: 5, kind: input, shape index: {}]   ;;  %s4276_s6 = inlined_call_operand.vmem [shape: bf16[1152,128], index: 6, kind: output, shape index: {}]  }
   0x1 LB: > { %s2633_s22 = sadd.s32 4294967295, %s3491_s21   ;;  %p2637_p0 = scmp.ge.s32.totalorder %s3491_s21, 1  ;;  %s3491_s21 = sphi %s3528_s21, %s16_s21  }
   0x2   : > { %p246_p1 = scmp.lt.s32.totalorder %s3491_s21, 4 }
   0x4   : > { %p247_p2 = pnand %p2637_p0, %p246_p1 }
   0x6   : > { %250 = sbr.rel (%p247_p2) target bundleno = 456 (0x1c8), region = 44 }
   0xd   : > { %v3381_v0 = vld [vmem:[%s4274_s4] sm:$0xff]   ;;  %s291_s25 = smul.u32 48, %s2633_s22  ;;  %v3542_v1 = vld [vmem:[%s4274_s4 + $0x8] sm:$0xff]   ;;  %v3549_v2 = vld [vmem:[%s4274_s4 + $0x10] sm:$0xff]  }
   0xe   : > { %3117 = vmatprep.subr.bf16.mxu0 %v3381_v0  ;;  %3181 = vmatprep.subr.bf16.mxu1 %v3381_v0  ;;  %v3558_v3 = vld [vmem:[%s4274_s4 + $0x18] sm:$0xff]   ;;  %v3583_v6 = vld [vmem:[%s4274_s4 + $0x20] sm:$0xff]   ;;  %v3592_v7 = vld [vmem:[%s4274_s4 + $0x28] sm:$0xff]  }
   0xf   : > { %p292_p3 = scmp.lt.s32.totalorder %s291_s25, 143  ;;  %3118 = vmatpush3.bf16.msra.mxu0 %v3381_v0  ;;  %3182 = vmatpush3.bf16.msra.mxu1 %v3381_v0  ;;  %v3601_v8 = vld [vmem:[%s4274_s4 + $0x30] sm:$0xff]   ;;  %v3610_v9 = vld [vmem:[%s4274_s4 + $0x38] sm:$0xff]  }
  0x10   : > { %3119 = vmatprep.subr.bf16.mxu0 %v3542_v1  ;;  %3183 = vmatprep.subr.bf16.mxu1 %v3542_v1 }
  0x11   : > { %s4473_s25 = smov (!%p292_p3, %s291_s25), 143 }
  0x12   : > { %s3551_s30 = sshll.u32 %s4473_s25, 2 }
  0x13   : > { %3120 = vmatpush3.bf16.msra.mxu0 %v3542_v1  ;;  %3184 = vmatpush3.bf16.msra.mxu1 %v3542_v1  ;;  %s3564_s11 = scalar_lea.vmem %s4270_s0, %s3551_s30  ;;  %s3570_s14 = scalar_lea.vmem %s4271_s1, %s3551_s30 }
  0x14   : > { %3121 = vmatprep.subr.bf16.mxu0 %v3549_v2  ;;  %3185 = vmatprep.subr.bf16.mxu1 %v3549_v2  ;;  %v3389_v4 = vld [vmem:[%s3564_s11] sm:$0xff]   ;;  %v3391_v10 = vld [vmem:[%s3564_s11 + $0x8] sm:$0xff]   ;;  %v3393_v12 = vld [vmem:[%s3564_s11 + $0x10] sm:$0xff]   ;;  %s3656_s26 = scalar_lea.vmem %s4272_s2, %s3551_s30  ;;  %s3664_s29 = scalar_lea.vmem %s4273_s3, %s3551_s30 }
  0x15   : > { %v3390_v5 = vld [vmem:[%s3570_s14] sm:$0xff]   ;;  %3133 = vmatprep.mubr.bf16.mxu0 %v3389_v4  ;;  %v3392_v11 = vld [vmem:[%s3570_s14 + $0x8] sm:$0xff]   ;;  %v3394_v13 = vld [vmem:[%s3570_s14 + $0x10] sm:$0xff]  }
  0x16   : > { %3197 = vmatprep.mubr.bf16.mxu1 %v3390_v5  ;;  %v3395_v14 = vld [vmem:[%s3564_s11 + $0x18] sm:$0xff]   ;;  %v3397_v16 = vld [vmem:[%s3564_s11 + $0x20] sm:$0xff]   ;;  %v3399_v18 = vld [vmem:[%s3564_s11 + $0x28] sm:$0xff]  }
  0x17   : > { %3122 = vmatpush3.bf16.msra.mxu0 %v3549_v2  ;;  %3186 = vmatpush3.bf16.msra.mxu1 %v3549_v2  ;;  %v3396_v15 = vld [vmem:[%s3570_s14 + $0x18] sm:$0xff]   ;;  %v3398_v17 = vld [vmem:[%s3570_s14 + $0x20] sm:$0xff]   ;;  %v3400_v19 = vld [vmem:[%s3570_s14 + $0x28] sm:$0xff]  }
  0x18   : > { %3123 = vmatprep.subr.bf16.mxu0 %v3558_v3  ;;  %3187 = vmatprep.subr.bf16.mxu1 %v3558_v3  ;;  %v3401_v20 = vld [vmem:[%s3564_s11 + $0x30] sm:$0xff]   ;;  %v3403_v22 = vld [vmem:[%s3564_s11 + $0x38] sm:$0xff]   ;;  %v3405_v24 = vld [vmem:[%s3564_s11 + $0x40] sm:$0xff]  }
  0x19   : > { %v3402_v21 = vld [vmem:[%s3570_s14 + $0x30] sm:$0xff]   ;;  %v3404_v23 = vld [vmem:[%s3570_s14 + $0x38] sm:$0xff]   ;;  %v3406_v25 = vld [vmem:[%s3570_s14 + $0x40] sm:$0xff]  }
  0x1a   : > { %v3407_v26 = vld [vmem:[%s3564_s11 + $0x48] sm:$0xff]   ;;  %v3409_v28 = vld [vmem:[%s3564_s11 + $0x50] sm:$0xff]   ;;  %v3411_v30 = vld [vmem:[%s3564_s11 + $0x58] sm:$0xff]  }
  0x1b   : > { %3124 = vmatpush3.bf16.msra.mxu0 %v3558_v3  ;;  %3188 = vmatpush3.bf16.msra.mxu1 %v3558_v3  ;;  %v3408_v27 = vld [vmem:[%s3570_s14 + $0x48] sm:$0xff]   ;;  %v3410_v29 = vld [vmem:[%s3570_s14 + $0x50] sm:$0xff]   ;;  %v3412_v31 = vld [vmem:[%s3570_s14 + $0x58] sm:$0xff]  }
  0x1c   : > { %3125 = vmatprep.subr.bf16.mxu0 %v3583_v6  ;;  %3189 = vmatprep.subr.bf16.mxu1 %v3583_v6  ;;  %v3413_v32 = vld [vmem:[%s3564_s11 + $0x60] sm:$0xff]   ;;  %v3415_v34 = vld [vmem:[%s3564_s11 + $0x68] sm:$0xff]   ;;  %v3417_v36 = vld [vmem:[%s3564_s11 + $0x70] sm:$0xff]  }
  0x1d   : > { %v3414_v33 = vld [vmem:[%s3570_s14 + $0x60] sm:$0xff]   ;;  %v3416_v35 = vld [vmem:[%s3570_s14 + $0x68] sm:$0xff]   ;;  %v3418_v37 = vld [vmem:[%s3570_s14 + $0x70] sm:$0xff]  }
  0x1e   : > { %v3419_v38 = vld [vmem:[%s3564_s11 + $0x78] sm:$0xff]   ;;  %v3421_v40 = vld [vmem:[%s3564_s11 + $0x80] sm:$0xff]   ;;  %v3423_v42 = vld [vmem:[%s3564_s11 + $0x88] sm:$0xff]  }
  0x1f   : > { %3126 = vmatpush3.bf16.msra.mxu0 %v3583_v6  ;;  %3190 = vmatpush3.bf16.msra.mxu1 %v3583_v6  ;;  %v3420_v39 = vld [vmem:[%s3570_s14 + $0x78] sm:$0xff]   ;;  %v3422_v41 = vld [vmem:[%s3570_s14 + $0x80] sm:$0xff]   ;;  %v3424_v43 = vld [vmem:[%s3570_s14 + $0x88] sm:$0xff]  }
  0x20   : > { %3127 = vmatprep.subr.bf16.mxu0 %v3592_v7  ;;  %3191 = vmatprep.subr.bf16.mxu1 %v3592_v7  ;;  %v3425_v44 = vld [vmem:[%s3564_s11 + $0x90] sm:$0xff]   ;;  %v3427_v46 = vld [vmem:[%s3564_s11 + $0x98] sm:$0xff]   ;;  %v3429_v48 = vld [vmem:[%s3564_s11 + $0xa0] sm:$0xff]  }
  0x21   : > { %v3426_v45 = vld [vmem:[%s3570_s14 + $0x90] sm:$0xff]   ;;  %v3428_v47 = vld [vmem:[%s3570_s14 + $0x98] sm:$0xff]   ;;  %v3430_v49 = vld [vmem:[%s3570_s14 + $0xa0] sm:$0xff]  }
  0x22   : > { %v3431_v50 = vld [vmem:[%s3564_s11 + $0xa8] sm:$0xff]   ;;  %v3433_v52 = vld [vmem:[%s3564_s11 + $0xb0] sm:$0xff]   ;;  %v3435_v54 = vld [vmem:[%s3564_s11 + $0xb8] sm:$0xff]   ;;  %s4068_s11 = scalar_lea.vmem %s4276_s6, %s3551_s30 }
  0x23   : > { %3128 = vmatpush3.bf16.msra.mxu0 %v3592_v7  ;;  %3192 = vmatpush3.bf16.msra.mxu1 %v3592_v7  ;;  %v3432_v51 = vld [vmem:[%s3570_s14 + $0xa8] sm:$0xff]   ;;  %v3434_v53 = vld [vmem:[%s3570_s14 + $0xb0] sm:$0xff]   ;;  %v3436_v55 = vld [vmem:[%s3570_s14 + $0xb8] sm:$0xff]  }
  0x24   : > { %3129 = vmatprep.subr.bf16.mxu0 %v3601_v8  ;;  %3193 = vmatprep.subr.bf16.mxu1 %v3601_v8  ;;  %v3437_v56 = vld [vmem:[%s3656_s26] sm:$0xff]   ;;  %v3439_v58 = vld [vmem:[%s3656_s26 + $0x8] sm:$0xff]   ;;  %v3441_v60 = vld [vmem:[%s3656_s26 + $0x10] sm:$0xff]  }
  0x25   : > { %v3438_v57 = vld [vmem:[%s3664_s29] sm:$0xff]   ;;  %v3440_v59 = vld [vmem:[%s3664_s29 + $0x8] sm:$0xff]   ;;  %v3442_v61 = vld [vmem:[%s3664_s29 + $0x10] sm:$0xff]  }
  0x26   : > { %v3443_v62 = vld [vmem:[%s3656_s26 + $0x18] sm:$0xff]   ;;  %v3449_v4 = vld [vmem:[%s3656_s26 + $0x30] sm:$0xff]  }
  0x27   : > { %3130 = vmatpush3.bf16.msra.mxu0 %v3601_v8  ;;  %3194 = vmatpush3.bf16.msra.mxu1 %v3601_v8  ;;  %v3444_v63 = vld [vmem:[%s3664_s29 + $0x18] sm:$0xff]   ;;  %v3450_v5 = vld [vmem:[%s3664_s29 + $0x30] sm:$0xff]  }
  0x28   : > { %3131 = vmatprep.subr.bf16.mxu0 %v3610_v9  ;;  %3195 = vmatprep.subr.bf16.mxu1 %v3610_v9 }
  0x2b   : > { %3132 = vmatpush3.bf16.msra.mxu0 %v3610_v9  ;;  %3196 = vmatpush3.bf16.msra.mxu1 %v3610_v9 }
  0x2c   : > { %3245 = vmatprep.subr.bf16.mxu0 %v3381_v0  ;;  %3309 = vmatprep.subr.bf16.mxu1 %v3381_v0 }
  0x2e   : > { %3134 = vmatmul.mubr.bf16.vlgmr.msra.gmra.mrb[0].mxu0 %v3391_v10  ;;  %3198 = vmatmul.mubr.bf16.vlgmr.msra.gmra.mrb[0].mxu1 %v3392_v11  ;;  %v3455_v10 = vld [vmem:[%s3656_s26 + $0x48] sm:$0xff]  }
  0x2f   : > { %3246 = vmatpush3.bf16.msra.mxu0 %v3381_v0  ;;  %3310 = vmatpush3.bf16.msra.mxu1 %v3381_v0  ;;  %v3445_v0 = vld [vmem:[%s3656_s26 + $0x20] sm:$0xff]   ;;  %v3456_v11 = vld [vmem:[%s3664_s29 + $0x48] sm:$0xff]  }
  0x30   : > { %3137 = vmatprep.mubr.bf16.mxu0 %v3393_v12  ;;  %3201 = vmatprep.mubr.bf16.mxu1 %v3394_v13  ;;  %v3457_v12 = vld [vmem:[%s3656_s26 + $0x50] sm:$0xff]  }
  0x31   : > { %3247 = vmatprep.subr.bf16.mxu0 %v3542_v1  ;;  %3311 = vmatprep.subr.bf16.mxu1 %v3542_v1  ;;  %v3458_v13 = vld [vmem:[%s3664_s29 + $0x50] sm:$0xff]  }
  0x33   : > { %3248 = vmatpush3.bf16.msra.mxu0 %v3542_v1  ;;  %3312 = vmatpush3.bf16.msra.mxu1 %v3542_v1  ;;  %v3446_v1 = vld [vmem:[%s3664_s29 + $0x20] sm:$0xff]  }
  0x34   : > { %3249 = vmatprep.subr.bf16.mxu0 %v3549_v2  ;;  %3313 = vmatprep.subr.bf16.mxu1 %v3549_v2 }
  0x36   : > { %3138 = vmatmul.mubr.bf16.gmra.mrb[4].mxu0 %v3395_v14  ;;  %3202 = vmatmul.mubr.bf16.gmra.mrb[4].mxu1 %v3396_v15  ;;  %v3459_v14 = vld [vmem:[%s3656_s26 + $0x58] sm:$0xff]  }
  0x37   : > { %3141 = vmatprep.mubr.bf16.mxu0 %v3397_v16  ;;  %3205 = vmatprep.mubr.bf16.mxu1 %v3398_v17  ;;  %v3460_v15 = vld [vmem:[%s3664_s29 + $0x58] sm:$0xff]   ;;  %v3461_v16 = vld [vmem:[%s3656_s26 + $0x60] sm:$0xff]  }
  0x38   : > { %3250 = vmatpush3.bf16.msra.mxu0 %v3549_v2  ;;  %3314 = vmatpush3.bf16.msra.mxu1 %v3549_v2  ;;  %v3447_v2 = vld [vmem:[%s3656_s26 + $0x28] sm:$0xff]   ;;  %v3462_v17 = vld [vmem:[%s3664_s29 + $0x60] sm:$0xff]  }
  0x39   : > { %3251 = vmatprep.subr.bf16.mxu0 %v3558_v3  ;;  %3315 = vmatprep.subr.bf16.mxu1 %v3558_v3 }
  0x3c   : > { %3252 = vmatpush3.bf16.msra.mxu0 %v3558_v3  ;;  %3316 = vmatpush3.bf16.msra.mxu1 %v3558_v3  ;;  %v3448_v3 = vld [vmem:[%s3664_s29 + $0x28] sm:$0xff]  }
  0x3d   : > { %3253 = vmatprep.subr.bf16.mxu0 %v3583_v6  ;;  %3317 = vmatprep.subr.bf16.mxu1 %v3583_v6 }
  0x3e   : > { %3142 = vmatmul.mubr.bf16.gmra.mrb[8].mxu0 %v3399_v18  ;;  %3206 = vmatmul.mubr.bf16.gmra.mrb[8].mxu1 %v3400_v19  ;;  %v3463_v18 = vld [vmem:[%s3656_s26 + $0x68] sm:$0xff]  }
  0x3f   : > { %3145 = vmatprep.mubr.bf16.mxu0 %v3401_v20  ;;  %3209 = vmatprep.mubr.bf16.mxu1 %v3402_v21  ;;  %v3464_v19 = vld [vmem:[%s3664_s29 + $0x68] sm:$0xff]   ;;  %v3465_v20 = vld [vmem:[%s3656_s26 + $0x70] sm:$0xff]  }
  0x40   : > { %3254 = vmatpush3.bf16.msra.mxu0 %v3583_v6  ;;  %3318 = vmatpush3.bf16.msra.mxu1 %v3583_v6  ;;  %v3451_v6 = vld [vmem:[%s3656_s26 + $0x38] sm:$0xff]   ;;  %v3466_v21 = vld [vmem:[%s3664_s29 + $0x70] sm:$0xff]  }
  0x41   : > { %3255 = vmatprep.subr.bf16.mxu0 %v3592_v7  ;;  %3319 = vmatprep.subr.bf16.mxu1 %v3592_v7 }
  0x44   : > { %3256 = vmatpush3.bf16.msra.mxu0 %v3592_v7  ;;  %3320 = vmatpush3.bf16.msra.mxu1 %v3592_v7  ;;  %v3452_v7 = vld [vmem:[%s3664_s29 + $0x38] sm:$0xff]  }
  0x45   : > { %3257 = vmatprep.subr.bf16.mxu0 %v3601_v8  ;;  %3321 = vmatprep.subr.bf16.mxu1 %v3601_v8 }
  0x46   : > { %3146 = vmatmul.mubr.bf16.gmra.mrb[12].mxu0 %v3403_v22  ;;  %3210 = vmatmul.mubr.bf16.gmra.mrb[12].mxu1 %v3404_v23  ;;  %v3467_v22 = vld [vmem:[%s3656_s26 + $0x78] sm:$0xff]  }
  0x47   : > { %3149 = vmatprep.mubr.bf16.mxu0 %v3405_v24  ;;  %3213 = vmatprep.mubr.bf16.mxu1 %v3406_v25  ;;  %v3468_v23 = vld [vmem:[%s3664_s29 + $0x78] sm:$0xff]   ;;  %v3469_v24 = vld [vmem:[%s3656_s26 + $0x80] sm:$0xff]  }
  0x48   : > { %3258 = vmatpush3.bf16.msra.mxu0 %v3601_v8  ;;  %3322 = vmatpush3.bf16.msra.mxu1 %v3601_v8  ;;  %v3453_v8 = vld [vmem:[%s3656_s26 + $0x40] sm:$0xff]  }
  0x49   : > { %3259 = vmatprep.subr.bf16.mxu0 %v3610_v9  ;;  %3323 = vmatprep.subr.bf16.mxu1 %v3610_v9  ;;  %v3470_v25 = vld [vmem:[%s3664_s29 + $0x80] sm:$0xff]  }
  0x4c   : > { %3260 = vmatpush3.bf16.msra.mxu0 %v3610_v9  ;;  %3324 = vmatpush3.bf16.msra.mxu1 %v3610_v9  ;;  %v3454_v9 = vld [vmem:[%s3664_s29 + $0x40] sm:$0xff]  }
  0x4e   : > { %3150 = vmatmul.mubr.bf16.gmra.mrb[16].mxu0 %v3407_v26  ;;  %3214 = vmatmul.mubr.bf16.gmra.mrb[16].mxu1 %v3408_v27  ;;  %v3471_v26 = vld [vmem:[%s3656_s26 + $0x88] sm:$0xff]  }
  0x4f   : > { %3153 = vmatprep.mubr.bf16.mxu0 %v3409_v28  ;;  %3217 = vmatprep.mubr.bf16.mxu1 %v3410_v29  ;;  %v3472_v27 = vld [vmem:[%s3664_s29 + $0x88] sm:$0xff]   ;;  %v3473_v28 = vld [vmem:[%s3656_s26 + $0x90] sm:$0xff]  }
  0x50   : > { %v3474_v29 = vld [vmem:[%s3664_s29 + $0x90] sm:$0xff]  }
  0x56   : > { %3154 = vmatmul.mubr.bf16.gmra.mrb[20].mxu0 %v3411_v30  ;;  %3218 = vmatmul.mubr.bf16.gmra.mrb[20].mxu1 %v3412_v31  ;;  %v3475_v30 = vld [vmem:[%s3656_s26 + $0x98] sm:$0xff]  }
  0x57   : > { %3157 = vmatprep.mubr.bf16.mxu0 %v3413_v32  ;;  %3221 = vmatprep.mubr.bf16.mxu1 %v3414_v33  ;;  %v3476_v31 = vld [vmem:[%s3664_s29 + $0x98] sm:$0xff]   ;;  %v3477_v32 = vld [vmem:[%s3656_s26 + $0xa0] sm:$0xff]  }
  0x58   : > { %v3478_v33 = vld [vmem:[%s3664_s29 + $0xa0] sm:$0xff]  }
  0x5e   : > { %3158 = vmatmul.mubr.bf16.gmra.mrb[24].mxu0 %v3415_v34  ;;  %3222 = vmatmul.mubr.bf16.gmra.mrb[24].mxu1 %v3416_v35  ;;  %v3479_v34 = vld [vmem:[%s3656_s26 + $0xa8] sm:$0xff]  }
  0x5f   : > { %3161 = vmatprep.mubr.bf16.mxu0 %v3417_v36  ;;  %3225 = vmatprep.mubr.bf16.mxu1 %v3418_v37  ;;  %v3480_v35 = vld [vmem:[%s3664_s29 + $0xa8] sm:$0xff]   ;;  %v3481_v36 = vld [vmem:[%s3656_s26 + $0xb0] sm:$0xff]  }
  0x60   : > { %v3482_v37 = vld [vmem:[%s3664_s29 + $0xb0] sm:$0xff]  }
  0x66   : > { %3162 = vmatmul.mubr.bf16.gmra.mrb[28].mxu0 %v3419_v38  ;;  %3226 = vmatmul.mubr.bf16.gmra.mrb[28].mxu1 %v3420_v39  ;;  %v3483_v38 = vld [vmem:[%s3656_s26 + $0xb8] sm:$0xff]  }
  0x67   : > { %3165 = vmatprep.mubr.bf16.mxu0 %v3421_v40  ;;  %3229 = vmatprep.mubr.bf16.mxu1 %v3422_v41  ;;  %v3484_v39 = vld [vmem:[%s3664_s29 + $0xb8] sm:$0xff]  }
  0x6e   : > { %3166 = vmatmul.mubr.bf16.gmra.mrb[32].mxu0 %v3423_v42  ;;  %3230 = vmatmul.mubr.bf16.gmra.mrb[32].mxu1 %v3424_v43 }
  0x6f   : > { %3169 = vmatprep.mubr.bf16.mxu0 %v3425_v44  ;;  %3233 = vmatprep.mubr.bf16.mxu1 %v3426_v45 }
  0x76   : > { %3170 = vmatmul.mubr.bf16.gmra.mrb[36].mxu0 %v3427_v46  ;;  %3234 = vmatmul.mubr.bf16.gmra.mrb[36].mxu1 %v3428_v47 }
  0x77   : > { %3173 = vmatprep.mubr.bf16.mxu0 %v3429_v48  ;;  %3237 = vmatprep.mubr.bf16.mxu1 %v3430_v49 }
  0x7e   : > { %3174 = vmatmul.mubr.bf16.gmra.mrb[40].mxu0 %v3431_v50  ;;  %3238 = vmatmul.mubr.bf16.gmra.mrb[40].mxu1 %v3432_v51 }
  0x7f   : > { %3177 = vmatprep.mubr.bf16.mxu0 %v3433_v52  ;;  %3241 = vmatprep.mubr.bf16.mxu1 %v3434_v53 }
  0x86   : > { %3178 = vmatmul.mubr.bf16.gmra.mrb[44].mxu0 %v3435_v54  ;;  %3242 = vmatmul.mubr.bf16.gmra.mrb[44].mxu1 %v3436_v55 }
  0x87   : > { %3261 = vmatprep.mubr.bf16.mxu0 %v3437_v56  ;;  %3325 = vmatprep.mubr.bf16.mxu1 %v3438_v57 }
  0x8e   : > { %3262 = vmatmul.mubr.bf16.vlgmr.msra.gmra.mrb[48].mxu0 %v3439_v58  ;;  %3326 = vmatmul.mubr.bf16.vlgmr.msra.gmra.mrb[48].mxu1 %v3440_v59 }
  0x8f   : > { %3265 = vmatprep.mubr.bf16.mxu0 %v3441_v60  ;;  %3329 = vmatprep.mubr.bf16.mxu1 %v3442_v61 }
  0x96   : > { %3266 = vmatmul.mubr.bf16.gmra.mrb[52].mxu0 %v3443_v62  ;;  %3330 = vmatmul.mubr.bf16.gmra.mrb[52].mxu1 %v3444_v63 }
  0x97   : > { %3269 = vmatprep.mubr.bf16.mxu0 %v3445_v0  ;;  %3333 = vmatprep.mubr.bf16.mxu1 %v3446_v1 }
  0x9e   : > { %3270 = vmatmul.mubr.bf16.gmra.mrb[56].mxu0 %v3447_v2  ;;  %3334 = vmatmul.mubr.bf16.gmra.mrb[56].mxu1 %v3448_v3 }
  0x9f   : > { %3273 = vmatprep.mubr.bf16.mxu0 %v3449_v4  ;;  %3337 = vmatprep.mubr.bf16.mxu1 %v3450_v5 }
  0xa6   : > { %3274 = vmatmul.mubr.bf16.gmra.mrb[60].mxu0 %v3451_v6  ;;  %3338 = vmatmul.mubr.bf16.gmra.mrb[60].mxu1 %v3452_v7 }
  0xa7   : > { %3277 = vmatprep.mubr.bf16.mxu0 %v3453_v8  ;;  %3341 = vmatprep.mubr.bf16.mxu1 %v3454_v9 }
  0xae   : > { %3278 = vmatmul.mubr.bf16.gmra.mrb[64].mxu0 %v3455_v10  ;;  %3342 = vmatmul.mubr.bf16.gmra.mrb[64].mxu1 %v3456_v11 }
  0xaf   : > { %3281 = vmatprep.mubr.bf16.mxu0 %v3457_v12  ;;  %3345 = vmatprep.mubr.bf16.mxu1 %v3458_v13 }
  0xb6   : > { %3282 = vmatmul.mubr.bf16.gmra.mrb[68].mxu0 %v3459_v14  ;;  %3346 = vmatmul.mubr.bf16.gmra.mrb[68].mxu1 %v3460_v15 }
  0xb7   : > { %3285 = vmatprep.mubr.bf16.mxu0 %v3461_v16  ;;  %3349 = vmatprep.mubr.bf16.mxu1 %v3462_v17 }
  0xbe   : > { %3286 = vmatmul.mubr.bf16.gmra.mrb[72].mxu0 %v3463_v18  ;;  %3350 = vmatmul.mubr.bf16.gmra.mrb[72].mxu1 %v3464_v19 }
  0xbf   : > { %3289 = vmatprep.mubr.bf16.mxu0 %v3465_v20  ;;  %3353 = vmatprep.mubr.bf16.mxu1 %v3466_v21 }
  0xc6   : > { %3290 = vmatmul.mubr.bf16.gmra.mrb[76].mxu0 %v3467_v22  ;;  %3354 = vmatmul.mubr.bf16.gmra.mrb[76].mxu1 %v3468_v23 }
  0xc7   : > { %3293 = vmatprep.mubr.bf16.mxu0 %v3469_v24  ;;  %3357 = vmatprep.mubr.bf16.mxu1 %v3470_v25 }
  0xce   : > { %3294 = vmatmul.mubr.bf16.gmra.mrb[80].mxu0 %v3471_v26  ;;  %3358 = vmatmul.mubr.bf16.gmra.mrb[80].mxu1 %v3472_v27 }
  0xcf   : > { %3297 = vmatprep.mubr.bf16.mxu0 %v3473_v28  ;;  %3361 = vmatprep.mubr.bf16.mxu1 %v3474_v29 }
  0xd6   : > { %3298 = vmatmul.mubr.bf16.gmra.mrb[84].mxu0 %v3475_v30  ;;  %3362 = vmatmul.mubr.bf16.gmra.mrb[84].mxu1 %v3476_v31 }
  0xd7   : > { %3301 = vmatprep.mubr.bf16.mxu0 %v3477_v32  ;;  %3365 = vmatprep.mubr.bf16.mxu1 %v3478_v33 }
  0xde   : > { %3302 = vmatmul.mubr.bf16.gmra.mrb[88].mxu0 %v3479_v34  ;;  %3366 = vmatmul.mubr.bf16.gmra.mrb[88].mxu1 %v3480_v35 }
  0xdf   : > { %3305 = vmatprep.mubr.bf16.mxu0 %v3481_v36  ;;  %3369 = vmatprep.mubr.bf16.mxu1 %v3482_v37 }
  0xe6   : > { %3306 = vmatmul.mubr.bf16.gmra.mrb[92].mxu0 %v3483_v38  ;;  %3370 = vmatmul.mubr.bf16.gmra.mrb[92].mxu1 %v3484_v39 }
 0x101   : > { %v3752_v40 = vpop.f32.mrb[0].mxu0  ;;  %v3754_v41 = vpop.f32.mrb[0].mxu1 }
 0x102   : > { %v3758_v43 = vpop.f32.mrb[1].mxu0  ;;  %v3760_v44 = vpop.f32.mrb[1].mxu1 }
 0x103   : > { %v3764_v46 = vpop.f32.mrb[2].mxu0  ;;  %v3766_v47 = vpop.f32.mrb[2].mxu1  ;;  %v4376_v35 = vmax.f32 %v3758_v43, %v3760_v44 }
 0x104   : > { %v3770_v49 = vpop.f32.mrb[3].mxu0  ;;  %v3772_v50 = vpop.f32.mrb[3].mxu1 }
 0x109   : > { %v3776_v52 = vpop.f32.mrb[4].mxu0  ;;  %v3778_v53 = vpop.f32.mrb[4].mxu1 }
 0x10a   : > { %v3782_v55 = vpop.f32.mrb[5].mxu0  ;;  %v3784_v56 = vpop.f32.mrb[5].mxu1 }
 0x10b   : > { %v3788_v58 = vpop.f32.mrb[6].mxu0  ;;  %v3790_v59 = vpop.f32.mrb[6].mxu1 }
 0x10c   : > { %v3794_v61 = vpop.f32.mrb[7].mxu0  ;;  %v3796_v62 = vpop.f32.mrb[7].mxu1 }
 0x111   : > { %v3800_v0 = vpop.f32.mrb[8].mxu0  ;;  %v3802_v1 = vpop.f32.mrb[8].mxu1 }
 0x112   : > { %v3806_v3 = vpop.f32.mrb[9].mxu0  ;;  %v3808_v4 = vpop.f32.mrb[9].mxu1 }
 0x113   : > { %v3812_v6 = vpop.f32.mrb[10].mxu0  ;;  %v3814_v7 = vpop.f32.mrb[10].mxu1 }
 0x114   : > { %v3818_v9 = vpop.f32.mrb[11].mxu0  ;;  %v3820_v10 = vpop.f32.mrb[11].mxu1 }
 0x119   : > { %v3824_v12 = vpop.f32.mrb[12].mxu0  ;;  %v3826_v13 = vpop.f32.mrb[12].mxu1 }
 0x11a   : > { %v3830_v15 = vpop.f32.mrb[13].mxu0  ;;  %v3832_v16 = vpop.f32.mrb[13].mxu1 }
 0x11b   : > { %v3836_v18 = vpop.f32.mrb[14].mxu0  ;;  %v3838_v19 = vpop.f32.mrb[14].mxu1 }
 0x11c   : > { %v3842_v21 = vpop.f32.mrb[15].mxu0  ;;  %v3844_v22 = vpop.f32.mrb[15].mxu1 }
 0x121   : > { %v3848_v24 = vpop.f32.mrb[16].mxu0  ;;  %v3850_v25 = vpop.f32.mrb[16].mxu1 }
 0x122   : > { %v3854_v27 = vpop.f32.mrb[17].mxu0  ;;  %v3856_v28 = vpop.f32.mrb[17].mxu1 }
 0x123   : > { %v3860_v30 = vpop.f32.mrb[18].mxu0  ;;  %v3862_v31 = vpop.f32.mrb[18].mxu1 }
 0x124   : > { %v3866_v33 = vpop.f32.mrb[19].mxu0  ;;  %v3868_v34 = vpop.f32.mrb[19].mxu1 }
 0x129   : > { %v3872_v36 = vpop.f32.mrb[20].mxu0  ;;  %v3874_v37 = vpop.f32.mrb[20].mxu1 }
 0x12a   : > { %v3878_v39 = vpop.f32.mrb[21].mxu0  ;;  %v3880_v29 = vpop.f32.mrb[21].mxu1 }
 0x12b   : > { %v3884_v26 = vpop.f32.mrb[22].mxu0  ;;  %v3886_v23 = vpop.f32.mrb[22].mxu1 }
 0x12c   : > { %v3890_v20 = vpop.f32.mrb[23].mxu0  ;;  %v3892_v17 = vpop.f32.mrb[23].mxu1 }
 0x12d   : > { %4326 = vst [vmem:[#allocation2_spill] sm:$0xff] %v3892_v17 }
 0x131   : > { %v3896_v14 = vpop.f32.mrb[24].mxu0  ;;  %v3898_v11 = vpop.f32.mrb[24].mxu1 }
 0x132   : > { %4327 = vst [vmem:[#allocation3_spill] sm:$0xff] %v3896_v14  ;;  %4328 = vst [vmem:[#allocation4_spill] sm:$0xff] %v3898_v11  ;;  %v3902_v8 = vpop.f32.mrb[25].mxu0  ;;  %v3904_v5 = vpop.f32.mrb[25].mxu1 }
 0x133   : > { %4329 = vst [vmem:[#allocation5_spill] sm:$0xff] %v3902_v8  ;;  %4330 = vst [vmem:[#allocation6_spill] sm:$0xff] %v3904_v5  ;;  %v3908_v2 = vpop.f32.mrb[26].mxu0  ;;  %v3910_v63 = vpop.f32.mrb[26].mxu1  ;;  %v4046_v5 = vld [vmem:[%s4275_s5] ss:$0 sm:$0xff] }
 0x134   : > { %4331 = vst [vmem:[#allocation7_spill] sm:$0xff] %v3908_v2  ;;  %4332 = vst [vmem:[#allocation8_spill] sm:$0xff] %v3910_v63  ;;  %v3914_v60 = vpop.f32.mrb[27].mxu0  ;;  %v3916_v57 = vpop.f32.mrb[27].mxu1  ;;  %v4375_v2 = vmax.f32 %v3752_v40, %v3754_v41 }
 0x135   : > { %4333 = vst [vmem:[#allocation9_spill] sm:$0xff] %v3914_v60  ;;  %4334 = vst [vmem:[#allocation10_spill] sm:$0xff] %v3916_v57 }
 0x139   : > { %v3920_v54 = vpop.f32.mrb[28].mxu0  ;;  %v3922_v51 = vpop.f32.mrb[28].mxu1 }
 0x13a   : > { %4335 = vst [vmem:[#allocation11_spill] sm:$0xff] %v3920_v54  ;;  %4336 = vst [vmem:[#allocation12_spill] sm:$0xff] %v3922_v51  ;;  %v3926_v48 = vpop.f32.mrb[29].mxu0  ;;  %v3928_v45 = vpop.f32.mrb[29].mxu1 }
 0x13b   : > { %4337 = vst [vmem:[#allocation13_spill] sm:$0xff] %v3926_v48  ;;  %4338 = vst [vmem:[#allocation14_spill] sm:$0xff] %v3928_v45  ;;  %v3932_v42 = vpop.f32.mrb[30].mxu0  ;;  %v3934_v63 = vpop.f32.mrb[30].mxu1 }
 0x13c   : > { %4339 = vst [vmem:[#allocation15_spill] sm:$0xff] %v3932_v42  ;;  %4340 = vst [vmem:[#allocation16_spill] sm:$0xff] %v3934_v63  ;;  %v3938_v57 = vpop.f32.mrb[31].mxu0  ;;  %v3940_v60 = vpop.f32.mrb[31].mxu1 }
 0x13d   : > { %4341 = vst [vmem:[#allocation17_spill] sm:$0xff] %v3938_v57  ;;  %4342 = vst [vmem:[#allocation18_spill] sm:$0xff] %v3940_v60 }
 0x141   : > { %v3944_v51 = vpop.f32.mrb[32].mxu0  ;;  %v3946_v54 = vpop.f32.mrb[32].mxu1 }
 0x142   : > { %4343 = vst [vmem:[#allocation19_spill] sm:$0xff] %v3944_v51  ;;  %4344 = vst [vmem:[#allocation20_spill] sm:$0xff] %v3946_v54  ;;  %v3950_v45 = vpop.f32.mrb[33].mxu0  ;;  %v3952_v48 = vpop.f32.mrb[33].mxu1 }
 0x143   : > { %4345 = vst [vmem:[#allocation21_spill] sm:$0xff] %v3950_v45  ;;  %4346 = vst [vmem:[#allocation22_spill] sm:$0xff] %v3952_v48  ;;  %v3956_v63 = vpop.f32.mrb[34].mxu0  ;;  %v3958_v42 = vpop.f32.mrb[34].mxu1 }
 0x144   : > { %4347 = vst [vmem:[#allocation23_spill] sm:$0xff] %v3956_v63  ;;  %4348 = vst [vmem:[#allocation24_spill] sm:$0xff] %v3958_v42  ;;  %v3962_v60 = vpop.f32.mrb[35].mxu0  ;;  %v3964_v57 = vpop.f32.mrb[35].mxu1 }
 0x145   : > { %4349 = vst [vmem:[#allocation25_spill] sm:$0xff] %v3962_v60  ;;  %4350 = vst [vmem:[#allocation26_spill] sm:$0xff] %v3964_v57 }
 0x149   : > { %v3968_v54 = vpop.f32.mrb[36].mxu0  ;;  %v3970_v51 = vpop.f32.mrb[36].mxu1 }
 0x14a   : > { %4351 = vst [vmem:[#allocation27_spill] sm:$0xff] %v3968_v54  ;;  %4352 = vst [vmem:[#allocation28_spill] sm:$0xff] %v3970_v51  ;;  %v3974_v48 = vpop.f32.mrb[37].mxu0  ;;  %v3976_v45 = vpop.f32.mrb[37].mxu1 }
 0x14b   : > { %4353 = vst [vmem:[#allocation29_spill] sm:$0xff] %v3974_v48  ;;  %4354 = vst [vmem:[#allocation30_spill] sm:$0xff] %v3976_v45  ;;  %v3980_v42 = vpop.f32.mrb[38].mxu0  ;;  %v3982_v63 = vpop.f32.mrb[38].mxu1 }
 0x14c   : > { %4355 = vst [vmem:[#allocation31_spill] sm:$0xff] %v3980_v42  ;;  %4356 = vst [vmem:[#allocation32_spill] sm:$0xff] %v3982_v63  ;;  %v3986_v57 = vpop.f32.mrb[39].mxu0  ;;  %v3988_v60 = vpop.f32.mrb[39].mxu1 }
 0x14d   : > { %4357 = vst [vmem:[#allocation33_spill] sm:$0xff] %v3986_v57  ;;  %4358 = vst [vmem:[#allocation34_spill] sm:$0xff] %v3988_v60 }
 0x151   : > { %v3992_v51 = vpop.f32.mrb[40].mxu0  ;;  %v3994_v54 = vpop.f32.mrb[40].mxu1 }
 0x152   : > { %4359 = vst [vmem:[#allocation35_spill] sm:$0xff] %v3992_v51  ;;  %4360 = vst [vmem:[#allocation36_spill] sm:$0xff] %v3994_v54  ;;  %v3998_v45 = vpop.f32.mrb[41].mxu0  ;;  %v4000_v48 = vpop.f32.mrb[41].mxu1 }
 0x153   : > { %4361 = vst [vmem:[#allocation37_spill] sm:$0xff] %v3998_v45  ;;  %4362 = vst [vmem:[#allocation38_spill] sm:$0xff] %v4000_v48  ;;  %v4004_v63 = vpop.f32.mrb[42].mxu0  ;;  %v4006_v42 = vpop.f32.mrb[42].mxu1 }
 0x154   : > { %4363 = vst [vmem:[#allocation39_spill] sm:$0xff] %v4004_v63  ;;  %4364 = vst [vmem:[#allocation40_spill] sm:$0xff] %v4006_v42  ;;  %v4010_v60 = vpop.f32.mrb[43].mxu0  ;;  %v4012_v57 = vpop.f32.mrb[43].mxu1 }
 0x155   : > { %4365 = vst [vmem:[#allocation41_spill] sm:$0xff] %v4010_v60  ;;  %4366 = vst [vmem:[#allocation42_spill] sm:$0xff] %v4012_v57 }
 0x159   : > { %v4016_v54 = vpop.f32.mrb[44].mxu0  ;;  %v4018_v51 = vpop.f32.mrb[44].mxu1 }
 0x15a   : > { %4367 = vst [vmem:[#allocation43_spill] sm:$0xff] %v4016_v54  ;;  %4368 = vst [vmem:[#allocation44_spill] sm:$0xff] %v4018_v51  ;;  %v4022_v48 = vpop.f32.mrb[45].mxu0  ;;  %v4024_v45 = vpop.f32.mrb[45].mxu1 }
 0x15b   : > { %4369 = vst [vmem:[#allocation45_spill] sm:$0xff] %v4022_v48  ;;  %4370 = vst [vmem:[#allocation46_spill] sm:$0xff] %v4024_v45  ;;  %v4028_v42 = vpop.f32.mrb[46].mxu0  ;;  %v4030_v63 = vpop.f32.mrb[46].mxu1 }
 0x15c   : > { %4371 = vst [vmem:[#allocation47_spill] sm:$0xff] %v4028_v42  ;;  %4372 = vst [vmem:[#allocation48_spill] sm:$0xff] %v4030_v63  ;;  %v4034_v57 = vpop.f32.mrb[47].mxu0  ;;  %v4036_v60 = vpop.f32.mrb[47].mxu1 }
 0x15d   : > { %4373 = vst [vmem:[#allocation49_spill] sm:$0xff] %v4034_v57  ;;  %4374 = vst [vmem:[#allocation50_spill] sm:$0xff] %v4036_v60  ;;  %v4377_v60 = vmax.f32 %v3764_v46, %v3766_v47 }
 0x161   : > { %v3263_v51 = vpop.f32.mrb[48].mxu0  ;;  %v3327_v54 = vpop.f32.mrb[48].mxu1 }
 0x162   : > { %v1687_v32 = vmax.f32 %v4375_v2, %v3263_v51  ;;  %v1494_v45 = vpop.f32.mrb[49].mxu0  ;;  %v1959_v48 = vpop.f32.mrb[49].mxu1  ;;  %v4378_v2 = vmax.f32 %v3770_v49, %v3772_v50 }
 0x163   : > { %v1685_v63 = vmax.f32 %v4376_v35, %v1494_v45  ;;  %v3264_v42 = vpop.f32.mrb[50].mxu0  ;;  %v3328_v8 = vpop.f32.mrb[50].mxu1 }
 0x164   : > { %v2152_v38 = vmax.f32 %v1687_v32, %v3327_v54  ;;  %v1688_v57 = vmax.f32 %v4377_v60, %v3264_v42  ;;  %v1497_v40 = vpop.f32.mrb[51].mxu0  ;;  %v1962_v41 = vpop.f32.mrb[51].mxu1 }
 0x165   : > { %v2150_v51 = vmax.f32 %v1685_v63, %v1959_v48  ;;  %v1686_v11 = vmax.f32 %v4378_v2, %v1497_v40  ;;  %v4379_v48 = vmax.f32 %v3776_v52, %v3778_v53  ;;  %v4381_v53 = vmax.f32 %v3788_v58, %v3790_v59 }
 0x166   : > { %v2207_v14 = vadd.f32 %v4046_v5, %v2152_v38  ;;  %v2153_v17 = vmax.f32 %v1688_v57, %v3328_v8  ;;  %v4380_v8 = vmax.f32 %v3782_v55, %v3784_v56 }
 0x167   : > { %v2205_v43 = vadd.f32 %v4046_v5, %v2150_v51  ;;  %v2151_v44 = vmax.f32 %v1686_v11, %v1962_v41 }
 0x168   : > { %v2208_v45 = vadd.f32 %v4046_v5, %v2153_v17  ;;  %v2255_v47 = vmax.f32 %v2207_v14, 0.0 }
 0x169   : > { %v2206_v54 = vadd.f32 %v4046_v5, %v2151_v44  ;;  %v3267_v46 = vpop.f32.mrb[52].mxu0  ;;  %v3331_v42 = vpop.f32.mrb[52].mxu1  ;;  %v2253_v32 = vmax.f32 %v2205_v43, 0.0  ;;  %v4382_v43 = vmax.f32 %v3794_v61, %v3796_v62  ;;  %v4383_v61 = vmax.f32 %v3800_v0, %v3802_v1 }
 0x16a   : > { %v2256_v60 = vmax.f32 %v2208_v45, 0.0  ;;  %v1691_v49 = vmax.f32 %v4379_v48, %v3267_v46  ;;  %v1510_v50 = vpop.f32.mrb[53].mxu0  ;;  %v1975_v63 = vpop.f32.mrb[53].mxu1 }
 0x16b   : > { %v2254_v57 = vmax.f32 %v2206_v54, 0.0  ;;  %v1689_v11 = vmax.f32 %v4380_v8, %v1510_v50  ;;  %v3268_v14 = vpop.f32.mrb[54].mxu0  ;;  %v3332_v17 = vpop.f32.mrb[54].mxu1 }
 0x16c   : > { %v2854_v35 = vpack.c.bf16 %v2256_v60, %v2255_v47  ;;  %v2156_v52 = vmax.f32 %v1691_v49, %v3331_v42  ;;  %v1692_v38 = vmax.f32 %v4381_v53, %v3268_v14  ;;  %v1513_v40 = vpop.f32.mrb[55].mxu0  ;;  %v1978_v41 = vpop.f32.mrb[55].mxu1 }
 0x16d   : > { %v2849_v51 = vpack.c.bf16 %v2254_v57, %v2253_v32  ;;  %v2154_v2 = vmax.f32 %v1689_v11, %v1975_v63  ;;  %v1690_v44 = vmax.f32 %v4382_v43, %v1513_v40  ;;  %v4384_v32 = vmax.f32 %v3806_v3, %v3808_v4 }
 0x16e   : > { %2966 = vst [vmem:[%s4068_s11 + $0x8] sm:$0xff] %v2854_v35   ;;  %v2211_v55 = vadd.f32 %v4046_v5, %v2156_v52  ;;  %v2157_v56 = vmax.f32 %v1692_v38, %v3332_v17  ;;  %v4385_v35 = vmax.f32 %v3812_v6, %v3814_v7  ;;  %v4386_v40 = vmax.f32 %v3818_v9, %v3820_v10 }
 0x16f   : > { %2850 = vst [vmem:[%s4068_s11] sm:$0xff] %v2849_v51   ;;  %v2209_v45 = vadd.f32 %v4046_v5, %v2154_v2  ;;  %v2155_v54 = vmax.f32 %v1690_v44, %v1978_v41  ;;  %v4387_v9 = vmax.f32 %v3824_v12, %v3826_v13 }
 0x170   : > { %v2212_v46 = vadd.f32 %v4046_v5, %v2157_v56  ;;  %v2259_v47 = vmax.f32 %v2211_v55, 0.0 }
 0x171   : > { %v2210_v58 = vadd.f32 %v4046_v5, %v2155_v54  ;;  %v3271_v59 = vpop.f32.mrb[56].mxu0  ;;  %v3335_v42 = vpop.f32.mrb[56].mxu1  ;;  %v2257_v50 = vmax.f32 %v2209_v45, 0.0 }
 0x172   : > { %v2260_v60 = vmax.f32 %v2212_v46, 0.0  ;;  %v1695_v62 = vmax.f32 %v4383_v61, %v3271_v59  ;;  %v1526_v48 = vpop.f32.mrb[57].mxu0  ;;  %v1991_v49 = vpop.f32.mrb[57].mxu1  ;;  %v4388_v59 = vmax.f32 %v3830_v15, %v3832_v16 }
 0x173   : > { %v2258_v63 = vmax.f32 %v2210_v58, 0.0  ;;  %v1693_v57 = vmax.f32 %v4384_v32, %v1526_v48  ;;  %v3272_v8 = vpop.f32.mrb[58].mxu0  ;;  %v3336_v11 = vpop.f32.mrb[58].mxu1  ;;  %v4389_v48 = vmax.f32 %v3836_v18, %v3838_v19  ;;  %v4390_v32 = vmax.f32 %v3842_v21, %v3844_v22 }
 0x174   : > { %v2864_v14 = vpack.c.bf16 %v2260_v60, %v2259_v47  ;;  %v2160_v17 = vmax.f32 %v1695_v62, %v3335_v42  ;;  %v1696_v52 = vmax.f32 %v4385_v35, %v3272_v8  ;;  %v1529_v0 = vpop.f32.mrb[59].mxu0  ;;  %v1994_v1 = vpop.f32.mrb[59].mxu1  ;;  %v4391_v21 = vmax.f32 %v3848_v24, %v3850_v25 }
 0x175   : > { %v2859_v53 = vpack.c.bf16 %v2258_v63, %v2257_v50  ;;  %v2158_v38 = vmax.f32 %v1693_v57, %v1991_v49  ;;  %v1694_v41 = vmax.f32 %v4386_v40, %v1529_v0  ;;  %v4392_v40 = vmax.f32 %v3854_v27, %v3856_v28 }
 0x176   : > { %2968 = vst [vmem:[%s4068_s11 + $0x18] sm:$0xff] %v2864_v14   ;;  %v2215_v3 = vadd.f32 %v4046_v5, %v2160_v17  ;;  %v2161_v4 = vmax.f32 %v1696_v52, %v3336_v11 }
 0x177   : > { %2967 = vst [vmem:[%s4068_s11 + $0x10] sm:$0xff] %v2859_v53   ;;  %v2213_v51 = vadd.f32 %v4046_v5, %v2158_v38  ;;  %v2159_v2 = vmax.f32 %v1694_v41, %v1994_v1 }
 0x178   : > { %v2216_v43 = vadd.f32 %v4046_v5, %v2161_v4  ;;  %v2263_v55 = vmax.f32 %v2215_v3, 0.0 }
 0x179   : > { %v2214_v6 = vadd.f32 %v4046_v5, %v2159_v2  ;;  %v3275_v7 = vpop.f32.mrb[60].mxu0  ;;  %v3339_v44 = vpop.f32.mrb[60].mxu1  ;;  %v2261_v46 = vmax.f32 %v2213_v51, 0.0 }
 0x17a   : > { %v2264_v56 = vmax.f32 %v2216_v43, 0.0  ;;  %v1699_v10 = vmax.f32 %v4387_v9, %v3275_v7  ;;  %v1542_v45 = vpop.f32.mrb[61].mxu0  ;;  %v2007_v54 = vpop.f32.mrb[61].mxu1  ;;  %v4393_v43 = vmax.f32 %v3860_v30, %v3862_v31 }
 0x17b   : > { %v2262_v58 = vmax.f32 %v2214_v6, 0.0  ;;  %v1697_v42 = vmax.f32 %v4388_v59, %v1542_v45  ;;  %v3276_v47 = vpop.f32.mrb[62].mxu0  ;;  %v3340_v60 = vpop.f32.mrb[62].mxu1 }
 0x17c   : > { %v2874_v61 = vpack.c.bf16 %v2264_v56, %v2263_v55  ;;  %v2164_v62 = vmax.f32 %v1699_v10, %v3339_v44  ;;  %v1700_v49 = vmax.f32 %v4389_v48, %v3276_v47  ;;  %v1545_v12 = vpop.f32.mrb[63].mxu0  ;;  %v2010_v13 = vpop.f32.mrb[63].mxu1  ;;  %v4394_v55 = vmax.f32 %v3866_v33, %v3868_v34 }
 0x17d   : > { %v2869_v50 = vpack.c.bf16 %v2262_v58, %v2261_v46  ;;  %v2162_v63 = vmax.f32 %v1697_v42, %v2007_v54  ;;  %v1698_v57 = vmax.f32 %v4390_v32, %v1545_v12  ;;  %v4395_v33 = vmax.f32 %v3872_v36, %v3874_v37 }
 0x17e   : > { %2970 = vst [vmem:[%s4068_s11 + $0x28] sm:$0xff] %v2874_v61   ;;  %v2219_v15 = vadd.f32 %v4046_v5, %v2164_v62  ;;  %v2165_v16 = vmax.f32 %v1700_v49, %v3340_v60  ;;  %v4396_v61 = vmax.f32 %v3878_v39, %v3880_v29 }
 0x17f   : > { %2969 = vst [vmem:[%s4068_s11 + $0x20] sm:$0xff] %v2869_v50   ;;  %v2217_v8 = vadd.f32 %v4046_v5, %v2162_v63  ;;  %v2163_v11 = vmax.f32 %v1698_v57, %v2010_v13  ;;  %v4397_v50 = vmax.f32 %v3884_v26, %v3886_v23 }
 0x180   : > { %v2220_v14 = vadd.f32 %v4046_v5, %v2165_v16  ;;  %v2267_v35 = vmax.f32 %v2219_v15, 0.0  ;;  %v4398_v15 = vld [vmem:[#allocation2_spill] sm:$0xff] }
 0x181   : > { %v2218_v18 = vadd.f32 %v4046_v5, %v2163_v11  ;;  %v3279_v19 = vpop.f32.mrb[64].mxu0  ;;  %v3343_v17 = vpop.f32.mrb[64].mxu1  ;;  %v2265_v53 = vmax.f32 %v2217_v8, 0.0  ;;  %v4399_v16 = vmax.f32 %v3890_v20, %v4398_v15 }
 0x182   : > { %v2268_v52 = vmax.f32 %v2220_v14, 0.0  ;;  %v1703_v22 = vmax.f32 %v4391_v21, %v3279_v19  ;;  %v1558_v0 = vpop.f32.mrb[65].mxu0  ;;  %v2023_v1 = vpop.f32.mrb[65].mxu1  ;;  %v4401_v21 = vld [vmem:[#allocation4_spill] sm:$0xff] }
 0x183   : > { %v2266_v38 = vmax.f32 %v2218_v18, 0.0  ;;  %v1701_v41 = vmax.f32 %v4392_v40, %v1558_v0  ;;  %v3280_v3 = vpop.f32.mrb[66].mxu0  ;;  %v3344_v4 = vpop.f32.mrb[66].mxu1  ;;  %v4403_v40 = vld [vmem:[#allocation5_spill] sm:$0xff] }
 0x184   : > { %v2884_v51 = vpack.c.bf16 %v2268_v52, %v2267_v35  ;;  %v2168_v2 = vmax.f32 %v1703_v22, %v3343_v17  ;;  %v1704_v6 = vmax.f32 %v4393_v43, %v3280_v3  ;;  %v1561_v24 = vpop.f32.mrb[67].mxu0  ;;  %v2026_v25 = vpop.f32.mrb[67].mxu1  ;;  %v4400_v52 = vld [vmem:[#allocation3_spill] sm:$0xff] }
 0x185   : > { %v2879_v7 = vpack.c.bf16 %v2266_v38, %v2265_v53  ;;  %v2166_v44 = vmax.f32 %v1701_v41, %v2023_v1  ;;  %v1702_v56 = vmax.f32 %v4394_v55, %v1561_v24  ;;  %v4402_v20 = vmax.f32 %v4400_v52, %v4401_v21  ;;  %v4404_v41 = vld [vmem:[#allocation6_spill] sm:$0xff]  ;;  %v4406_v24 = vld [vmem:[#allocation7_spill] sm:$0xff] }
 0x186   : > { %2972 = vst [vmem:[%s4068_s11 + $0x38] sm:$0xff] %v2884_v51   ;;  %v2223_v27 = vadd.f32 %v4046_v5, %v2168_v2  ;;  %v2169_v28 = vmax.f32 %v1704_v6, %v3344_v4  ;;  %v4405_v3 = vmax.f32 %v4403_v40, %v4404_v41  ;;  %v4422_v52 = vld [vmem:[#allocation18_spill] sm:$0xff] }
 0x187   : > { %2971 = vst [vmem:[%s4068_s11 + $0x30] sm:$0xff] %v2879_v7   ;;  %v2221_v9 = vadd.f32 %v4046_v5, %v2166_v44  ;;  %v2167_v10 = vmax.f32 %v1702_v56, %v2026_v25  ;;  %v4407_v25 = vld [vmem:[#allocation8_spill] sm:$0xff] }
 0x188   : > { %v2224_v45 = vadd.f32 %v4046_v5, %v2169_v28  ;;  %v2271_v46 = vmax.f32 %v2223_v27, 0.0  ;;  %v4408_v7 = vmax.f32 %v4406_v24, %v4407_v25 }
 0x189   : > { %v2222_v30 = vadd.f32 %v4046_v5, %v2167_v10  ;;  %v3283_v31 = vpop.f32.mrb[68].mxu0  ;;  %v3347_v54 = vpop.f32.mrb[68].mxu1  ;;  %v2269_v47 = vmax.f32 %v2221_v9, 0.0  ;;  %v4409_v9 = vld [vmem:[#allocation9_spill] sm:$0xff]  ;;  %v4410_v10 = vld [vmem:[#allocation10_spill] sm:$0xff] }
 0x18a   : > { %v2272_v58 = vmax.f32 %v2224_v45, 0.0  ;;  %v1707_v34 = vmax.f32 %v4395_v33, %v3283_v31  ;;  %v1574_v59 = vpop.f32.mrb[69].mxu0  ;;  %v2039_v42 = vpop.f32.mrb[69].mxu1  ;;  %v4411_v45 = vmax.f32 %v4409_v9, %v4410_v10 }
 0x18b   : > { %v2270_v60 = vmax.f32 %v2222_v30, 0.0  ;;  %v1705_v62 = vmax.f32 %v4396_v61, %v1574_v59  ;;  %v3284_v48 = vpop.f32.mrb[70].mxu0  ;;  %v3348_v49 = vpop.f32.mrb[70].mxu1  ;;  %v4412_v61 = vld [vmem:[#allocation11_spill] sm:$0xff] }
 0x18c   : > { %v2894_v12 = vpack.c.bf16 %v2272_v58, %v2271_v46  ;;  %v2172_v13 = vmax.f32 %v1707_v34, %v3347_v54  ;;  %v1708_v63 = vmax.f32 %v4397_v50, %v3284_v48  ;;  %v1577_v36 = vpop.f32.mrb[71].mxu0  ;;  %v2042_v37 = vpop.f32.mrb[71].mxu1 }
 0x18d   : > { %v2889_v32 = vpack.c.bf16 %v2270_v60, %v2269_v47  ;;  %v2170_v57 = vmax.f32 %v1705_v62, %v2039_v42  ;;  %v1706_v8 = vmax.f32 %v4399_v16, %v1577_v36  ;;  %v4413_v62 = vld [vmem:[#allocation12_spill] sm:$0xff]  ;;  %v4415_v36 = vld [vmem:[#allocation13_spill] sm:$0xff] }
 0x18e   : > { %2974 = vst [vmem:[%s4068_s11 + $0x48] sm:$0xff] %v2894_v12   ;;  %v2227_v29 = vadd.f32 %v4046_v5, %v2172_v13  ;;  %v2173_v39 = vmax.f32 %v1708_v63, %v3348_v49  ;;  %v4414_v48 = vmax.f32 %v4412_v61, %v4413_v62  ;;  %v4434_v61 = vld [vmem:[#allocation26_spill] sm:$0xff] }
 0x18f   : > { %2973 = vst [vmem:[%s4068_s11 + $0x40] sm:$0xff] %v2889_v32   ;;  %v2225_v11 = vadd.f32 %v4046_v5, %v2170_v57  ;;  %v2171_v14 = vmax.f32 %v1706_v8, %v2042_v37  ;;  %v4416_v37 = vld [vmem:[#allocation14_spill] sm:$0xff] }
 0x190   : > { %v2228_v18 = vadd.f32 %v4046_v5, %v2173_v39  ;;  %v2275_v17 = vmax.f32 %v2227_v29, 0.0  ;;  %v4417_v32 = vmax.f32 %v4415_v36, %v4416_v37  ;;  %v4418_v39 = vld [vmem:[#allocation15_spill] sm:$0xff] }
 0x191   : > { %v2226_v23 = vadd.f32 %v4046_v5, %v2171_v14  ;;  %v3287_v26 = vpop.f32.mrb[72].mxu0  ;;  %v3351_v19 = vpop.f32.mrb[72].mxu1  ;;  %v2273_v53 = vmax.f32 %v2225_v11, 0.0  ;;  %v4419_v11 = vld [vmem:[#allocation16_spill] sm:$0xff] }
 0x192   : > { %v2276_v35 = vmax.f32 %v2228_v18, 0.0  ;;  %v1711_v22 = vmax.f32 %v4402_v20, %v3287_v26  ;;  %v1590_v0 = vpop.f32.mrb[73].mxu0  ;;  %v2055_v1 = vpop.f32.mrb[73].mxu1  ;;  %v4420_v14 = vmax.f32 %v4418_v39, %v4419_v11 }
 0x193   : > { %v2274_v38 = vmax.f32 %v2226_v23, 0.0  ;;  %v1709_v4 = vmax.f32 %v4405_v3, %v1590_v0  ;;  %v3288_v51 = vpop.f32.mrb[74].mxu0  ;;  %v3352_v2 = vpop.f32.mrb[74].mxu1 }
 0x194   : > { %v2904_v43 = vpack.c.bf16 %v2276_v35, %v2275_v17  ;;  %v2176_v6 = vmax.f32 %v1711_v22, %v3351_v19  ;;  %v1712_v44 = vmax.f32 %v4408_v7, %v3288_v51  ;;  %v1593_v55 = vpop.f32.mrb[75].mxu0  ;;  %v2058_v56 = vpop.f32.mrb[75].mxu1  ;;  %v4421_v35 = vld [vmem:[#allocation17_spill] sm:$0xff] }
 0x195   : > { %v2899_v27 = vpack.c.bf16 %v2274_v38, %v2273_v53  ;;  %v2174_v28 = vmax.f32 %v1709_v4, %v2055_v1  ;;  %v1710_v30 = vmax.f32 %v4411_v45, %v1593_v55  ;;  %v4423_v21 = vmax.f32 %v4421_v35, %v4422_v52 }
 0x196   : > { %2976 = vst [vmem:[%s4068_s11 + $0x58] sm:$0xff] %v2904_v43   ;;  %v2231_v31 = vadd.f32 %v4046_v5, %v2176_v6  ;;  %v2177_v54 = vmax.f32 %v1712_v44, %v3352_v2  ;;  %v4424_v2 = vld [vmem:[#allocation19_spill] sm:$0xff]  ;;  %v4425_v43 = vld [vmem:[#allocation20_spill] sm:$0xff] }
 0x197   : > { %2975 = vst [vmem:[%s4068_s11 + $0x50] sm:$0xff] %v2899_v27   ;;  %v2229_v46 = vadd.f32 %v4046_v5, %v2174_v28  ;;  %v2175_v58 = vmax.f32 %v1710_v30, %v2058_v56  ;;  %v4426_v6 = vmax.f32 %v4424_v2, %v4425_v43  ;;  %v4427_v56 = vld [vmem:[#allocation21_spill] sm:$0xff]  ;;  %v4428_v27 = vld [vmem:[#allocation22_spill] sm:$0xff] }
 0x198   : > { %v2232_v33 = vadd.f32 %v4046_v5, %v2177_v54  ;;  %v2279_v47 = vmax.f32 %v2231_v31, 0.0  ;;  %v4429_v28 = vmax.f32 %v4427_v56, %v4428_v27  ;;  %v4430_v54 = vld [vmem:[#allocation23_spill] sm:$0xff]  ;;  %v4446_v2 = vld [vmem:[#allocation34_spill] sm:$0xff] }
 0x199   : > { %v2230_v34 = vadd.f32 %v4046_v5, %v2175_v58  ;;  %v3291_v59 = vpop.f32.mrb[76].mxu0  ;;  %v3355_v42 = vpop.f32.mrb[76].mxu1  ;;  %v2277_v50 = vmax.f32 %v2229_v46, 0.0  ;;  %v4431_v46 = vld [vmem:[#allocation24_spill] sm:$0xff] }
 0x19a   : > { %v2280_v60 = vmax.f32 %v2232_v33, 0.0  ;;  %v1715_v49 = vmax.f32 %v4414_v48, %v3291_v59  ;;  %v1606_v12 = vpop.f32.mrb[77].mxu0  ;;  %v2071_v13 = vpop.f32.mrb[77].mxu1  ;;  %v4432_v58 = vmax.f32 %v4430_v54, %v4431_v46 }
 0x19b   : > { %v2278_v63 = vmax.f32 %v2230_v34, 0.0  ;;  %v1713_v57 = vmax.f32 %v4417_v32, %v1606_v12  ;;  %v3292_v15 = vpop.f32.mrb[78].mxu0  ;;  %v3356_v16 = vpop.f32.mrb[78].mxu1 }
 0x19c   : > { %v2914_v8 = vpack.c.bf16 %v2280_v60, %v2279_v47  ;;  %v2180_v29 = vmax.f32 %v1715_v49, %v3355_v42  ;;  %v1716_v18 = vmax.f32 %v4420_v14, %v3292_v15  ;;  %v1609_v23 = vpop.f32.mrb[79].mxu0  ;;  %v2074_v26 = vpop.f32.mrb[79].mxu1  ;;  %v4433_v60 = vld [vmem:[#allocation25_spill] sm:$0xff] }
 0x19d   : > { %v2909_v19 = vpack.c.bf16 %v2278_v63, %v2277_v50  ;;  %v2178_v17 = vmax.f32 %v1713_v57, %v2071_v13  ;;  %v1714_v20 = vmax.f32 %v4423_v21, %v1609_v23  ;;  %v4435_v62 = vmax.f32 %v4433_v60, %v4434_v61 }
 0x19e   : > { %2978 = vst [vmem:[%s4068_s11 + $0x68] sm:$0xff] %v2914_v8   ;;  %v2235_v22 = vadd.f32 %v4046_v5, %v2180_v29  ;;  %v2181_v0 = vmax.f32 %v1716_v18, %v3356_v16  ;;  %v4436_v16 = vld [vmem:[#allocation27_spill] sm:$0xff]  ;;  %v4437_v8 = vld [vmem:[#allocation28_spill] sm:$0xff] }
 0x19f   : > { %2977 = vst [vmem:[%s4068_s11 + $0x60] sm:$0xff] %v2909_v19   ;;  %v2233_v1 = vadd.f32 %v4046_v5, %v2178_v17  ;;  %v2179_v53 = vmax.f32 %v1714_v20, %v2074_v26  ;;  %v4438_v29 = vmax.f32 %v4436_v16, %v4437_v8  ;;  %v4439_v26 = vld [vmem:[#allocation29_spill] sm:$0xff]  ;;  %v4440_v19 = vld [vmem:[#allocation30_spill] sm:$0xff] }
 0x1a0   : > { %v2236_v38 = vadd.f32 %v4046_v5, %v2181_v0  ;;  %v2283_v4 = vmax.f32 %v2235_v22, 0.0  ;;  %v4441_v17 = vmax.f32 %v4439_v26, %v4440_v19  ;;  %v4442_v0 = vld [vmem:[#allocation31_spill] sm:$0xff]  ;;  %v4458_v16 = vld [vmem:[#allocation42_spill] sm:$0xff] }
 0x1a1   : > { %v2234_v40 = vadd.f32 %v4046_v5, %v2179_v53  ;;  %v3295_v41 = vpop.f32.mrb[80].mxu0  ;;  %v3359_v3 = vpop.f32.mrb[80].mxu1  ;;  %v2281_v44 = vmax.f32 %v2233_v1, 0.0  ;;  %v4443_v1 = vld [vmem:[#allocation32_spill] sm:$0xff] }
 0x1a2   : > { %v2284_v51 = vmax.f32 %v2236_v38, 0.0  ;;  %v1719_v24 = vmax.f32 %v4426_v6, %v3295_v41  ;;  %v1622_v25 = vpop.f32.mrb[81].mxu0  ;;  %v2087_v7 = vpop.f32.mrb[81].mxu1  ;;  %v4444_v53 = vmax.f32 %v4442_v0, %v4443_v1 }
 0x1a3   : > { %v2282_v55 = vmax.f32 %v2234_v40, 0.0  ;;  %v1717_v9 = vmax.f32 %v4429_v28, %v1622_v25  ;;  %v3296_v10 = vpop.f32.mrb[82].mxu0  ;;  %v3360_v45 = vpop.f32.mrb[82].mxu1 }
 0x1a4   : > { %v2924_v30 = vpack.c.bf16 %v2284_v51, %v2283_v4  ;;  %v2184_v31 = vmax.f32 %v1719_v24, %v3359_v3  ;;  %v1720_v33 = vmax.f32 %v4432_v58, %v3296_v10  ;;  %v1625_v34 = vpop.f32.mrb[83].mxu0  ;;  %v2090_v59 = vpop.f32.mrb[83].mxu1  ;;  %v4445_v51 = vld [vmem:[#allocation33_spill] sm:$0xff] }
 0x1a5   : > { %v2919_v42 = vpack.c.bf16 %v2282_v55, %v2281_v44  ;;  %v2182_v47 = vmax.f32 %v1717_v9, %v2087_v7  ;;  %v1718_v48 = vmax.f32 %v4435_v62, %v1625_v34  ;;  %v4447_v43 = vmax.f32 %v4445_v51, %v4446_v2 }
 0x1a6   : > { %2980 = vst [vmem:[%s4068_s11 + $0x78] sm:$0xff] %v2924_v30   ;;  %v2239_v49 = vadd.f32 %v4046_v5, %v2184_v31  ;;  %v2185_v12 = vmax.f32 %v1720_v33, %v3360_v45  ;;  %v4448_v45 = vld [vmem:[#allocation35_spill] sm:$0xff]  ;;  %v4449_v30 = vld [vmem:[#allocation36_spill] sm:$0xff] }
 0x1a7   : > { %2979 = vst [vmem:[%s4068_s11 + $0x70] sm:$0xff] %v2919_v42   ;;  %v2237_v13 = vadd.f32 %v4046_v5, %v2182_v47  ;;  %v2183_v50 = vmax.f32 %v1718_v48, %v2090_v59  ;;  %v4450_v31 = vmax.f32 %v4448_v45, %v4449_v30  ;;  %v4451_v59 = vld [vmem:[#allocation37_spill] sm:$0xff]  ;;  %v4452_v42 = vld [vmem:[#allocation38_spill] sm:$0xff] }
 0x1a8   : > { %v2240_v63 = vadd.f32 %v4046_v5, %v2185_v12  ;;  %v2287_v57 = vmax.f32 %v2239_v49, 0.0  ;;  %v4453_v47 = vmax.f32 %v4451_v59, %v4452_v42  ;;  %v4454_v12 = vld [vmem:[#allocation39_spill] sm:$0xff]  ;;  %v4470_v45 = vld [vmem:[#allocation50_spill] sm:$0xff] }
 0x1a9   : > { %v2238_v36 = vadd.f32 %v4046_v5, %v2183_v50  ;;  %v3299_v37 = vpop.f32.mrb[84].mxu0  ;;  %v3363_v32 = vpop.f32.mrb[84].mxu1  ;;  %v2285_v18 = vmax.f32 %v2237_v13, 0.0  ;;  %v4455_v13 = vld [vmem:[#allocation40_spill] sm:$0xff] }
 0x1aa   : > { %v2288_v15 = vmax.f32 %v2240_v63, 0.0  ;;  %v1723_v39 = vmax.f32 %v4438_v29, %v3299_v37  ;;  %v1638_v11 = vpop.f32.mrb[85].mxu0  ;;  %v2103_v14 = vpop.f32.mrb[85].mxu1  ;;  %v4456_v50 = vmax.f32 %v4454_v12, %v4455_v13 }
 0x1ab   : > { %v2286_v23 = vmax.f32 %v2238_v36, 0.0  ;;  %v1721_v35 = vmax.f32 %v4441_v17, %v1638_v11  ;;  %v3300_v52 = vpop.f32.mrb[86].mxu0  ;;  %v3364_v21 = vpop.f32.mrb[86].mxu1 }
 0x1ac   : > { %v2934_v20 = vpack.c.bf16 %v2288_v15, %v2287_v57  ;;  %v2188_v22 = vmax.f32 %v1723_v39, %v3363_v32  ;;  %v1724_v38 = vmax.f32 %v4444_v53, %v3300_v52  ;;  %v1641_v40 = vpop.f32.mrb[87].mxu0  ;;  %v2106_v41 = vpop.f32.mrb[87].mxu1  ;;  %v4457_v15 = vld [vmem:[#allocation41_spill] sm:$0xff] }
 0x1ad   : > { %v2929_v3 = vpack.c.bf16 %v2286_v23, %v2285_v18  ;;  %v2186_v4 = vmax.f32 %v1721_v35, %v2103_v14  ;;  %v1722_v6 = vmax.f32 %v4447_v43, %v1641_v40  ;;  %v4459_v8 = vmax.f32 %v4457_v15, %v4458_v16 }
 0x1ae   : > { %2982 = vst [vmem:[%s4068_s11 + $0x88] sm:$0xff] %v2934_v20   ;;  %v2243_v24 = vadd.f32 %v4046_v5, %v2188_v22  ;;  %v2189_v25 = vmax.f32 %v1724_v38, %v3364_v21  ;;  %v4460_v21 = vld [vmem:[#allocation43_spill] sm:$0xff]  ;;  %v4461_v20 = vld [vmem:[#allocation44_spill] sm:$0xff] }
 0x1af   : > { %2981 = vst [vmem:[%s4068_s11 + $0x80] sm:$0xff] %v2929_v3   ;;  %v2241_v7 = vadd.f32 %v4046_v5, %v2186_v4  ;;  %v2187_v44 = vmax.f32 %v1722_v6, %v2106_v41  ;;  %v4462_v22 = vmax.f32 %v4460_v21, %v4461_v20  ;;  %v4463_v41 = vld [vmem:[#allocation45_spill] sm:$0xff]  ;;  %v4464_v3 = vld [vmem:[#allocation46_spill] sm:$0xff] }
 0x1b0   : > { %v2244_v55 = vadd.f32 %v4046_v5, %v2189_v25  ;;  %v2291_v9 = vmax.f32 %v2243_v24, 0.0  ;;  %v4465_v4 = vmax.f32 %v4463_v41, %v4464_v3  ;;  %v4466_v25 = vld [vmem:[#allocation47_spill] sm:$0xff] }
 0x1b1   : > { %v2242_v56 = vadd.f32 %v4046_v5, %v2187_v44  ;;  %v3303_v27 = vpop.f32.mrb[88].mxu0  ;;  %v3367_v28 = vpop.f32.mrb[88].mxu1  ;;  %v2289_v33 = vmax.f32 %v2241_v7, 0.0  ;;  %v4467_v7 = vld [vmem:[#allocation48_spill] sm:$0xff] }
 0x1b2   : > { %v2292_v10 = vmax.f32 %v2244_v55, 0.0  ;;  %v1727_v54 = vmax.f32 %v4450_v31, %v3303_v27  ;;  %v1654_v46 = vpop.f32.mrb[89].mxu0  ;;  %v2119_v58 = vpop.f32.mrb[89].mxu1  ;;  %v4468_v44 = vmax.f32 %v4466_v25, %v4467_v7 }
 0x1b3   : > { %v2290_v34 = vmax.f32 %v2242_v56, 0.0  ;;  %v1725_v60 = vmax.f32 %v4453_v47, %v1654_v46  ;;  %v3304_v61 = vpop.f32.mrb[90].mxu0  ;;  %v3368_v62 = vpop.f32.mrb[90].mxu1 }
 0x1b4   : > { %v2944_v48 = vpack.c.bf16 %v2292_v10, %v2291_v9  ;;  %v2192_v49 = vmax.f32 %v1727_v54, %v3367_v28  ;;  %v1728_v63 = vmax.f32 %v4456_v50, %v3304_v61  ;;  %v1657_v36 = vpop.f32.mrb[91].mxu0  ;;  %v2122_v37 = vpop.f32.mrb[91].mxu1  ;;  %v4469_v10 = vld [vmem:[#allocation49_spill] sm:$0xff] }
 0x1b5   : > { %v2939_v32 = vpack.c.bf16 %v2290_v34, %v2289_v33  ;;  %v2190_v57 = vmax.f32 %v1725_v60, %v2119_v58  ;;  %v1726_v29 = vmax.f32 %v4459_v8, %v1657_v36  ;;  %v4471_v30 = vmax.f32 %v4469_v10, %v4470_v45 }
 0x1b6   : > { %2984 = vst [vmem:[%s4068_s11 + $0x98] sm:$0xff] %v2944_v48   ;;  %v2247_v39 = vadd.f32 %v4046_v5, %v2192_v49  ;;  %v2193_v11 = vmax.f32 %v1728_v63, %v3368_v62 }
 0x1b7   : > { %2983 = vst [vmem:[%s4068_s11 + $0x90] sm:$0xff] %v2939_v32   ;;  %v2245_v14 = vadd.f32 %v4046_v5, %v2190_v57  ;;  %v2191_v18 = vmax.f32 %v1726_v29, %v2122_v37 }
 0x1b8   : > { %v2248_v23 = vadd.f32 %v4046_v5, %v2193_v11  ;;  %v2295_v35 = vmax.f32 %v2247_v39, 0.0 }
 0x1b9   : > { %v2246_v26 = vadd.f32 %v4046_v5, %v2191_v18  ;;  %v3307_v19 = vpop.f32.mrb[92].mxu0  ;;  %v3371_v17 = vpop.f32.mrb[92].mxu1  ;;  %v2293_v38 = vmax.f32 %v2245_v14, 0.0 }
 0x1ba   : > { %v2296_v52 = vmax.f32 %v2248_v23, 0.0  ;;  %v1731_v0 = vmax.f32 %v4462_v22, %v3307_v19  ;;  %v1670_v1 = vpop.f32.mrb[93].mxu0  ;;  %v2135_v53 = vpop.f32.mrb[93].mxu1 }
 0x1bb   : > { %v2294_v40 = vmax.f32 %v2246_v26, 0.0  ;;  %v1729_v51 = vmax.f32 %v4465_v4, %v1670_v1  ;;  %v3308_v2 = vpop.f32.mrb[94].mxu0  ;;  %v3372_v43 = vpop.f32.mrb[94].mxu1 }
 0x1bc   : > { %v2954_v6 = vpack.c.bf16 %v2296_v52, %v2295_v35  ;;  %v2196_v24 = vmax.f32 %v1731_v0, %v3371_v17  ;;  %v1732_v55 = vmax.f32 %v4468_v44, %v3308_v2  ;;  %v1673_v56 = vpop.f32.mrb[95].mxu0  ;;  %v2138_v27 = vpop.f32.mrb[95].mxu1 }
 0x1bd   : > { %v2949_v28 = vpack.c.bf16 %v2294_v40, %v2293_v38  ;;  %v2194_v9 = vmax.f32 %v1729_v51, %v2135_v53  ;;  %v1730_v31 = vmax.f32 %v4471_v30, %v1673_v56 }
 0x1be   : > { %2986 = vst [vmem:[%s4068_s11 + $0xa8] sm:$0xff] %v2954_v6   ;;  %v2251_v54 = vadd.f32 %v4046_v5, %v2196_v24  ;;  %v2197_v46 = vmax.f32 %v1732_v55, %v3372_v43 }
 0x1bf   : > { %2985 = vst [vmem:[%s4068_s11 + $0xa0] sm:$0xff] %v2949_v28   ;;  %v2249_v58 = vadd.f32 %v4046_v5, %v2194_v9  ;;  %v2195_v33 = vmax.f32 %v1730_v31, %v2138_v27 }
 0x1c0   : > { %v2252_v34 = vadd.f32 %v4046_v5, %v2197_v46  ;;  %v2299_v42 = vmax.f32 %v2251_v54, 0.0 }
 0x1c1   : > { %v2250_v59 = vadd.f32 %v4046_v5, %v2195_v33  ;;  %v2297_v60 = vmax.f32 %v2249_v58, 0.0 }
 0x1c2   : > { %v2300_v47 = vmax.f32 %v2252_v34, 0.0 }
 0x1c3   : > { %v2298_v61 = vmax.f32 %v2250_v59, 0.0 }
 0x1c4   : > { %v2964_v62 = vpack.c.bf16 %v2300_v47, %v2299_v42 }
 0x1c5   : > { %v2959_v48 = vpack.c.bf16 %v2298_v61, %v2297_v60 }
 0x1c6   : > { %2988 = vst [vmem:[%s4068_s11 + $0xb8] sm:$0xff] %v2964_v62  }
 0x1c7   : > { %2987 = vst [vmem:[%s4068_s11 + $0xb0] sm:$0xff] %v2959_v48  }
 0x1c8 PF: > { %s16_s21 = sadd.s32 1, %s3491_s21  }
 0x1c9   : > { %p13_p4 = scmp.ge.s32.totalorder %s16_s21, 5  }
 0x1cb   :  { %15 = sbr.rel (!%p13_p4) target bundleno = 1 (0x1), region = 83 }

// kernel: cnn_forward.6
= control target key start
LH: loop header
LB: loop body
LE: loop exit
PB: predicated region body
PF: predicated region fallthrough
CT: control target
= control target key end

     0   :  { %s6749_s4 = inlined_call_operand.vmem [shape: bf16[512,128], index: 4, kind: input, shape index: {}]   ;;  %s6750_s0 = inlined_call_operand.vmem [shape: bf16[248,512], index: 0, kind: input, shape index: {}]   ;;  %s6751_s1 = inlined_call_operand.vmem [shape: bf16[248,512], index: 1, kind: input, shape index: {}]   ;;  %s6752_s2 = inlined_call_operand.vmem [shape: bf16[248,512], index: 2, kind: input, shape index: {}]   ;;  %s6753_s3 = inlined_call_operand.vmem [shape: bf16[248,512], index: 3, kind: input, shape index: {}]   ;;  %s6754_s5 = inlined_call_operand.vmem [shape: f32[1,128], index: 5, kind: input, shape index: {}]   ;;  %s6755_s6 = inlined_call_operand.vmem [shape: bf16[248,128], index: 6, kind: output, shape index: {}]  }
   0x1   :  { %v5200_v0 = vld [vmem:[%s6749_s4 + $0x40] sm:$0xff]   ;;  %v5223_v4 = vld [vmem:[%s6749_s4 + $0x48] sm:$0xff]   ;;  %v5247_v8 = vld [vmem:[%s6749_s4 + $0x50] sm:$0xff]  }
   0x2   :  { %v5205_v1 = vld [vmem:[%s6749_s4 + $0xc0] sm:$0xff]   ;;  %3826 = vmatprep.subr.bf16.mxu0 %v5200_v0  ;;  %v5229_v5 = vld [vmem:[%s6749_s4 + $0xc8] sm:$0xff]   ;;  %v5253_v9 = vld [vmem:[%s6749_s4 + $0xd0] sm:$0xff]  }
   0x3   :  { %v5211_v2 = vld [vmem:[%s6749_s4] sm:$0xff]   ;;  %3938 = vmatprep.subr.bf16.mxu1 %v5205_v1  ;;  %v5235_v6 = vld [vmem:[%s6749_s4 + $0x8] sm:$0xff]   ;;  %v5259_v10 = vld [vmem:[%s6749_s4 + $0x10] sm:$0xff]  }
   0x4   :  { %v5217_v3 = vld [vmem:[%s6749_s4 + $0x80] sm:$0xff]   ;;  %3827 = vmatpush3.bf16.msra.mxu0 %v5211_v2  ;;  %v5241_v7 = vld [vmem:[%s6749_s4 + $0x88] sm:$0xff]   ;;  %v5265_v11 = vld [vmem:[%s6749_s4 + $0x90] sm:$0xff]  }
   0x5   :  { %3939 = vmatpush3.bf16.msra.mxu1 %v5217_v3  ;;  %3828 = vmatprep.subr.bf16.mxu0 %v5223_v4  ;;  %v5271_v12 = vld [vmem:[%s6749_s4 + $0x58] sm:$0xff]   ;;  %v5295_v16 = vld [vmem:[%s6749_s4 + $0x60] sm:$0xff]   ;;  %v5319_v20 = vld [vmem:[%s6749_s4 + $0x68] sm:$0xff]  }
   0x6   :  { %3940 = vmatprep.subr.bf16.mxu1 %v5229_v5  ;;  %v5277_v13 = vld [vmem:[%s6749_s4 + $0xd8] sm:$0xff]   ;;  %v5301_v17 = vld [vmem:[%s6749_s4 + $0xe0] sm:$0xff]   ;;  %v5325_v21 = vld [vmem:[%s6749_s4 + $0xe8] sm:$0xff]  }
   0x7   :  { %v5283_v14 = vld [vmem:[%s6749_s4 + $0x18] sm:$0xff]   ;;  %v5307_v18 = vld [vmem:[%s6749_s4 + $0x20] sm:$0xff]   ;;  %v5331_v22 = vld [vmem:[%s6749_s4 + $0x28] sm:$0xff]  }
   0x8   :  { %3829 = vmatpush3.bf16.msra.mxu0 %v5235_v6  ;;  %v5289_v15 = vld [vmem:[%s6749_s4 + $0x98] sm:$0xff]   ;;  %v5313_v19 = vld [vmem:[%s6749_s4 + $0xa0] sm:$0xff]   ;;  %v5337_v23 = vld [vmem:[%s6749_s4 + $0xa8] sm:$0xff]  }
   0x9   :  { %3941 = vmatpush3.bf16.msra.mxu1 %v5241_v7  ;;  %3830 = vmatprep.subr.bf16.mxu0 %v5247_v8  ;;  %v5343_v24 = vld [vmem:[%s6749_s4 + $0x70] sm:$0xff]   ;;  %v5367_v28 = vld [vmem:[%s6749_s4 + $0x78] sm:$0xff]  }
   0xa   :  { %3942 = vmatprep.subr.bf16.mxu1 %v5253_v9  ;;  %v5349_v25 = vld [vmem:[%s6749_s4 + $0xf0] sm:$0xff]   ;;  %v5373_v29 = vld [vmem:[%s6749_s4 + $0xf8] sm:$0xff]  }
   0xb   :  { %v5355_v26 = vld [vmem:[%s6749_s4 + $0x30] sm:$0xff]   ;;  %v5379_v30 = vld [vmem:[%s6749_s4 + $0x38] sm:$0xff]  }
   0xc   :  { %3831 = vmatpush3.bf16.msra.mxu0 %v5259_v10  ;;  %v5361_v27 = vld [vmem:[%s6749_s4 + $0xb0] sm:$0xff]   ;;  %v5385_v31 = vld [vmem:[%s6749_s4 + $0xb8] sm:$0xff]  }
   0xd   :  { %3943 = vmatpush3.bf16.msra.mxu1 %v5265_v11  ;;  %3832 = vmatprep.subr.bf16.mxu0 %v5271_v12  ;;  %v4754_v32 = vld [vmem:[%s6750_s0] ss:$16 sps:$4 sm:$0xff]   ;;  %v4756_v33 = vld [vmem:[%s6750_s0 + $0x4] ss:$16 sps:$4 sm:$0xff]   ;;  %v4757_v34 = vld [vmem:[%s6750_s0 + $0x8] ss:$16 sps:$4 sm:$0xff]  }
   0xe   :  { %3944 = vmatprep.subr.bf16.mxu1 %v5277_v13  ;;  %v4759_v35 = vld [vmem:[%s6750_s0 + $0xc] ss:$16 sps:$4 sm:$0xff]   ;;  %688 = vmatprep.mubr.bf16.mxu0 %v4756_v33  ;;  %v4760_v36 = vld [vmem:[%s6750_s0 + $0x24] ss:$16 sps:$4 sm:$0xff]   ;;  %v4764_v38 = vld [vmem:[%s6750_s0 + $0x20] ss:$16 sps:$4 sm:$0xff]  }
   0xf   :  { %848 = vmatprep.mubr.bf16.mxu1 %v4759_v35  ;;  %v4762_v37 = vld [vmem:[%s6750_s0 + $0x2c] ss:$16 sps:$4 sm:$0xff]   ;;  %v4765_v39 = vld [vmem:[%s6750_s0 + $0x28] ss:$16 sps:$4 sm:$0xff]   ;;  %v4766_v40 = vld [vmem:[%s6750_s0 + $0x44] ss:$16 sps:$4 sm:$0xff]  }
  0x10   :  { %3833 = vmatpush3.bf16.msra.mxu0 %v5283_v14  ;;  %v4768_v41 = vld [vmem:[%s6750_s0 + $0x4c] ss:$16 sps:$4 sm:$0xff]   ;;  %v4770_v42 = vld [vmem:[%s6750_s0 + $0x40] ss:$16 sps:$4 sm:$0xff]   ;;  %v4771_v43 = vld [vmem:[%s6750_s0 + $0x48] ss:$16 sps:$4 sm:$0xff]  }
  0x11   :  { %3945 = vmatpush3.bf16.msra.mxu1 %v5289_v15  ;;  %3834 = vmatprep.subr.bf16.mxu0 %v5295_v16  ;;  %v4772_v44 = vld [vmem:[%s6750_s0 + $0x64] ss:$16 sps:$4 sm:$0xff]   ;;  %v4774_v45 = vld [vmem:[%s6750_s0 + $0x6c] ss:$16 sps:$4 sm:$0xff]   ;;  %v4776_v46 = vld [vmem:[%s6750_s0 + $0x60] ss:$16 sps:$4 sm:$0xff]  }
  0x12   :  { %3946 = vmatprep.subr.bf16.mxu1 %v5301_v17  ;;  %v4777_v47 = vld [vmem:[%s6750_s0 + $0x68] ss:$16 sps:$4 sm:$0xff]   ;;  %v4778_v48 = vld [vmem:[%s6750_s0 + $0x84] ss:$16 sps:$4 sm:$0xff]   ;;  %v4780_v49 = vld [vmem:[%s6750_s0 + $0x8c] ss:$16 sps:$4 sm:$0xff]  }
  0x13   :  { %v4782_v50 = vld [vmem:[%s6750_s0 + $0x80] ss:$16 sps:$4 sm:$0xff]   ;;  %v4783_v51 = vld [vmem:[%s6750_s0 + $0x88] ss:$16 sps:$4 sm:$0xff]   ;;  %v4784_v52 = vld [vmem:[%s6750_s0 + $0xa4] ss:$16 sps:$4 sm:$0xff]  }
  0x14   :  { %3835 = vmatpush3.bf16.msra.mxu0 %v5307_v18  ;;  %v4786_v53 = vld [vmem:[%s6750_s0 + $0xac] ss:$16 sps:$4 sm:$0xff]   ;;  %v4788_v54 = vld [vmem:[%s6750_s0 + $0xa0] ss:$16 sps:$4 sm:$0xff]   ;;  %v4789_v55 = vld [vmem:[%s6750_s0 + $0xa8] ss:$16 sps:$4 sm:$0xff]  }
  0x15   :  { %3947 = vmatpush3.bf16.msra.mxu1 %v5313_v19  ;;  %3836 = vmatprep.subr.bf16.mxu0 %v5319_v20  ;;  %v4790_v56 = vld [vmem:[%s6750_s0 + $0xc4] ss:$16 sps:$4 sm:$0xff]   ;;  %v4792_v57 = vld [vmem:[%s6750_s0 + $0xcc] ss:$16 sps:$4 sm:$0xff]   ;;  %v4794_v58 = vld [vmem:[%s6750_s0 + $0xc0] ss:$16 sps:$4 sm:$0xff]  }
  0x16   :  { %3948 = vmatprep.subr.bf16.mxu1 %v5325_v21  ;;  %v4795_v59 = vld [vmem:[%s6750_s0 + $0xc8] ss:$16 sps:$4 sm:$0xff]   ;;  %v4796_v60 = vld [vmem:[%s6750_s0 + $0xe4] ss:$16 sps:$4 sm:$0xff]   ;;  %v4798_v61 = vld [vmem:[%s6750_s0 + $0xec] ss:$16 sps:$4 sm:$0xff]  }
  0x17   :  { %v4800_v62 = vld [vmem:[%s6750_s0 + $0xe0] ss:$16 sps:$4 sm:$0xff]   ;;  %v4801_v63 = vld [vmem:[%s6750_s0 + $0xe8] ss:$16 sps:$4 sm:$0xff]   ;;  %v4810_v35 = vld [vmem:[%s6750_s0 + $0x12c] ss:$16 sps:$4 sm:$0xff]  }
  0x18   :  { %3837 = vmatpush3.bf16.msra.mxu0 %v5331_v22  ;;  %v4807_v33 = vld [vmem:[%s6750_s0 + $0x108] ss:$16 sps:$4 sm:$0xff]  }
  0x19   :  { %3949 = vmatpush3.bf16.msra.mxu1 %v5337_v23  ;;  %3838 = vmatprep.subr.bf16.mxu0 %v5343_v24 }
  0x1a   :  { %3950 = vmatprep.subr.bf16.mxu1 %v5349_v25 }
  0x1c   :  { %3839 = vmatpush3.bf16.msra.mxu0 %v5355_v26 }
  0x1d   :  { %3951 = vmatpush3.bf16.msra.mxu1 %v5361_v27  ;;  %3840 = vmatprep.subr.bf16.mxu0 %v5367_v28 }
  0x1e   :  { %3952 = vmatprep.subr.bf16.mxu1 %v5373_v29 }
  0x20   :  { %3841 = vmatpush3.bf16.msra.mxu0 %v5379_v30 }
  0x21   :  { %3953 = vmatpush3.bf16.msra.mxu1 %v5385_v31  ;;  %4050 = vmatprep.subr.bf16.mxu0 %v5200_v0 }
  0x22   :  { %4162 = vmatprep.subr.bf16.mxu1 %v5205_v1 }
  0x23   :  { %689 = vmatmul.mubr.bf16.vlgmr.msra.gmra.mrb[0].mxu0 %v4754_v32  ;;  %v4806_v32 = vld [vmem:[%s6750_s0 + $0x100] ss:$16 sps:$4 sm:$0xff]  }
  0x24   :  { %849 = vmatmul.mubr.bf16.vlgmr.msra.gmra.mrb[0].mxu1 %v4757_v34  ;;  %4051 = vmatpush3.bf16.msra.mxu0 %v5211_v2  ;;  %v4808_v34 = vld [vmem:[%s6750_s0 + $0x124] ss:$16 sps:$4 sm:$0xff]  }
  0x25   :  { %4163 = vmatpush3.bf16.msra.mxu1 %v5217_v3  ;;  %696 = vmatprep.mubr.bf16.mxu0 %v4760_v36  ;;  %v4812_v36 = vld [vmem:[%s6750_s0 + $0x120] ss:$16 sps:$4 sm:$0xff]  }
  0x26   :  { %856 = vmatprep.mubr.bf16.mxu1 %v4762_v37  ;;  %4052 = vmatprep.subr.bf16.mxu0 %v5223_v4  ;;  %v4813_v37 = vld [vmem:[%s6750_s0 + $0x128] ss:$16 sps:$4 sm:$0xff]  }
  0x27   :  { %4164 = vmatprep.subr.bf16.mxu1 %v5229_v5 }
  0x28   :  { %4053 = vmatpush3.bf16.msra.mxu0 %v5235_v6 }
  0x29   :  { %4165 = vmatpush3.bf16.msra.mxu1 %v5241_v7  ;;  %4054 = vmatprep.subr.bf16.mxu0 %v5247_v8 }
  0x2a   :  { %4166 = vmatprep.subr.bf16.mxu1 %v5253_v9 }
  0x2b   :  { %697 = vmatmul.mubr.bf16.gmra.mrb[4].mxu0 %v4764_v38  ;;  %v4814_v38 = vld [vmem:[%s6750_s0 + $0x144] ss:$16 sps:$4 sm:$0xff]  }
  0x2c   :  { %857 = vmatmul.mubr.bf16.gmra.mrb[4].mxu1 %v4765_v39  ;;  %704 = vmatprep.mubr.bf16.mxu0 %v4766_v40  ;;  %v4816_v39 = vld [vmem:[%s6750_s0 + $0x14c] ss:$16 sps:$4 sm:$0xff]   ;;  %v4818_v40 = vld [vmem:[%s6750_s0 + $0x140] ss:$16 sps:$4 sm:$0xff]  }
  0x2d   :  { %864 = vmatprep.mubr.bf16.mxu1 %v4768_v41  ;;  %4055 = vmatpush3.bf16.msra.mxu0 %v5259_v10  ;;  %v4819_v41 = vld [vmem:[%s6750_s0 + $0x148] ss:$16 sps:$4 sm:$0xff]  }
  0x2e   :  { %4167 = vmatpush3.bf16.msra.mxu1 %v5265_v11  ;;  %4056 = vmatprep.subr.bf16.mxu0 %v5271_v12 }
  0x2f   :  { %4168 = vmatprep.subr.bf16.mxu1 %v5277_v13 }
  0x31   :  { %4057 = vmatpush3.bf16.msra.mxu0 %v5283_v14 }
  0x32   :  { %4169 = vmatpush3.bf16.msra.mxu1 %v5289_v15  ;;  %4058 = vmatprep.subr.bf16.mxu0 %v5295_v16 }
  0x33   :  { %705 = vmatmul.mubr.bf16.gmra.mrb[8].mxu0 %v4770_v42  ;;  %4170 = vmatprep.subr.bf16.mxu1 %v5301_v17  ;;  %v4820_v42 = vld [vmem:[%s6750_s0 + $0x164] ss:$16 sps:$4 sm:$0xff]  }
  0x34   :  { %865 = vmatmul.mubr.bf16.gmra.mrb[8].mxu1 %v4771_v43  ;;  %712 = vmatprep.mubr.bf16.mxu0 %v4772_v44  ;;  %v4822_v43 = vld [vmem:[%s6750_s0 + $0x16c] ss:$16 sps:$4 sm:$0xff]   ;;  %v4824_v44 = vld [vmem:[%s6750_s0 + $0x160] ss:$16 sps:$4 sm:$0xff]  }
  0x35   :  { %872 = vmatprep.mubr.bf16.mxu1 %v4774_v45  ;;  %4059 = vmatpush3.bf16.msra.mxu0 %v5307_v18  ;;  %v4825_v45 = vld [vmem:[%s6750_s0 + $0x168] ss:$16 sps:$4 sm:$0xff]  }
  0x36   :  { %4171 = vmatpush3.bf16.msra.mxu1 %v5313_v19  ;;  %4060 = vmatprep.subr.bf16.mxu0 %v5319_v20 }
  0x37   :  { %4172 = vmatprep.subr.bf16.mxu1 %v5325_v21 }
  0x39   :  { %4061 = vmatpush3.bf16.msra.mxu0 %v5331_v22 }
  0x3a   :  { %4173 = vmatpush3.bf16.msra.mxu1 %v5337_v23  ;;  %4062 = vmatprep.subr.bf16.mxu0 %v5343_v24 }
  0x3b   :  { %713 = vmatmul.mubr.bf16.gmra.mrb[12].mxu0 %v4776_v46  ;;  %4174 = vmatprep.subr.bf16.mxu1 %v5349_v25  ;;  %v4826_v46 = vld [vmem:[%s6750_s0 + $0x184] ss:$16 sps:$4 sm:$0xff]  }
  0x3c   :  { %873 = vmatmul.mubr.bf16.gmra.mrb[12].mxu1 %v4777_v47  ;;  %720 = vmatprep.mubr.bf16.mxu0 %v4778_v48  ;;  %v4828_v47 = vld [vmem:[%s6750_s0 + $0x18c] ss:$16 sps:$4 sm:$0xff]   ;;  %v4830_v48 = vld [vmem:[%s6750_s0 + $0x180] ss:$16 sps:$4 sm:$0xff]  }
  0x3d   :  { %880 = vmatprep.mubr.bf16.mxu1 %v4780_v49  ;;  %4063 = vmatpush3.bf16.msra.mxu0 %v5355_v26  ;;  %v4831_v49 = vld [vmem:[%s6750_s0 + $0x188] ss:$16 sps:$4 sm:$0xff]  }
  0x3e   :  { %4175 = vmatpush3.bf16.msra.mxu1 %v5361_v27  ;;  %4064 = vmatprep.subr.bf16.mxu0 %v5367_v28 }
  0x3f   :  { %4176 = vmatprep.subr.bf16.mxu1 %v5373_v29 }
  0x41   :  { %4065 = vmatpush3.bf16.msra.mxu0 %v5379_v30 }
  0x42   :  { %4177 = vmatpush3.bf16.msra.mxu1 %v5385_v31  ;;  %4274 = vmatprep.subr.bf16.mxu0 %v5200_v0  ;;  %v4802_v0 = vld [vmem:[%s6750_s0 + $0x104] ss:$16 sps:$4 sm:$0xff]  }
  0x43   :  { %721 = vmatmul.mubr.bf16.gmra.mrb[16].mxu0 %v4782_v50  ;;  %4386 = vmatprep.subr.bf16.mxu1 %v5205_v1  ;;  %v4804_v1 = vld [vmem:[%s6750_s0 + $0x10c] ss:$16 sps:$4 sm:$0xff]   ;;  %v4832_v50 = vld [vmem:[%s6750_s0 + $0x1a4] ss:$16 sps:$4 sm:$0xff]  }
  0x44   :  { %881 = vmatmul.mubr.bf16.gmra.mrb[16].mxu1 %v4783_v51  ;;  %728 = vmatprep.mubr.bf16.mxu0 %v4784_v52  ;;  %v4834_v51 = vld [vmem:[%s6750_s0 + $0x1ac] ss:$16 sps:$4 sm:$0xff]   ;;  %v4836_v52 = vld [vmem:[%s6750_s0 + $0x1a0] ss:$16 sps:$4 sm:$0xff]  }
  0x45   :  { %888 = vmatprep.mubr.bf16.mxu1 %v4786_v53  ;;  %v4837_v53 = vld [vmem:[%s6750_s0 + $0x1a8] ss:$16 sps:$4 sm:$0xff]  }
  0x4b   :  { %729 = vmatmul.mubr.bf16.gmra.mrb[20].mxu0 %v4788_v54  ;;  %v4838_v54 = vld [vmem:[%s6750_s0 + $0x1c4] ss:$16 sps:$4 sm:$0xff]  }
  0x4c   :  { %889 = vmatmul.mubr.bf16.gmra.mrb[20].mxu1 %v4789_v55  ;;  %736 = vmatprep.mubr.bf16.mxu0 %v4790_v56  ;;  %v4840_v55 = vld [vmem:[%s6750_s0 + $0x1cc] ss:$16 sps:$4 sm:$0xff]   ;;  %v148_v56 = vld [vmem:[%s6750_s0 + $0x1e0] sm:$0xff] }
  0x4d   :  { %896 = vmatprep.mubr.bf16.mxu1 %v4792_v57  ;;  %v149_v57 = vld [vmem:[%s6750_s0 + $0x1e8] sm:$0xff] }
  0x53   :  { %737 = vmatmul.mubr.bf16.gmra.mrb[24].mxu0 %v4794_v58  ;;  %v4842_v58 = vld [vmem:[%s6750_s0 + $0x1c0] ss:$16 sps:$4 sm:$0xff]  }
  0x54   :  { %897 = vmatmul.mubr.bf16.gmra.mrb[24].mxu1 %v4795_v59  ;;  %744 = vmatprep.mubr.bf16.mxu0 %v4796_v60  ;;  %v4843_v59 = vld [vmem:[%s6750_s0 + $0x1c8] ss:$16 sps:$4 sm:$0xff]   ;;  %v3447_v60 = vcombine.high %v148_v56, %v148_v56 }
  0x55   :  { %904 = vmatprep.mubr.bf16.mxu1 %v4798_v61  ;;  %v3449_v61 = vcombine.high %v149_v57, %v149_v57 }
  0x5b   :  { %745 = vmatmul.mubr.bf16.gmra.mrb[28].mxu0 %v4800_v62  ;;  %v3446_v62 = vcombine.low %v148_v56, %v148_v56  ;;  %v4920_v56 = vld [vmem:[%s6751_s1 + $0x184] ss:$16 sps:$4 sm:$0xff]  }
  0x5c   :  { %905 = vmatmul.mubr.bf16.gmra.mrb[28].mxu1 %v4801_v63  ;;  %752 = vmatprep.mubr.bf16.mxu0 %v4802_v0  ;;  %v3448_v63 = vcombine.low %v149_v57, %v149_v57  ;;  %v4850_v0 = vld [vmem:[%s6751_s1 + $0x4] ss:$16 sps:$4 sm:$0xff]  }
  0x5d   :  { %912 = vmatprep.mubr.bf16.mxu1 %v4804_v1  ;;  %v4853_v1 = vld [vmem:[%s6751_s1 + $0xc] ss:$16 sps:$4 sm:$0xff]  }
  0x63   :  { %753 = vmatmul.mubr.bf16.gmra.mrb[32].mxu0 %v4806_v32  ;;  %v4848_v32 = vld [vmem:[%s6751_s1] ss:$16 sps:$4 sm:$0xff]  }
  0x64   :  { %913 = vmatmul.mubr.bf16.gmra.mrb[32].mxu1 %v4807_v33  ;;  %760 = vmatprep.mubr.bf16.mxu0 %v4808_v34  ;;  %v4851_v33 = vld [vmem:[%s6751_s1 + $0x8] ss:$16 sps:$4 sm:$0xff]   ;;  %v4854_v34 = vld [vmem:[%s6751_s1 + $0x24] ss:$16 sps:$4 sm:$0xff]  }
  0x65   :  { %920 = vmatprep.mubr.bf16.mxu1 %v4810_v35  ;;  %v4856_v35 = vld [vmem:[%s6751_s1 + $0x2c] ss:$16 sps:$4 sm:$0xff]  }
  0x6b   :  { %761 = vmatmul.mubr.bf16.gmra.mrb[36].mxu0 %v4812_v36  ;;  %v4858_v36 = vld [vmem:[%s6751_s1 + $0x20] ss:$16 sps:$4 sm:$0xff]  }
  0x6c   :  { %921 = vmatmul.mubr.bf16.gmra.mrb[36].mxu1 %v4813_v37  ;;  %768 = vmatprep.mubr.bf16.mxu0 %v4814_v38  ;;  %v4859_v37 = vld [vmem:[%s6751_s1 + $0x28] ss:$16 sps:$4 sm:$0xff]   ;;  %v4860_v38 = vld [vmem:[%s6751_s1 + $0x44] ss:$16 sps:$4 sm:$0xff]  }
  0x6d   :  { %928 = vmatprep.mubr.bf16.mxu1 %v4816_v39  ;;  %v4904_v39 = vld [vmem:[%s6751_s1 + $0x12c] ss:$16 sps:$4 sm:$0xff]  }
  0x73   :  { %769 = vmatmul.mubr.bf16.gmra.mrb[40].mxu0 %v4818_v40  ;;  %v4906_v40 = vld [vmem:[%s6751_s1 + $0x120] ss:$16 sps:$4 sm:$0xff]  }
  0x74   :  { %929 = vmatmul.mubr.bf16.gmra.mrb[40].mxu1 %v4819_v41  ;;  %776 = vmatprep.mubr.bf16.mxu0 %v4820_v42  ;;  %v4907_v41 = vld [vmem:[%s6751_s1 + $0x128] ss:$16 sps:$4 sm:$0xff]   ;;  %v4908_v42 = vld [vmem:[%s6751_s1 + $0x144] ss:$16 sps:$4 sm:$0xff]  }
  0x75   :  { %936 = vmatprep.mubr.bf16.mxu1 %v4822_v43  ;;  %v4910_v43 = vld [vmem:[%s6751_s1 + $0x14c] ss:$16 sps:$4 sm:$0xff]  }
  0x7b   :  { %777 = vmatmul.mubr.bf16.gmra.mrb[44].mxu0 %v4824_v44  ;;  %v4912_v44 = vld [vmem:[%s6751_s1 + $0x140] ss:$16 sps:$4 sm:$0xff]  }
  0x7c   :  { %937 = vmatmul.mubr.bf16.gmra.mrb[44].mxu1 %v4825_v45  ;;  %784 = vmatprep.mubr.bf16.mxu0 %v4826_v46  ;;  %v4913_v45 = vld [vmem:[%s6751_s1 + $0x148] ss:$16 sps:$4 sm:$0xff]   ;;  %v4914_v46 = vld [vmem:[%s6751_s1 + $0x164] ss:$16 sps:$4 sm:$0xff]  }
  0x7d   :  { %944 = vmatprep.mubr.bf16.mxu1 %v4828_v47  ;;  %v4916_v47 = vld [vmem:[%s6751_s1 + $0x16c] ss:$16 sps:$4 sm:$0xff]  }
  0x83   :  { %785 = vmatmul.mubr.bf16.gmra.mrb[48].mxu0 %v4830_v48 }
  0x84   :  { %945 = vmatmul.mubr.bf16.gmra.mrb[48].mxu1 %v4831_v49  ;;  %792 = vmatprep.mubr.bf16.mxu0 %v4832_v50 }
  0x85   :  { %952 = vmatprep.mubr.bf16.mxu1 %v4834_v51  ;;  %v4918_v51 = vld [vmem:[%s6751_s1 + $0x160] ss:$16 sps:$4 sm:$0xff]  }
  0x8b   :  { %793 = vmatmul.mubr.bf16.gmra.mrb[52].mxu0 %v4836_v52 }
  0x8c   :  { %953 = vmatmul.mubr.bf16.gmra.mrb[52].mxu1 %v4837_v53  ;;  %800 = vmatprep.mubr.bf16.mxu0 %v4838_v54 }
  0x8d   :  { %960 = vmatprep.mubr.bf16.mxu1 %v4840_v55  ;;  %v4919_v55 = vld [vmem:[%s6751_s1 + $0x168] ss:$16 sps:$4 sm:$0xff]  }
  0x93   :  { %801 = vmatmul.mubr.bf16.gmra.mrb[56].mxu0 %v4842_v58 }
  0x94   :  { %961 = vmatmul.mubr.bf16.gmra.mrb[56].mxu1 %v4843_v59  ;;  %808 = vmatprep.mubr.bf16.mxu0 %v3447_v60  ;;  %v4922_v60 = vld [vmem:[%s6751_s1 + $0x18c] ss:$16 sps:$4 sm:$0xff]  }
  0x95   :  { %968 = vmatprep.mubr.bf16.mxu1 %v3449_v61 }
  0x9b   :  { %809 = vmatmul.mubr.bf16.gmra.mrb[60].mxu0 %v3446_v62 }
  0x9c   :  { %969 = vmatmul.mubr.bf16.gmra.mrb[60].mxu1 %v3448_v63  ;;  %1384 = vmatprep.mubr.bf16.mxu0 %v4850_v0 }
  0x9d   :  { %1544 = vmatprep.mubr.bf16.mxu1 %v4853_v1 }
  0xa3   :  { %1385 = vmatmul.mubr.bf16.vlgmr.msra.gmra.mrb[64].mxu0 %v4848_v32 }
  0xa4   :  { %1545 = vmatmul.mubr.bf16.vlgmr.msra.gmra.mrb[64].mxu1 %v4851_v33  ;;  %4275 = vmatpush3.bf16.msra.mxu0 %v5211_v2  ;;  %v4862_v2 = vld [vmem:[%s6751_s1 + $0x4c] ss:$16 sps:$4 sm:$0xff]  }
  0xa5   :  { %4387 = vmatpush3.bf16.msra.mxu1 %v5217_v3  ;;  %1392 = vmatprep.mubr.bf16.mxu0 %v4854_v34  ;;  %v4864_v3 = vld [vmem:[%s6751_s1 + $0x40] ss:$16 sps:$4 sm:$0xff]  }
  0xa6   :  { %1552 = vmatprep.mubr.bf16.mxu1 %v4856_v35  ;;  %4276 = vmatprep.subr.bf16.mxu0 %v5223_v4  ;;  %v4865_v4 = vld [vmem:[%s6751_s1 + $0x48] ss:$16 sps:$4 sm:$0xff]   ;;  %v4924_v35 = vld [vmem:[%s6751_s1 + $0x180] ss:$16 sps:$4 sm:$0xff]  }
  0xa7   :  { %4388 = vmatprep.subr.bf16.mxu1 %v5229_v5  ;;  %v4866_v5 = vld [vmem:[%s6751_s1 + $0x64] ss:$16 sps:$4 sm:$0xff]  }
  0xa8   :  { %4277 = vmatpush3.bf16.msra.mxu0 %v5235_v6  ;;  %v4868_v6 = vld [vmem:[%s6751_s1 + $0x6c] ss:$16 sps:$4 sm:$0xff]  }
  0xa9   :  { %4389 = vmatpush3.bf16.msra.mxu1 %v5241_v7  ;;  %4278 = vmatprep.subr.bf16.mxu0 %v5247_v8  ;;  %v4870_v7 = vld [vmem:[%s6751_s1 + $0x60] ss:$16 sps:$4 sm:$0xff]   ;;  %v4871_v8 = vld [vmem:[%s6751_s1 + $0x68] ss:$16 sps:$4 sm:$0xff]  }
  0xaa   :  { %4390 = vmatprep.subr.bf16.mxu1 %v5253_v9  ;;  %v4872_v9 = vld [vmem:[%s6751_s1 + $0x84] ss:$16 sps:$4 sm:$0xff]  }
  0xab   :  { %1393 = vmatmul.mubr.bf16.gmra.mrb[68].mxu0 %v4858_v36 }
  0xac   :  { %1553 = vmatmul.mubr.bf16.gmra.mrb[68].mxu1 %v4859_v37  ;;  %1400 = vmatprep.mubr.bf16.mxu0 %v4860_v38 }
  0xad   :  { %1560 = vmatprep.mubr.bf16.mxu1 %v4862_v2  ;;  %4279 = vmatpush3.bf16.msra.mxu0 %v5259_v10  ;;  %v4874_v10 = vld [vmem:[%s6751_s1 + $0x8c] ss:$16 sps:$4 sm:$0xff]   ;;  %v4925_v2 = vld [vmem:[%s6751_s1 + $0x188] ss:$16 sps:$4 sm:$0xff]  }
  0xae   :  { %4391 = vmatpush3.bf16.msra.mxu1 %v5265_v11  ;;  %4280 = vmatprep.subr.bf16.mxu0 %v5271_v12  ;;  %v4876_v11 = vld [vmem:[%s6751_s1 + $0x80] ss:$16 sps:$4 sm:$0xff]   ;;  %v4877_v12 = vld [vmem:[%s6751_s1 + $0x88] ss:$16 sps:$4 sm:$0xff]  }
  0xaf   :  { %4392 = vmatprep.subr.bf16.mxu1 %v5277_v13  ;;  %v4878_v13 = vld [vmem:[%s6751_s1 + $0xa4] ss:$16 sps:$4 sm:$0xff]  }
  0xb1   :  { %4281 = vmatpush3.bf16.msra.mxu0 %v5283_v14  ;;  %v4880_v14 = vld [vmem:[%s6751_s1 + $0xac] ss:$16 sps:$4 sm:$0xff]  }
  0xb2   :  { %4393 = vmatpush3.bf16.msra.mxu1 %v5289_v15  ;;  %4282 = vmatprep.subr.bf16.mxu0 %v5295_v16  ;;  %v5130_v15 = vld [vmem:[%s6749_s4 + $0x40] sm:$0xff]  }
  0xb3   :  { %1401 = vmatmul.mubr.bf16.gmra.mrb[72].mxu0 %v4864_v3  ;;  %4394 = vmatprep.subr.bf16.mxu1 %v5301_v17  ;;  %v5131_v16 = vld [vmem:[%s6749_s4 + $0xc0] sm:$0xff]  }
  0xb4   :  { %1561 = vmatmul.mubr.bf16.gmra.mrb[72].mxu1 %v4865_v4  ;;  %1408 = vmatprep.mubr.bf16.mxu0 %v4866_v5  ;;  %v4882_v17 = vld [vmem:[%s6751_s1 + $0xa0] ss:$16 sps:$4 sm:$0xff]   ;;  %v4926_v3 = vld [vmem:[%s6751_s1 + $0x1a4] ss:$16 sps:$4 sm:$0xff]  }
  0xb5   :  { %1568 = vmatprep.mubr.bf16.mxu1 %v4868_v6  ;;  %4283 = vmatpush3.bf16.msra.mxu0 %v5307_v18  ;;  %v4883_v18 = vld [vmem:[%s6751_s1 + $0xa8] ss:$16 sps:$4 sm:$0xff]  }
  0xb6   :  { %4395 = vmatpush3.bf16.msra.mxu1 %v5313_v19  ;;  %4284 = vmatprep.subr.bf16.mxu0 %v5319_v20  ;;  %v4884_v19 = vld [vmem:[%s6751_s1 + $0xc4] ss:$16 sps:$4 sm:$0xff]   ;;  %v4886_v20 = vld [vmem:[%s6751_s1 + $0xcc] ss:$16 sps:$4 sm:$0xff]  }
  0xb7   :  { %4396 = vmatprep.subr.bf16.mxu1 %v5325_v21  ;;  %v4888_v21 = vld [vmem:[%s6751_s1 + $0xc0] ss:$16 sps:$4 sm:$0xff]  }
  0xb9   :  { %4285 = vmatpush3.bf16.msra.mxu0 %v5331_v22  ;;  %v4889_v22 = vld [vmem:[%s6751_s1 + $0xc8] ss:$16 sps:$4 sm:$0xff]  }
  0xba   :  { %4397 = vmatpush3.bf16.msra.mxu1 %v5337_v23  ;;  %4286 = vmatprep.subr.bf16.mxu0 %v5343_v24  ;;  %v4890_v23 = vld [vmem:[%s6751_s1 + $0xe4] ss:$16 sps:$4 sm:$0xff]   ;;  %v4892_v24 = vld [vmem:[%s6751_s1 + $0xec] ss:$16 sps:$4 sm:$0xff]  }
  0xbb   :  { %1409 = vmatmul.mubr.bf16.gmra.mrb[76].mxu0 %v4870_v7  ;;  %4398 = vmatprep.subr.bf16.mxu1 %v5349_v25  ;;  %v4894_v25 = vld [vmem:[%s6751_s1 + $0xe0] ss:$16 sps:$4 sm:$0xff]   ;;  %v4928_v7 = vld [vmem:[%s6751_s1 + $0x1ac] ss:$16 sps:$4 sm:$0xff]  }
  0xbc   :  { %1569 = vmatmul.mubr.bf16.gmra.mrb[76].mxu1 %v4871_v8  ;;  %1416 = vmatprep.mubr.bf16.mxu0 %v4872_v9 }
  0xbd   :  { %1576 = vmatprep.mubr.bf16.mxu1 %v4874_v10  ;;  %4287 = vmatpush3.bf16.msra.mxu0 %v5355_v26  ;;  %v4895_v26 = vld [vmem:[%s6751_s1 + $0xe8] ss:$16 sps:$4 sm:$0xff]  }
  0xbe   :  { %4399 = vmatpush3.bf16.msra.mxu1 %v5361_v27  ;;  %4288 = vmatprep.subr.bf16.mxu0 %v5367_v28  ;;  %v4896_v27 = vld [vmem:[%s6751_s1 + $0x104] ss:$16 sps:$4 sm:$0xff]   ;;  %v4898_v28 = vld [vmem:[%s6751_s1 + $0x10c] ss:$16 sps:$4 sm:$0xff]  }
  0xbf   :  { %4400 = vmatprep.subr.bf16.mxu1 %v5373_v29  ;;  %v4900_v29 = vld [vmem:[%s6751_s1 + $0x100] ss:$16 sps:$4 sm:$0xff]  }
  0xc1   :  { %4289 = vmatpush3.bf16.msra.mxu0 %v5379_v30  ;;  %v4901_v30 = vld [vmem:[%s6751_s1 + $0x108] ss:$16 sps:$4 sm:$0xff]  }
  0xc2   :  { %4401 = vmatpush3.bf16.msra.mxu1 %v5385_v31  ;;  %4498 = vmatprep.subr.bf16.mxu0 %v5130_v15  ;;  %v4902_v31 = vld [vmem:[%s6751_s1 + $0x124] ss:$16 sps:$4 sm:$0xff]  }
  0xc3   :  { %1417 = vmatmul.mubr.bf16.gmra.mrb[80].mxu0 %v4876_v11  ;;  %4610 = vmatprep.subr.bf16.mxu1 %v5131_v16  ;;  %v4930_v16 = vld [vmem:[%s6751_s1 + $0x1a0] ss:$16 sps:$4 sm:$0xff]  }
  0xc4   :  { %1577 = vmatmul.mubr.bf16.gmra.mrb[80].mxu1 %v4877_v12  ;;  %1424 = vmatprep.mubr.bf16.mxu0 %v4878_v13 }
  0xc5   :  { %1584 = vmatprep.mubr.bf16.mxu1 %v4880_v14 }
  0xcb   :  { %1425 = vmatmul.mubr.bf16.gmra.mrb[84].mxu0 %v4882_v17 }
  0xcc   :  { %1585 = vmatmul.mubr.bf16.gmra.mrb[84].mxu1 %v4883_v18  ;;  %1432 = vmatprep.mubr.bf16.mxu0 %v4884_v19 }
  0xcd   :  { %1592 = vmatprep.mubr.bf16.mxu1 %v4886_v20  ;;  %v4931_v20 = vld [vmem:[%s6751_s1 + $0x1a8] ss:$16 sps:$4 sm:$0xff]  }
  0xd3   :  { %1433 = vmatmul.mubr.bf16.gmra.mrb[88].mxu0 %v4888_v21  ;;  %v4932_v21 = vld [vmem:[%s6751_s1 + $0x1c4] ss:$16 sps:$4 sm:$0xff]  }
  0xd4   :  { %1593 = vmatmul.mubr.bf16.gmra.mrb[88].mxu1 %v4889_v22  ;;  %1440 = vmatprep.mubr.bf16.mxu0 %v4890_v23 }
  0xd5   :  { %1600 = vmatprep.mubr.bf16.mxu1 %v4892_v24 }
  0xdb   :  { %1441 = vmatmul.mubr.bf16.gmra.mrb[92].mxu0 %v4894_v25  ;;  %v4934_v25 = vld [vmem:[%s6751_s1 + $0x1cc] ss:$16 sps:$4 sm:$0xff]  }
  0xdc   :  { %1601 = vmatmul.mubr.bf16.gmra.mrb[92].mxu1 %v4895_v26  ;;  %1448 = vmatprep.mubr.bf16.mxu0 %v4896_v27 }
  0xdd   :  { %1608 = vmatprep.mubr.bf16.mxu1 %v4898_v28 }
  0xe3   :  { %1449 = vmatmul.mubr.bf16.gmra.mrb[96].mxu0 %v4900_v29 }
  0xe4   :  { %1609 = vmatmul.mubr.bf16.gmra.mrb[96].mxu1 %v4901_v30  ;;  %1456 = vmatprep.mubr.bf16.mxu0 %v4902_v31  ;;  %v1036_v31 = vld [vmem:[%s6751_s1 + $0x1e0] sm:$0xff] }
  0xe5   :  { %1616 = vmatprep.mubr.bf16.mxu1 %v4904_v39 }
  0xeb   :  { %1457 = vmatmul.mubr.bf16.gmra.mrb[100].mxu0 %v4906_v40  ;;  %v1037_v40 = vld [vmem:[%s6751_s1 + $0x1e8] sm:$0xff] }
  0xec   :  { %1617 = vmatmul.mubr.bf16.gmra.mrb[100].mxu1 %v4907_v41  ;;  %1464 = vmatprep.mubr.bf16.mxu0 %v4908_v42 }
  0xed   :  { %1624 = vmatprep.mubr.bf16.mxu1 %v4910_v43  ;;  %v4936_v43 = vld [vmem:[%s6751_s1 + $0x1c0] ss:$16 sps:$4 sm:$0xff]  }
  0xf3   :  { %1465 = vmatmul.mubr.bf16.gmra.mrb[104].mxu0 %v4912_v44 }
  0xf4   :  { %1625 = vmatmul.mubr.bf16.gmra.mrb[104].mxu1 %v4913_v45  ;;  %1472 = vmatprep.mubr.bf16.mxu0 %v4914_v46 }
  0xf5   :  { %1632 = vmatprep.mubr.bf16.mxu1 %v4916_v47  ;;  %v4937_v47 = vld [vmem:[%s6751_s1 + $0x1c8] ss:$16 sps:$4 sm:$0xff]  }
  0xf6   :  { %v3842_v48 = vpop.f32.mrb[0].mxu0 }
  0xf7   :  { %v3954_v49 = vpop.f32.mrb[0].mxu1  ;;  %v3843_v50 = vpop.f32.mrb[1].mxu0 }
  0xf8   :  { %v3844_v52 = vadd.f32 %v3843_v50, %v3842_v48  ;;  %v3955_v53 = vpop.f32.mrb[1].mxu1  ;;  %v3845_v54 = vpop.f32.mrb[2].mxu0  ;;  %v3543_v48 = vcombine.high %v1036_v31, %v1036_v31 }
  0xf9   :  { %v3956_v57 = vadd.f32 %v3955_v53, %v3954_v49  ;;  %v3957_v58 = vpop.f32.mrb[2].mxu1  ;;  %v3846_v59 = vpop.f32.mrb[3].mxu0 }
  0xfa   :  { %v3847_v61 = vadd.f32 %v3846_v59, %v3845_v54  ;;  %v3958_v62 = vpop.f32.mrb[3].mxu1 }
  0xfb   :  { %v5795_v63 = vadd.f32 %v3956_v57, %v3844_v52  ;;  %v3959_v0 = vadd.f32 %v3958_v62, %v3957_v58  ;;  %1473 = vmatmul.mubr.bf16.gmra.mrb[108].mxu0 %v4918_v51  ;;  %v3545_v52 = vcombine.high %v1037_v40, %v1037_v40 }
  0xfc   :  { %1633 = vmatmul.mubr.bf16.gmra.mrb[108].mxu1 %v4919_v55  ;;  %1480 = vmatprep.mubr.bf16.mxu0 %v4920_v56 }
  0xfd   :  { %v5797_v1 = vadd.f32 %v3959_v0, %v3847_v61  ;;  %1640 = vmatprep.mubr.bf16.mxu1 %v4922_v60  ;;  %v3542_v61 = vcombine.low %v1036_v31, %v1036_v31  ;;  %v4952_v31 = vld [vmem:[%s6752_s2 + $0x20] ss:$16 sps:$4 sm:$0xff]  }
  0xfe   :  { %v3848_v32 = vpop.f32.mrb[4].mxu0 }
  0xff   :  { %v3960_v33 = vpop.f32.mrb[4].mxu1  ;;  %v3849_v34 = vpop.f32.mrb[5].mxu0 }
 0x100   :  { %v3850_v36 = vadd.f32 %v3849_v34, %v3848_v32  ;;  %v3961_v37 = vpop.f32.mrb[5].mxu1  ;;  %v3851_v38 = vpop.f32.mrb[6].mxu0  ;;  %v4944_v34 = vld [vmem:[%s6752_s2 + $0x4] ss:$16 sps:$4 sm:$0xff]  }
 0x101   :  { %v3962_v4 = vadd.f32 %v3961_v37, %v3960_v33  ;;  %v3963_v5 = vpop.f32.mrb[6].mxu1  ;;  %v3852_v6 = vpop.f32.mrb[7].mxu0  ;;  %v3544_v33 = vcombine.low %v1037_v40, %v1037_v40  ;;  %v4953_v40 = vld [vmem:[%s6752_s2 + $0x28] ss:$16 sps:$4 sm:$0xff]  }
 0x102   :  { %v3853_v8 = vadd.f32 %v3852_v6, %v3851_v38  ;;  %v3964_v9 = vpop.f32.mrb[7].mxu1  ;;  %v4947_v38 = vld [vmem:[%s6752_s2 + $0xc] ss:$16 sps:$4 sm:$0xff]  }
 0x103   :  { %v5811_v10 = vadd.f32 %v3962_v4, %v3850_v36  ;;  %v3965_v11 = vadd.f32 %v3964_v9, %v3963_v5  ;;  %1481 = vmatmul.mubr.bf16.gmra.mrb[112].mxu0 %v4924_v35 }
 0x104   :  { %1641 = vmatmul.mubr.bf16.gmra.mrb[112].mxu1 %v4925_v2  ;;  %1488 = vmatprep.mubr.bf16.mxu0 %v4926_v3 }
 0x105   :  { %v5813_v12 = vadd.f32 %v3965_v11, %v3853_v8  ;;  %1648 = vmatprep.mubr.bf16.mxu1 %v4928_v7  ;;  %v4942_v11 = vld [vmem:[%s6752_s2] ss:$16 sps:$4 sm:$0xff]  }
 0x106   :  { %v3854_v13 = vpop.f32.mrb[8].mxu0 }
 0x107   :  { %v3966_v14 = vpop.f32.mrb[8].mxu1  ;;  %v3855_v15 = vpop.f32.mrb[9].mxu0 }
 0x108   :  { %v3856_v17 = vadd.f32 %v3855_v15, %v3854_v13  ;;  %v3967_v18 = vpop.f32.mrb[9].mxu1  ;;  %v3857_v19 = vpop.f32.mrb[10].mxu0 }
 0x109   :  { %v3968_v22 = vadd.f32 %v3967_v18, %v3966_v14  ;;  %v3969_v23 = vpop.f32.mrb[10].mxu1  ;;  %v3858_v24 = vpop.f32.mrb[11].mxu0 }
 0x10a   :  { %v3859_v26 = vadd.f32 %v3858_v24, %v3857_v19  ;;  %v3970_v27 = vpop.f32.mrb[11].mxu1 }
 0x10b   :  { %v5827_v28 = vadd.f32 %v3968_v22, %v3856_v17  ;;  %v3971_v29 = vadd.f32 %v3970_v27, %v3969_v23  ;;  %1489 = vmatmul.mubr.bf16.gmra.mrb[116].mxu0 %v4930_v16  ;;  %v4945_v16 = vld [vmem:[%s6752_s2 + $0x8] ss:$16 sps:$4 sm:$0xff]   ;;  %v4950_v23 = vld [vmem:[%s6752_s2 + $0x2c] ss:$16 sps:$4 sm:$0xff]  }
 0x10c   :  { %1649 = vmatmul.mubr.bf16.gmra.mrb[116].mxu1 %v4931_v20  ;;  %1496 = vmatprep.mubr.bf16.mxu0 %v4932_v21  ;;  %v4948_v20 = vld [vmem:[%s6752_s2 + $0x24] ss:$16 sps:$4 sm:$0xff]  }
 0x10d   :  { %v5829_v30 = vadd.f32 %v3971_v29, %v3859_v26  ;;  %1656 = vmatprep.mubr.bf16.mxu1 %v4934_v25  ;;  %v5132_v26 = vld [vmem:[%s6749_s4] sm:$0xff]  }
 0x10e   :  { %v3860_v39 = vpop.f32.mrb[12].mxu0  ;;  %v5133_v29 = vld [vmem:[%s6749_s4 + $0x80] sm:$0xff]  }
 0x10f   :  { %v3972_v41 = vpop.f32.mrb[12].mxu1  ;;  %v3861_v42 = vpop.f32.mrb[13].mxu0 }
 0x110   :  { %v3862_v44 = vadd.f32 %v3861_v42, %v3860_v39  ;;  %v3973_v45 = vpop.f32.mrb[13].mxu1  ;;  %v3863_v46 = vpop.f32.mrb[14].mxu0  ;;  %v5134_v42 = vld [vmem:[%s6749_s4 + $0x48] sm:$0xff]  }
 0x111   :  { %v3974_v49 = vadd.f32 %v3973_v45, %v3972_v41  ;;  %v3975_v50 = vpop.f32.mrb[14].mxu1  ;;  %v3864_v51 = vpop.f32.mrb[15].mxu0  ;;  %v4954_v41 = vld [vmem:[%s6752_s2 + $0x44] ss:$16 sps:$4 sm:$0xff]   ;;  %v5135_v45 = vld [vmem:[%s6749_s4 + $0xc8] sm:$0xff]  }
 0x112   :  { %v3865_v53 = vadd.f32 %v3864_v51, %v3863_v46  ;;  %v3976_v54 = vpop.f32.mrb[15].mxu1 }
 0x113   :  { %v5843_v55 = vadd.f32 %v3974_v49, %v3862_v44  ;;  %v3977_v56 = vadd.f32 %v3976_v54, %v3975_v50  ;;  %1497 = vmatmul.mubr.bf16.gmra.mrb[120].mxu0 %v4936_v43  ;;  %v5136_v49 = vld [vmem:[%s6749_s4 + $0x8] sm:$0xff]  }
 0x114   :  { %1657 = vmatmul.mubr.bf16.gmra.mrb[120].mxu1 %v4937_v47  ;;  %1504 = vmatprep.mubr.bf16.mxu0 %v3543_v48  ;;  %v5137_v54 = vld [vmem:[%s6749_s4 + $0x88] sm:$0xff]  }
 0x115   :  { %v5845_v57 = vadd.f32 %v3977_v56, %v3865_v53  ;;  %1664 = vmatprep.mubr.bf16.mxu1 %v3545_v52  ;;  %v4956_v53 = vld [vmem:[%s6752_s2 + $0x4c] ss:$16 sps:$4 sm:$0xff]   ;;  %v5138_v56 = vld [vmem:[%s6749_s4 + $0x50] sm:$0xff]  }
 0x116   :  { %v3866_v58 = vpop.f32.mrb[16].mxu0 }
 0x117   :  { %v3978_v59 = vpop.f32.mrb[16].mxu1  ;;  %v3867_v60 = vpop.f32.mrb[17].mxu0 }
 0x118   :  { %v3868_v62 = vadd.f32 %v3867_v60, %v3866_v58  ;;  %v3979_v0 = vpop.f32.mrb[17].mxu1  ;;  %v3869_v32 = vpop.f32.mrb[18].mxu0  ;;  %v5139_v60 = vld [vmem:[%s6749_s4 + $0xd0] sm:$0xff]  }
 0x119   :  { %v3980_v35 = vadd.f32 %v3979_v0, %v3978_v59  ;;  %v3981_v36 = vpop.f32.mrb[18].mxu1  ;;  %v3870_v37 = vpop.f32.mrb[19].mxu0 }
 0x11a   :  { %v3871_v2 = vadd.f32 %v3870_v37, %v3869_v32  ;;  %v3982_v3 = vpop.f32.mrb[19].mxu1  ;;  %v4958_v32 = vld [vmem:[%s6752_s2 + $0x40] ss:$16 sps:$4 sm:$0xff]  }
 0x11b   :  { %v5853_v4 = vadd.f32 %v3980_v35, %v3868_v62  ;;  %v3983_v5 = vadd.f32 %v3982_v3, %v3981_v36  ;;  %1505 = vmatmul.mubr.bf16.gmra.mrb[124].mxu0 %v3542_v61  ;;  %v4959_v35 = vld [vmem:[%s6752_s2 + $0x48] ss:$16 sps:$4 sm:$0xff]   ;;  %v4960_v36 = vld [vmem:[%s6752_s2 + $0x64] ss:$16 sps:$4 sm:$0xff]  }
 0x11c   :  { %1665 = vmatmul.mubr.bf16.gmra.mrb[124].mxu1 %v3544_v33  ;;  %2111 = vmatprep.mubr.bf16.mxu0 %v4944_v34  ;;  %v5140_v33 = vld [vmem:[%s6749_s4 + $0x10] sm:$0xff]  }
 0x11d   :  { %v5855_v6 = vadd.f32 %v3983_v5, %v3871_v2  ;;  %2271 = vmatprep.mubr.bf16.mxu1 %v4947_v38  ;;  %v5141_v37 = vld [vmem:[%s6749_s4 + $0x90] sm:$0xff]   ;;  %v5142_v38 = vld [vmem:[%s6749_s4 + $0x58] sm:$0xff]  }
 0x11e   :  { %v3872_v7 = vpop.f32.mrb[20].mxu0  ;;  %v5143_v5 = vld [vmem:[%s6749_s4 + $0xd8] sm:$0xff]  }
 0x11f   :  { %v3984_v8 = vpop.f32.mrb[20].mxu1  ;;  %v3873_v9 = vpop.f32.mrb[21].mxu0 }
 0x120   :  { %v3874_v13 = vadd.f32 %v3873_v9, %v3872_v7  ;;  %v3985_v14 = vpop.f32.mrb[21].mxu1  ;;  %v3875_v15 = vpop.f32.mrb[22].mxu0 }
 0x121   :  { %v3986_v17 = vadd.f32 %v3985_v14, %v3984_v8  ;;  %v3987_v18 = vpop.f32.mrb[22].mxu1  ;;  %v3876_v19 = vpop.f32.mrb[23].mxu0 }
 0x122   :  { %v3877_v21 = vadd.f32 %v3876_v19, %v3875_v15  ;;  %v3988_v22 = vpop.f32.mrb[23].mxu1  ;;  %v4962_v15 = vld [vmem:[%s6752_s2 + $0x6c] ss:$16 sps:$4 sm:$0xff]  }
 0x123   :  { %v5869_v24 = vadd.f32 %v3986_v17, %v3874_v13  ;;  %v3989_v25 = vadd.f32 %v3988_v22, %v3987_v18  ;;  %2112 = vmatmul.mubr.bf16.vlgmr.msra.gmra.mrb[128].mxu0 %v4942_v11  ;;  %v5145_v19 = vld [vmem:[%s6749_s4 + $0x98] sm:$0xff]  }
 0x124   :  { %2272 = vmatmul.mubr.bf16.vlgmr.msra.gmra.mrb[128].mxu1 %v4945_v16  ;;  %4499 = vmatpush3.bf16.msra.mxu0 %v5132_v26  ;;  %v5144_v16 = vld [vmem:[%s6749_s4 + $0x18] sm:$0xff]   ;;  %v4964_v26 = vld [vmem:[%s6752_s2 + $0x60] ss:$16 sps:$4 sm:$0xff]  }
 0x125   :  { %v5874_v27 = vadd.f32 %v3989_v25, %v3877_v21  ;;  %4611 = vmatpush3.bf16.msra.mxu1 %v5133_v29  ;;  %2119 = vmatprep.mubr.bf16.mxu0 %v4948_v20  ;;  %v5146_v20 = vld [vmem:[%s6749_s4 + $0x60] sm:$0xff]  }
 0x126   :  { %v3878_v39 = vpop.f32.mrb[24].mxu0  ;;  %2279 = vmatprep.mubr.bf16.mxu1 %v4950_v23  ;;  %4500 = vmatprep.subr.bf16.mxu0 %v5134_v42  ;;  %v5147_v23 = vld [vmem:[%s6749_s4 + $0xe0] sm:$0xff]   ;;  %v5150_v42 = vld [vmem:[%s6749_s4 + $0x68] sm:$0xff]  }
 0x127   :  { %v3990_v43 = vpop.f32.mrb[24].mxu1  ;;  %v3879_v44 = vpop.f32.mrb[25].mxu0  ;;  %4612 = vmatprep.subr.bf16.mxu1 %v5135_v45  ;;  %v5148_v29 = vld [vmem:[%s6749_s4 + $0x20] sm:$0xff]   ;;  %v5151_v45 = vld [vmem:[%s6749_s4 + $0xe8] sm:$0xff]  }
 0x128   :  { %v3880_v46 = vadd.f32 %v3879_v44, %v3878_v39  ;;  %v3991_v47 = vpop.f32.mrb[25].mxu1  ;;  %v3881_v48 = vpop.f32.mrb[26].mxu0  ;;  %4501 = vmatpush3.bf16.msra.mxu0 %v5136_v49  ;;  %v4965_v39 = vld [vmem:[%s6752_s2 + $0x68] ss:$16 sps:$4 sm:$0xff]  }
 0x129   :  { %v3992_v50 = vadd.f32 %v3991_v47, %v3990_v43  ;;  %v3993_v51 = vpop.f32.mrb[26].mxu1  ;;  %v3882_v52 = vpop.f32.mrb[27].mxu0  ;;  %4613 = vmatpush3.bf16.msra.mxu1 %v5137_v54  ;;  %4502 = vmatprep.subr.bf16.mxu0 %v5138_v56 }
 0x12a   :  { %v3883_v58 = vadd.f32 %v3882_v52, %v3881_v48  ;;  %v3994_v59 = vpop.f32.mrb[27].mxu1  ;;  %4614 = vmatprep.subr.bf16.mxu1 %v5139_v60  ;;  %v4968_v52 = vld [vmem:[%s6752_s2 + $0x8c] ss:$16 sps:$4 sm:$0xff]  }
 0x12b   :  { %v5909_v61 = vadd.f32 %v3992_v50, %v3880_v46  ;;  %v3995_v62 = vadd.f32 %v3994_v59, %v3993_v51  ;;  %2120 = vmatmul.mubr.bf16.gmra.mrb[132].mxu0 %v4952_v31  ;;  %v5154_v59 = vld [vmem:[%s6749_s4 + $0x70] sm:$0xff]  }
 0x12c   :  { %2280 = vmatmul.mubr.bf16.gmra.mrb[132].mxu1 %v4953_v40  ;;  %2127 = vmatprep.mubr.bf16.mxu0 %v4954_v41  ;;  %v4966_v40 = vld [vmem:[%s6752_s2 + $0x84] ss:$16 sps:$4 sm:$0xff]  }
 0x12d   :  { %v5911_v0 = vadd.f32 %v3995_v62, %v3883_v58  ;;  %2287 = vmatprep.mubr.bf16.mxu1 %v4956_v53  ;;  %4503 = vmatpush3.bf16.msra.mxu0 %v5140_v33  ;;  %v5149_v41 = vld [vmem:[%s6749_s4 + $0xa0] sm:$0xff]   ;;  %v5152_v53 = vld [vmem:[%s6749_s4 + $0x28] sm:$0xff]  }
 0x12e   :  { %v3884_v34 = vpop.f32.mrb[28].mxu0  ;;  %4615 = vmatpush3.bf16.msra.mxu1 %v5141_v37  ;;  %4504 = vmatprep.subr.bf16.mxu0 %v5142_v38  ;;  %v5153_v58 = vld [vmem:[%s6749_s4 + $0xa8] sm:$0xff]   ;;  %v5158_v37 = vld [vmem:[%s6749_s4 + $0x78] sm:$0xff]  }
 0x12f   :  { %v3996_v2 = vpop.f32.mrb[28].mxu1  ;;  %v3885_v3 = vpop.f32.mrb[29].mxu0  ;;  %4616 = vmatprep.subr.bf16.mxu1 %v5143_v5  ;;  %v5159_v5 = vld [vmem:[%s6749_s4 + $0xf8] sm:$0xff]  }
 0x130   :  { %v3886_v7 = vadd.f32 %v3885_v3, %v3884_v34  ;;  %v3997_v8 = vpop.f32.mrb[29].mxu1  ;;  %v3887_v9 = vpop.f32.mrb[30].mxu0  ;;  %v5156_v34 = vld [vmem:[%s6749_s4 + $0x30] sm:$0xff]  }
 0x131   :  { %v3998_v11 = vadd.f32 %v3997_v8, %v3996_v2  ;;  %v3999_v13 = vpop.f32.mrb[30].mxu1  ;;  %v3888_v14 = vpop.f32.mrb[31].mxu0  ;;  %4505 = vmatpush3.bf16.msra.mxu0 %v5144_v16  ;;  %v4970_v3 = vld [vmem:[%s6752_s2 + $0x80] ss:$16 sps:$4 sm:$0xff]  }
 0x132   :  { %v3889_v17 = vadd.f32 %v3888_v14, %v3887_v9  ;;  %v4000_v18 = vpop.f32.mrb[31].mxu1  ;;  %4617 = vmatpush3.bf16.msra.mxu1 %v5145_v19  ;;  %4506 = vmatprep.subr.bf16.mxu0 %v5146_v20 }
 0x133   :  { %v5946_v21 = vadd.f32 %v3998_v11, %v3886_v7  ;;  %v4001_v22 = vadd.f32 %v4000_v18, %v3999_v13  ;;  %2128 = vmatmul.mubr.bf16.gmra.mrb[136].mxu0 %v4958_v32  ;;  %4618 = vmatprep.subr.bf16.mxu1 %v5147_v23  ;;  %v5155_v32 = vld [vmem:[%s6749_s4 + $0xf0] sm:$0xff]   ;;  %v4971_v11 = vld [vmem:[%s6752_s2 + $0x88] ss:$16 sps:$4 sm:$0xff]  }
 0x134   :  { %2288 = vmatmul.mubr.bf16.gmra.mrb[136].mxu1 %v4959_v35  ;;  %2135 = vmatprep.mubr.bf16.mxu0 %v4960_v36  ;;  %v5157_v36 = vld [vmem:[%s6749_s4 + $0xb0] sm:$0xff]   ;;  %v5160_v18 = vld [vmem:[%s6749_s4 + $0x38] sm:$0xff]  }
 0x135   :  { %v5951_v25 = vadd.f32 %v4001_v22, %v3889_v17  ;;  %2295 = vmatprep.mubr.bf16.mxu1 %v4962_v15  ;;  %4507 = vmatpush3.bf16.msra.mxu0 %v5148_v29  ;;  %v4972_v13 = vld [vmem:[%s6752_s2 + $0xa4] ss:$16 sps:$4 sm:$0xff]   ;;  %v4974_v17 = vld [vmem:[%s6752_s2 + $0xac] ss:$16 sps:$4 sm:$0xff]  }
 0x136   :  { %v3890_v31 = vpop.f32.mrb[32].mxu0  ;;  %4619 = vmatpush3.bf16.msra.mxu1 %v5149_v41  ;;  %4508 = vmatprep.subr.bf16.mxu0 %v5150_v42  ;;  %v5161_v22 = vld [vmem:[%s6749_s4 + $0xb8] sm:$0xff]   ;;  %v4976_v41 = vld [vmem:[%s6752_s2 + $0xa0] ss:$16 sps:$4 sm:$0xff]  }
 0x137   :  { %6773 = vst [vmem:[#allocation2_spill] sm:$0xff] %v5951_v25  ;;  %v4002_v43 = vpop.f32.mrb[32].mxu1  ;;  %v3891_v44 = vpop.f32.mrb[33].mxu0  ;;  %4620 = vmatprep.subr.bf16.mxu1 %v5151_v45  ;;  %v4977_v45 = vld [vmem:[%s6752_s2 + $0xa8] ss:$16 sps:$4 sm:$0xff]  }
 0x138   :  { %v3892_v46 = vadd.f32 %v3891_v44, %v3890_v31  ;;  %v4003_v47 = vpop.f32.mrb[33].mxu1  ;;  %v3893_v48 = vpop.f32.mrb[34].mxu0 }
 0x139   :  { %v4004_v49 = vadd.f32 %v4003_v47, %v4002_v43  ;;  %v4005_v50 = vpop.f32.mrb[34].mxu1  ;;  %v3894_v51 = vpop.f32.mrb[35].mxu0  ;;  %4509 = vmatpush3.bf16.msra.mxu0 %v5152_v53 }
 0x13a   :  { %v3895_v54 = vadd.f32 %v3894_v51, %v3893_v48  ;;  %v4006_v56 = vpop.f32.mrb[35].mxu1  ;;  %4621 = vmatpush3.bf16.msra.mxu1 %v5153_v58  ;;  %4510 = vmatprep.subr.bf16.mxu0 %v5154_v59 }
 0x13b   :  { %v5986_v60 = vadd.f32 %v4004_v49, %v3892_v46  ;;  %v4007_v62 = vadd.f32 %v4006_v56, %v4005_v50  ;;  %2136 = vmatmul.mubr.bf16.gmra.mrb[140].mxu0 %v4964_v26  ;;  %4622 = vmatprep.subr.bf16.mxu1 %v5155_v32  ;;  %v4978_v46 = vld [vmem:[%s6752_s2 + $0xc4] ss:$16 sps:$4 sm:$0xff]   ;;  %v4980_v50 = vld [vmem:[%s6752_s2 + $0xcc] ss:$16 sps:$4 sm:$0xff]   ;;  %v4982_v32 = vld [vmem:[%s6752_s2 + $0xc0] ss:$16 sps:$4 sm:$0xff]  }
 0x13c   :  { %2296 = vmatmul.mubr.bf16.gmra.mrb[140].mxu1 %v4965_v39  ;;  %2143 = vmatprep.mubr.bf16.mxu0 %v4966_v40 }
 0x13d   :  { %v5991_v33 = vadd.f32 %v4007_v62, %v3895_v54  ;;  %2303 = vmatprep.mubr.bf16.mxu1 %v4968_v52  ;;  %4511 = vmatpush3.bf16.msra.mxu0 %v5156_v34 }
 0x13e   :  { %v3896_v35 = vpop.f32.mrb[36].mxu0  ;;  %4623 = vmatpush3.bf16.msra.mxu1 %v5157_v36  ;;  %4512 = vmatprep.subr.bf16.mxu0 %v5158_v37  ;;  %v4983_v37 = vld [vmem:[%s6752_s2 + $0xc8] ss:$16 sps:$4 sm:$0xff]  }
 0x13f   :  { %6774 = vst [vmem:[#allocation3_spill] sm:$0xff] %v5991_v33  ;;  %v4008_v38 = vpop.f32.mrb[36].mxu1  ;;  %v3897_v2 = vpop.f32.mrb[37].mxu0  ;;  %4624 = vmatprep.subr.bf16.mxu1 %v5159_v5 }
 0x140   :  { %v3898_v7 = vadd.f32 %v3897_v2, %v3896_v35  ;;  %v4009_v8 = vpop.f32.mrb[37].mxu1  ;;  %v3899_v9 = vpop.f32.mrb[38].mxu0 }
 0x141   :  { %v4010_v14 = vadd.f32 %v4009_v8, %v4008_v38  ;;  %v4011_v15 = vpop.f32.mrb[38].mxu1  ;;  %v3900_v16 = vpop.f32.mrb[39].mxu0  ;;  %4513 = vmatpush3.bf16.msra.mxu0 %v5160_v18  ;;  %v4984_v38 = vld [vmem:[%s6752_s2 + $0xe4] ss:$16 sps:$4 sm:$0xff]   ;;  %v4988_v18 = vld [vmem:[%s6752_s2 + $0xe0] ss:$16 sps:$4 sm:$0xff]  }
 0x142   :  { %v3901_v19 = vadd.f32 %v3900_v16, %v3899_v9  ;;  %v4012_v20 = vpop.f32.mrb[39].mxu1  ;;  %4625 = vmatpush3.bf16.msra.mxu1 %v5161_v22 }
 0x143   :  { %v6023_v23 = vadd.f32 %v4010_v14, %v3898_v7  ;;  %v4013_v26 = vadd.f32 %v4012_v20, %v4011_v15  ;;  %2144 = vmatmul.mubr.bf16.gmra.mrb[144].mxu0 %v4970_v3  ;;  %v4986_v7 = vld [vmem:[%s6752_s2 + $0xec] ss:$16 sps:$4 sm:$0xff]  }
 0x144   :  { %2304 = vmatmul.mubr.bf16.gmra.mrb[144].mxu1 %v4971_v11  ;;  %2151 = vmatprep.mubr.bf16.mxu0 %v4972_v13 }
 0x145   :  { %v6025_v29 = vadd.f32 %v4013_v26, %v3901_v19  ;;  %2311 = vmatprep.mubr.bf16.mxu1 %v4974_v17  ;;  %v4989_v26 = vld [vmem:[%s6752_s2 + $0xe8] ss:$16 sps:$4 sm:$0xff]  }
 0x146   :  { %v3902_v31 = vpop.f32.mrb[40].mxu0 }
 0x147   :  { %6775 = vst [vmem:[#allocation4_spill] sm:$0xff] %v6025_v29  ;;  %v4014_v39 = vpop.f32.mrb[40].mxu1  ;;  %v3903_v40 = vpop.f32.mrb[41].mxu0 }
 0x148   :  { %v3904_v42 = vadd.f32 %v3903_v40, %v3902_v31  ;;  %v4015_v43 = vpop.f32.mrb[41].mxu1  ;;  %v3905_v44 = vpop.f32.mrb[42].mxu0  ;;  %v4990_v31 = vld [vmem:[%s6752_s2 + $0x104] ss:$16 sps:$4 sm:$0xff]  }
 0x149   :  { %v4016_v47 = vadd.f32 %v4015_v43, %v4014_v39  ;;  %v4017_v48 = vpop.f32.mrb[42].mxu1  ;;  %v3906_v49 = vpop.f32.mrb[43].mxu0 }
 0x14a   :  { %v3907_v51 = vadd.f32 %v3906_v49, %v3905_v44  ;;  %v4018_v52 = vpop.f32.mrb[43].mxu1 }
 0x14b   :  { %v6039_v53 = vadd.f32 %v4016_v47, %v3904_v42  ;;  %v4019_v54 = vadd.f32 %v4018_v52, %v4017_v48  ;;  %2152 = vmatmul.mubr.bf16.gmra.mrb[148].mxu0 %v4976_v41  ;;  %v4992_v42 = vld [vmem:[%s6752_s2 + $0x10c] ss:$16 sps:$4 sm:$0xff]  }
 0x14c   :  { %2312 = vmatmul.mubr.bf16.gmra.mrb[148].mxu1 %v4977_v45  ;;  %2159 = vmatprep.mubr.bf16.mxu0 %v4978_v46 }
 0x14d   :  { %v6041_v56 = vadd.f32 %v4019_v54, %v3907_v51  ;;  %2319 = vmatprep.mubr.bf16.mxu1 %v4980_v50  ;;  %v4994_v51 = vld [vmem:[%s6752_s2 + $0x100] ss:$16 sps:$4 sm:$0xff]  }
 0x14e   :  { %v3908_v58 = vpop.f32.mrb[44].mxu0 }
 0x14f   :  { %6776 = vst [vmem:[#allocation5_spill] sm:$0xff] %v6041_v56  ;;  %v4020_v59 = vpop.f32.mrb[44].mxu1  ;;  %v3909_v62 = vpop.f32.mrb[45].mxu0 }
 0x150   :  { %v3910_v34 = vadd.f32 %v3909_v62, %v3908_v58  ;;  %v4021_v35 = vpop.f32.mrb[45].mxu1  ;;  %v3911_v36 = vpop.f32.mrb[46].mxu0  ;;  %v4996_v62 = vld [vmem:[%s6752_s2 + $0x124] ss:$16 sps:$4 sm:$0xff]  }
 0x151   :  { %v4022_v2 = vadd.f32 %v4021_v35, %v4020_v59  ;;  %v4023_v3 = vpop.f32.mrb[46].mxu1  ;;  %v3912_v5 = vpop.f32.mrb[47].mxu0  ;;  %v4995_v59 = vld [vmem:[%s6752_s2 + $0x108] ss:$16 sps:$4 sm:$0xff]  }
 0x152   :  { %v3913_v8 = vadd.f32 %v3912_v5, %v3911_v36  ;;  %v4024_v9 = vpop.f32.mrb[47].mxu1  ;;  %v4998_v36 = vld [vmem:[%s6752_s2 + $0x12c] ss:$16 sps:$4 sm:$0xff]  }
 0x153   :  { %v6055_v11 = vadd.f32 %v4022_v2, %v3910_v34  ;;  %v4025_v13 = vadd.f32 %v4024_v9, %v4023_v3  ;;  %2160 = vmatmul.mubr.bf16.gmra.mrb[152].mxu0 %v4982_v32 }
 0x154   :  { %2320 = vmatmul.mubr.bf16.gmra.mrb[152].mxu1 %v4983_v37  ;;  %2167 = vmatprep.mubr.bf16.mxu0 %v4984_v38 }
 0x155   :  { %v6057_v14 = vadd.f32 %v4025_v13, %v3913_v8  ;;  %2327 = vmatprep.mubr.bf16.mxu1 %v4986_v7  ;;  %v5000_v13 = vld [vmem:[%s6752_s2 + $0x120] ss:$16 sps:$4 sm:$0xff]  }
 0x156   :  { %v3914_v15 = vpop.f32.mrb[48].mxu0 }
 0x157   :  { %6777 = vst [vmem:[#allocation6_spill] sm:$0xff] %v6057_v14  ;;  %v4026_v16 = vpop.f32.mrb[48].mxu1  ;;  %v3915_v17 = vpop.f32.mrb[49].mxu0 }
 0x158   :  { %v3916_v19 = vadd.f32 %v3915_v17, %v3914_v15  ;;  %v4027_v20 = vpop.f32.mrb[49].mxu1  ;;  %v3917_v22 = vpop.f32.mrb[50].mxu0 }
 0x159   :  { %v4028_v39 = vadd.f32 %v4027_v20, %v4026_v16  ;;  %v4029_v40 = vpop.f32.mrb[50].mxu1  ;;  %v3918_v41 = vpop.f32.mrb[51].mxu0 }
 0x15a   :  { %v3919_v43 = vadd.f32 %v3918_v41, %v3917_v22  ;;  %v4030_v44 = vpop.f32.mrb[51].mxu1 }
 0x15b   :  { %v6071_v45 = vadd.f32 %v4028_v39, %v3916_v19  ;;  %v4031_v46 = vadd.f32 %v4030_v44, %v4029_v40  ;;  %2168 = vmatmul.mubr.bf16.gmra.mrb[156].mxu0 %v4988_v18  ;;  %v5001_v18 = vld [vmem:[%s6752_s2 + $0x128] ss:$16 sps:$4 sm:$0xff]   ;;  %v5002_v19 = vld [vmem:[%s6752_s2 + $0x144] ss:$16 sps:$4 sm:$0xff]  }
 0x15c   :  { %2328 = vmatmul.mubr.bf16.gmra.mrb[156].mxu1 %v4989_v26  ;;  %2175 = vmatprep.mubr.bf16.mxu0 %v4990_v31  ;;  %v5004_v31 = vld [vmem:[%s6752_s2 + $0x14c] ss:$16 sps:$4 sm:$0xff]  }
 0x15d   :  { %v6073_v47 = vadd.f32 %v4031_v46, %v3919_v43  ;;  %2335 = vmatprep.mubr.bf16.mxu1 %v4992_v42 }
 0x15e   :  { %v3920_v48 = vpop.f32.mrb[52].mxu0 }
 0x15f   :  { %6778 = vst [vmem:[#allocation7_spill] sm:$0xff] %v6073_v47  ;;  %v4032_v49 = vpop.f32.mrb[52].mxu1  ;;  %v3921_v50 = vpop.f32.mrb[53].mxu0 }
 0x160   :  { %v3922_v52 = vadd.f32 %v3921_v50, %v3920_v48  ;;  %v4033_v54 = vpop.f32.mrb[53].mxu1  ;;  %v3923_v58 = vpop.f32.mrb[54].mxu0 }
 0x161   :  { %v4034_v32 = vadd.f32 %v4033_v54, %v4032_v49  ;;  %v4035_v34 = vpop.f32.mrb[54].mxu1  ;;  %v3924_v35 = vpop.f32.mrb[55].mxu0  ;;  %v5006_v49 = vld [vmem:[%s6752_s2 + $0x140] ss:$16 sps:$4 sm:$0xff]   ;;  %v5007_v54 = vld [vmem:[%s6752_s2 + $0x148] ss:$16 sps:$4 sm:$0xff]  }
 0x162   :  { %v3925_v37 = vadd.f32 %v3924_v35, %v3923_v58  ;;  %v4036_v38 = vpop.f32.mrb[55].mxu1  ;;  %v5008_v58 = vld [vmem:[%s6752_s2 + $0x164] ss:$16 sps:$4 sm:$0xff]  }
 0x163   :  { %v6087_v2 = vadd.f32 %v4034_v32, %v3922_v52  ;;  %v4037_v3 = vadd.f32 %v4036_v38, %v4035_v34  ;;  %2176 = vmatmul.mubr.bf16.gmra.mrb[160].mxu0 %v4994_v51  ;;  %v5010_v34 = vld [vmem:[%s6752_s2 + $0x16c] ss:$16 sps:$4 sm:$0xff]  }
 0x164   :  { %2336 = vmatmul.mubr.bf16.gmra.mrb[160].mxu1 %v4995_v59  ;;  %2183 = vmatprep.mubr.bf16.mxu0 %v4996_v62 }
 0x165   :  { %v6089_v5 = vadd.f32 %v4037_v3, %v3925_v37  ;;  %2343 = vmatprep.mubr.bf16.mxu1 %v4998_v36 }
 0x166   :  { %v3926_v7 = vpop.f32.mrb[56].mxu0 }
 0x167   :  { %6779 = vst [vmem:[#allocation8_spill] sm:$0xff] %v6089_v5  ;;  %v4038_v8 = vpop.f32.mrb[56].mxu1  ;;  %v3927_v9 = vpop.f32.mrb[57].mxu0 }
 0x168   :  { %v3928_v15 = vadd.f32 %v3927_v9, %v3926_v7  ;;  %v4039_v16 = vpop.f32.mrb[57].mxu1  ;;  %v3929_v17 = vpop.f32.mrb[58].mxu0  ;;  %v5012_v7 = vld [vmem:[%s6752_s2 + $0x160] ss:$16 sps:$4 sm:$0xff]  }
 0x169   :  { %v4040_v20 = vadd.f32 %v4039_v16, %v4038_v8  ;;  %v4041_v22 = vpop.f32.mrb[58].mxu1  ;;  %v3930_v26 = vpop.f32.mrb[59].mxu0  ;;  %v5014_v16 = vld [vmem:[%s6752_s2 + $0x184] ss:$16 sps:$4 sm:$0xff]  }
 0x16a   :  { %v3931_v39 = vadd.f32 %v3930_v26, %v3929_v17  ;;  %v4042_v40 = vpop.f32.mrb[59].mxu1 }
 0x16b   :  { %v6103_v41 = vadd.f32 %v4040_v20, %v3928_v15  ;;  %v4043_v42 = vadd.f32 %v4042_v40, %v4041_v22  ;;  %2184 = vmatmul.mubr.bf16.gmra.mrb[164].mxu0 %v5000_v13  ;;  %v5013_v15 = vld [vmem:[%s6752_s2 + $0x168] ss:$16 sps:$4 sm:$0xff]   ;;  %v5016_v20 = vld [vmem:[%s6752_s2 + $0x18c] ss:$16 sps:$4 sm:$0xff]  }
 0x16c   :  { %2344 = vmatmul.mubr.bf16.gmra.mrb[164].mxu1 %v5001_v18  ;;  %2191 = vmatprep.mubr.bf16.mxu0 %v5002_v19 }
 0x16d   :  { %v6105_v43 = vadd.f32 %v4043_v42, %v3931_v39  ;;  %2351 = vmatprep.mubr.bf16.mxu1 %v5004_v31 }
 0x16e   :  { %v3932_v44 = vpop.f32.mrb[60].mxu0 }
 0x16f   :  { %v4044_v46 = vpop.f32.mrb[60].mxu1  ;;  %v3933_v48 = vpop.f32.mrb[61].mxu0 }
 0x170   :  { %v3934_v50 = vadd.f32 %v3933_v48, %v3932_v44  ;;  %v4045_v51 = vpop.f32.mrb[61].mxu1  ;;  %v3935_v52 = vpop.f32.mrb[62].mxu0 }
 0x171   :  { %v4046_v59 = vadd.f32 %v4045_v51, %v4044_v46  ;;  %v4047_v62 = vpop.f32.mrb[62].mxu1  ;;  %v3936_v32 = vpop.f32.mrb[63].mxu0 }
 0x172   :  { %v4048_v35 = vpop.f32.mrb[63].mxu1 }
 0x173   :  { %v6119_v36 = vadd.f32 %v4046_v59, %v3934_v50  ;;  %2192 = vmatmul.mubr.bf16.gmra.mrb[168].mxu0 %v5006_v49  ;;  %v5018_v50 = vld [vmem:[%s6752_s2 + $0x180] ss:$16 sps:$4 sm:$0xff]   ;;  %v5020_v59 = vld [vmem:[%s6752_s2 + $0x1a4] ss:$16 sps:$4 sm:$0xff]   ;;  %v5022_v35 = vld [vmem:[%s6752_s2 + $0x1ac] ss:$16 sps:$4 sm:$0xff]  }
 0x174   :  { %2352 = vmatmul.mubr.bf16.gmra.mrb[168].mxu1 %v5007_v54  ;;  %2199 = vmatprep.mubr.bf16.mxu0 %v5008_v58  ;;  %v5019_v58 = vld [vmem:[%s6752_s2 + $0x188] ss:$16 sps:$4 sm:$0xff]  }
 0x175   :  { %6780 = vst [vmem:[#allocation9_spill] sm:$0xff] %v6119_v36  ;;  %2359 = vmatprep.mubr.bf16.mxu1 %v5010_v34 }
 0x176   :  { %v4066_v37 = vpop.f32.mrb[64].mxu0 }
 0x177   :  { %v4178_v38 = vpop.f32.mrb[64].mxu1  ;;  %v4067_v3 = vpop.f32.mrb[65].mxu0 }
 0x178   :  { %v4068_v8 = vadd.f32 %v4067_v3, %v4066_v37  ;;  %v4179_v9 = vpop.f32.mrb[65].mxu1  ;;  %v4069_v13 = vpop.f32.mrb[66].mxu0 }
 0x179   :  { %v4180_v17 = vadd.f32 %v4179_v9, %v4178_v38  ;;  %v4181_v18 = vpop.f32.mrb[66].mxu1  ;;  %v4070_v19 = vpop.f32.mrb[67].mxu0 }
 0x17a   :  { %v4071_v22 = vadd.f32 %v4070_v19, %v4069_v13  ;;  %v4182_v26 = vpop.f32.mrb[67].mxu1 }
 0x17b   :  { %v6133_v31 = vadd.f32 %v4180_v17, %v4068_v8  ;;  %v4183_v39 = vadd.f32 %v4182_v26, %v4181_v18  ;;  %2200 = vmatmul.mubr.bf16.gmra.mrb[172].mxu0 %v5012_v7  ;;  %v5024_v18 = vld [vmem:[%s6752_s2 + $0x1a0] ss:$16 sps:$4 sm:$0xff]   ;;  %v5025_v26 = vld [vmem:[%s6752_s2 + $0x1a8] ss:$16 sps:$4 sm:$0xff]  }
 0x17c   :  { %2360 = vmatmul.mubr.bf16.gmra.mrb[172].mxu1 %v5013_v15  ;;  %2207 = vmatprep.mubr.bf16.mxu0 %v5014_v16 }
 0x17d   :  { %v6137_v42 = vadd.f32 %v4183_v39, %v4071_v22  ;;  %2367 = vmatprep.mubr.bf16.mxu1 %v5016_v20  ;;  %v5026_v39 = vld [vmem:[%s6752_s2 + $0x1c4] ss:$16 sps:$4 sm:$0xff]  }
 0x17e   :  { %v4072_v44 = vpop.f32.mrb[68].mxu0 }
 0x17f   :  { %v4184_v48 = vpop.f32.mrb[68].mxu1  ;;  %v4073_v49 = vpop.f32.mrb[69].mxu0 }
 0x180   :  { %v4074_v51 = vadd.f32 %v4073_v49, %v4072_v44  ;;  %v4185_v52 = vpop.f32.mrb[69].mxu1  ;;  %v4075_v54 = vpop.f32.mrb[70].mxu0 }
 0x181   :  { %v4186_v62 = vadd.f32 %v4185_v52, %v4184_v48  ;;  %v4187_v32 = vpop.f32.mrb[70].mxu1  ;;  %v4076_v34 = vpop.f32.mrb[71].mxu0 }
 0x182   :  { %v4077_v37 = vadd.f32 %v4076_v34, %v4075_v54  ;;  %v4188_v38 = vpop.f32.mrb[71].mxu1 }
 0x183   :  { %v6153_v3 = vadd.f32 %v4186_v62, %v4074_v51  ;;  %v4189_v7 = vadd.f32 %v4188_v38, %v4187_v32  ;;  %2208 = vmatmul.mubr.bf16.gmra.mrb[176].mxu0 %v5018_v50  ;;  %v5028_v50 = vld [vmem:[%s6752_s2 + $0x1cc] ss:$16 sps:$4 sm:$0xff]   ;;  %v1763_v32 = vld [vmem:[%s6752_s2 + $0x1e0] sm:$0xff] }
 0x184   :  { %2368 = vmatmul.mubr.bf16.gmra.mrb[176].mxu1 %v5019_v58  ;;  %2215 = vmatprep.mubr.bf16.mxu0 %v5020_v59 }
 0x185   :  { %v6157_v9 = vadd.f32 %v4189_v7, %v4077_v37  ;;  %2375 = vmatprep.mubr.bf16.mxu1 %v5022_v35  ;;  %v1764_v35 = vld [vmem:[%s6752_s2 + $0x1e8] sm:$0xff] }
 0x186   :  { %v4078_v13 = vpop.f32.mrb[72].mxu0 }
 0x187   :  { %v4190_v16 = vpop.f32.mrb[72].mxu1  ;;  %v4079_v17 = vpop.f32.mrb[73].mxu0 }
 0x188   :  { %v4080_v19 = vadd.f32 %v4079_v17, %v4078_v13  ;;  %v4191_v20 = vpop.f32.mrb[73].mxu1  ;;  %v4081_v22 = vpop.f32.mrb[74].mxu0  ;;  %v5030_v13 = vld [vmem:[%s6752_s2 + $0x1c0] ss:$16 sps:$4 sm:$0xff]  }
 0x189   :  { %v4192_v44 = vadd.f32 %v4191_v20, %v4190_v16  ;;  %v4193_v48 = vpop.f32.mrb[74].mxu1  ;;  %v4082_v49 = vpop.f32.mrb[75].mxu0  ;;  %v3607_v20 = vcombine.high %v1763_v32, %v1763_v32 }
 0x18a   :  { %v4083_v51 = vadd.f32 %v4082_v49, %v4081_v22  ;;  %v4194_v52 = vpop.f32.mrb[75].mxu1 }
 0x18b   :  { %v6173_v54 = vadd.f32 %v4192_v44, %v4080_v19  ;;  %v4195_v58 = vadd.f32 %v4194_v52, %v4193_v48  ;;  %2216 = vmatmul.mubr.bf16.gmra.mrb[180].mxu0 %v5024_v18  ;;  %v5031_v19 = vld [vmem:[%s6752_s2 + $0x1c8] ss:$16 sps:$4 sm:$0xff]   ;;  %v3609_v44 = vcombine.high %v1764_v35, %v1764_v35 }
 0x18c   :  { %2376 = vmatmul.mubr.bf16.gmra.mrb[180].mxu1 %v5025_v26  ;;  %2223 = vmatprep.mubr.bf16.mxu0 %v5026_v39 }
 0x18d   :  { %v6177_v62 = vadd.f32 %v4195_v58, %v4083_v51  ;;  %2383 = vmatprep.mubr.bf16.mxu1 %v5028_v50 }
 0x18e   :  { %v4084_v34 = vpop.f32.mrb[76].mxu0 }
 0x18f   :  { %v4196_v38 = vpop.f32.mrb[76].mxu1  ;;  %v4085_v7 = vpop.f32.mrb[77].mxu0 }
 0x190   :  { %v4086_v16 = vadd.f32 %v4085_v7, %v4084_v34  ;;  %v4197_v17 = vpop.f32.mrb[77].mxu1  ;;  %v4087_v18 = vpop.f32.mrb[78].mxu0 }
 0x191   :  { %v4198_v22 = vadd.f32 %v4197_v17, %v4196_v38  ;;  %v4199_v26 = vpop.f32.mrb[78].mxu1  ;;  %v4088_v39 = vpop.f32.mrb[79].mxu0 }
 0x192   :  { %v4089_v48 = vadd.f32 %v4088_v39, %v4087_v18  ;;  %v4200_v49 = vpop.f32.mrb[79].mxu1  ;;  %v3606_v18 = vcombine.low %v1763_v32, %v1763_v32 }
 0x193   :  { %v6193_v50 = vadd.f32 %v4198_v22, %v4086_v16  ;;  %v4201_v51 = vadd.f32 %v4200_v49, %v4199_v26  ;;  %2224 = vmatmul.mubr.bf16.gmra.mrb[184].mxu0 %v5030_v13  ;;  %v3608_v26 = vcombine.low %v1764_v35, %v1764_v35  ;;  %v5038_v13 = vld [vmem:[%s6753_s3 + $0x4] ss:$16 sps:$4 sm:$0xff]  }
 0x194   :  { %2384 = vmatmul.mubr.bf16.gmra.mrb[184].mxu1 %v5031_v19  ;;  %2231 = vmatprep.mubr.bf16.mxu0 %v3607_v20 }
 0x195   :  { %v6197_v58 = vadd.f32 %v4201_v51, %v4089_v48  ;;  %2391 = vmatprep.mubr.bf16.mxu1 %v3609_v44  ;;  %v5041_v44 = vld [vmem:[%s6753_s3 + $0xc] ss:$16 sps:$4 sm:$0xff]  }
 0x196   :  { %v4090_v34 = vpop.f32.mrb[80].mxu0 }
 0x197   :  { %v4202_v7 = vpop.f32.mrb[80].mxu1  ;;  %v4091_v17 = vpop.f32.mrb[81].mxu0 }
 0x198   :  { %v4092_v39 = vadd.f32 %v4091_v17, %v4090_v34  ;;  %v4203_v16 = vpop.f32.mrb[81].mxu1  ;;  %v4093_v22 = vpop.f32.mrb[82].mxu0 }
 0x199   :  { %v4204_v19 = vadd.f32 %v4203_v16, %v4202_v7  ;;  %v4205_v20 = vpop.f32.mrb[82].mxu1  ;;  %v4094_v48 = vpop.f32.mrb[83].mxu0 }
 0x19a   :  { %v4095_v49 = vadd.f32 %v4094_v48, %v4093_v22  ;;  %v4206_v51 = vpop.f32.mrb[83].mxu1 }
 0x19b   :  { %v6207_v38 = vadd.f32 %v4204_v19, %v4092_v39  ;;  %v4207_v32 = vadd.f32 %v4206_v51, %v4205_v20  ;;  %2232 = vmatmul.mubr.bf16.gmra.mrb[188].mxu0 %v3606_v18  ;;  %v5036_v39 = vld [vmem:[%s6753_s3] ss:$16 sps:$4 sm:$0xff]   ;;  %v5042_v19 = vld [vmem:[%s6753_s3 + $0x24] ss:$16 sps:$4 sm:$0xff]  }
 0x19c   :  { %2392 = vmatmul.mubr.bf16.gmra.mrb[188].mxu1 %v3608_v26  ;;  %2838 = vmatprep.mubr.bf16.mxu0 %v5038_v13  ;;  %v5039_v13 = vld [vmem:[%s6753_s3 + $0x8] ss:$16 sps:$4 sm:$0xff]  }
 0x19d   :  { %v6211_v34 = vadd.f32 %v4207_v32, %v4095_v49  ;;  %2998 = vmatprep.mubr.bf16.mxu1 %v5041_v44  ;;  %v5044_v49 = vld [vmem:[%s6753_s3 + $0x2c] ss:$16 sps:$4 sm:$0xff]  }
 0x19e   :  { %v4096_v7 = vpop.f32.mrb[84].mxu0 }
 0x19f   :  { %v4208_v16 = vpop.f32.mrb[84].mxu1  ;;  %v4097_v52 = vpop.f32.mrb[85].mxu0 }
 0x1a0   :  { %v4098_v22 = vadd.f32 %v4097_v52, %v4096_v7  ;;  %v4209_v18 = vpop.f32.mrb[85].mxu1  ;;  %v4099_v26 = vpop.f32.mrb[86].mxu0 }
 0x1a1   :  { %v4210_v20 = vadd.f32 %v4209_v18, %v4208_v16  ;;  %v4211_v48 = vpop.f32.mrb[86].mxu1  ;;  %v4100_v44 = vpop.f32.mrb[87].mxu0 }
 0x1a2   :  { %v4101_v51 = vadd.f32 %v4100_v44, %v4099_v26  ;;  %v4212_v32 = vpop.f32.mrb[87].mxu1 }
 0x1a3   :  { %v6227_v52 = vadd.f32 %v4210_v20, %v4098_v22  ;;  %v4213_v7 = vadd.f32 %v4212_v32, %v4211_v48  ;;  %2839 = vmatmul.mubr.bf16.vlgmr.msra.gmra.mrb[192].mxu0 %v5036_v39  ;;  %v5046_v22 = vld [vmem:[%s6753_s3 + $0x20] ss:$16 sps:$4 sm:$0xff]   ;;  %v5048_v20 = vld [vmem:[%s6753_s3 + $0x44] ss:$16 sps:$4 sm:$0xff]  }
 0x1a4   :  { %2999 = vmatmul.mubr.bf16.vlgmr.msra.gmra.mrb[192].mxu1 %v5039_v13  ;;  %2846 = vmatprep.mubr.bf16.mxu0 %v5042_v19  ;;  %v5047_v19 = vld [vmem:[%s6753_s3 + $0x28] ss:$16 sps:$4 sm:$0xff]  }
 0x1a5   :  { %v6231_v35 = vadd.f32 %v4213_v7, %v4101_v51  ;;  %3006 = vmatprep.mubr.bf16.mxu1 %v5044_v49  ;;  %v5050_v51 = vld [vmem:[%s6753_s3 + $0x4c] ss:$16 sps:$4 sm:$0xff]  }
 0x1a6   :  { %v4102_v16 = vpop.f32.mrb[88].mxu0 }
 0x1a7   :  { %v4214_v37 = vpop.f32.mrb[88].mxu1  ;;  %v4103_v59 = vpop.f32.mrb[89].mxu0 }
 0x1a8   :  { %v4104_v26 = vadd.f32 %v4103_v59, %v4102_v16  ;;  %v4215_v39 = vpop.f32.mrb[89].mxu1  ;;  %v4105_v13 = vpop.f32.mrb[90].mxu0 }
 0x1a9   :  { %v4216_v48 = vadd.f32 %v4215_v39, %v4214_v37  ;;  %v4217_v44 = vpop.f32.mrb[90].mxu1  ;;  %v4106_v49 = vpop.f32.mrb[91].mxu0 }
 0x1aa   :  { %v4107_v32 = vadd.f32 %v4106_v49, %v4105_v13  ;;  %v4218_v7 = vpop.f32.mrb[91].mxu1 }
 0x1ab   :  { %v6247_v59 = vadd.f32 %v4216_v48, %v4104_v26  ;;  %v4219_v16 = vadd.f32 %v4218_v7, %v4217_v44  ;;  %2847 = vmatmul.mubr.bf16.gmra.mrb[196].mxu0 %v5046_v22  ;;  %v5052_v26 = vld [vmem:[%s6753_s3 + $0x40] ss:$16 sps:$4 sm:$0xff]   ;;  %v5054_v48 = vld [vmem:[%s6753_s3 + $0x64] ss:$16 sps:$4 sm:$0xff]  }
 0x1ac   :  { %3007 = vmatmul.mubr.bf16.gmra.mrb[196].mxu1 %v5047_v19  ;;  %2854 = vmatprep.mubr.bf16.mxu0 %v5048_v20  ;;  %v5053_v20 = vld [vmem:[%s6753_s3 + $0x48] ss:$16 sps:$4 sm:$0xff]  }
 0x1ad   :  { %v6251_v17 = vadd.f32 %v4219_v16, %v4107_v32  ;;  %3014 = vmatprep.mubr.bf16.mxu1 %v5050_v51  ;;  %v5056_v32 = vld [vmem:[%s6753_s3 + $0x6c] ss:$16 sps:$4 sm:$0xff]  }
 0x1ae   :  { %v4108_v37 = vpop.f32.mrb[92].mxu0 }
 0x1af   :  { %v4220_v15 = vpop.f32.mrb[92].mxu1  ;;  %v4109_v8 = vpop.f32.mrb[93].mxu0 }
 0x1b0   :  { %v4110_v13 = vadd.f32 %v4109_v8, %v4108_v37  ;;  %v4221_v22 = vpop.f32.mrb[93].mxu1  ;;  %v4111_v19 = vpop.f32.mrb[94].mxu0 }
 0x1b1   :  { %v4222_v44 = vadd.f32 %v4221_v22, %v4220_v15  ;;  %v4223_v49 = vpop.f32.mrb[94].mxu1  ;;  %v4112_v51 = vpop.f32.mrb[95].mxu0 }
 0x1b2   :  { %v4113_v7 = vadd.f32 %v4112_v51, %v4111_v19  ;;  %v4224_v16 = vpop.f32.mrb[95].mxu1 }
 0x1b3   :  { %v6267_v8 = vadd.f32 %v4222_v44, %v4110_v13  ;;  %v4225_v37 = vadd.f32 %v4224_v16, %v4223_v49  ;;  %2855 = vmatmul.mubr.bf16.gmra.mrb[200].mxu0 %v5052_v26  ;;  %v5058_v13 = vld [vmem:[%s6753_s3 + $0x60] ss:$16 sps:$4 sm:$0xff]   ;;  %v5060_v44 = vld [vmem:[%s6753_s3 + $0x84] ss:$16 sps:$4 sm:$0xff]  }
 0x1b4   :  { %3015 = vmatmul.mubr.bf16.gmra.mrb[200].mxu1 %v5053_v20  ;;  %2862 = vmatprep.mubr.bf16.mxu0 %v5054_v48  ;;  %v5059_v48 = vld [vmem:[%s6753_s3 + $0x68] ss:$16 sps:$4 sm:$0xff]  }
 0x1b5   :  { %v6271_v18 = vadd.f32 %v4225_v37, %v4113_v7  ;;  %3022 = vmatprep.mubr.bf16.mxu1 %v5056_v32  ;;  %v5062_v7 = vld [vmem:[%s6753_s3 + $0x8c] ss:$16 sps:$4 sm:$0xff]  }
 0x1b6   :  { %v4114_v15 = vpop.f32.mrb[96].mxu0 }
 0x1b7   :  { %6781 = vst [vmem:[#allocation10_spill] sm:$0xff] %v6271_v18  ;;  %v4226_v46 = vpop.f32.mrb[96].mxu1  ;;  %v4115_v40 = vpop.f32.mrb[97].mxu0 }
 0x1b8   :  { %v4116_v19 = vadd.f32 %v4115_v40, %v4114_v15  ;;  %v4227_v26 = vpop.f32.mrb[97].mxu1  ;;  %v4117_v20 = vpop.f32.mrb[98].mxu0 }
 0x1b9   :  { %v4228_v49 = vadd.f32 %v4227_v26, %v4226_v46  ;;  %v4229_v51 = vpop.f32.mrb[98].mxu1  ;;  %v4118_v32 = vpop.f32.mrb[99].mxu0 }
 0x1ba   :  { %v4119_v16 = vadd.f32 %v4118_v32, %v4117_v20  ;;  %v4230_v37 = vpop.f32.mrb[99].mxu1 }
 0x1bb   :  { %v6287_v40 = vadd.f32 %v4228_v49, %v4116_v19  ;;  %v4231_v15 = vadd.f32 %v4230_v37, %v4229_v51  ;;  %2863 = vmatmul.mubr.bf16.gmra.mrb[204].mxu0 %v5058_v13  ;;  %v5064_v19 = vld [vmem:[%s6753_s3 + $0x80] ss:$16 sps:$4 sm:$0xff]   ;;  %v5066_v49 = vld [vmem:[%s6753_s3 + $0xa4] ss:$16 sps:$4 sm:$0xff]  }
 0x1bc   :  { %3023 = vmatmul.mubr.bf16.gmra.mrb[204].mxu1 %v5059_v48  ;;  %2870 = vmatprep.mubr.bf16.mxu0 %v5060_v44  ;;  %v5065_v44 = vld [vmem:[%s6753_s3 + $0x88] ss:$16 sps:$4 sm:$0xff]  }
 0x1bd   :  { %v6291_v39 = vadd.f32 %v4231_v15, %v4119_v16  ;;  %3030 = vmatprep.mubr.bf16.mxu1 %v5062_v7  ;;  %v5068_v16 = vld [vmem:[%s6753_s3 + $0xac] ss:$16 sps:$4 sm:$0xff]  }
 0x1be   :  { %v4120_v46 = vpop.f32.mrb[100].mxu0 }
 0x1bf   :  { %6782 = vst [vmem:[#allocation11_spill] sm:$0xff] %v6291_v39  ;;  %v4232_v18 = vpop.f32.mrb[100].mxu1  ;;  %v4121_v25 = vpop.f32.mrb[101].mxu0 }
 0x1c0   :  { %v4122_v20 = vadd.f32 %v4121_v25, %v4120_v46  ;;  %v4233_v13 = vpop.f32.mrb[101].mxu1  ;;  %v4123_v48 = vpop.f32.mrb[102].mxu0 }
 0x1c1   :  { %v4234_v51 = vadd.f32 %v4233_v13, %v4232_v18  ;;  %v4235_v32 = vpop.f32.mrb[102].mxu1  ;;  %v4124_v7 = vpop.f32.mrb[103].mxu0 }
 0x1c2   :  { %v4125_v37 = vadd.f32 %v4124_v7, %v4123_v48  ;;  %v4236_v15 = vpop.f32.mrb[103].mxu1 }
 0x1c3   :  { %v6307_v25 = vadd.f32 %v4234_v51, %v4122_v20  ;;  %v4237_v46 = vadd.f32 %v4236_v15, %v4235_v32  ;;  %2871 = vmatmul.mubr.bf16.gmra.mrb[208].mxu0 %v5064_v19  ;;  %v5070_v20 = vld [vmem:[%s6753_s3 + $0xa0] ss:$16 sps:$4 sm:$0xff]   ;;  %v5072_v51 = vld [vmem:[%s6753_s3 + $0xc4] ss:$16 sps:$4 sm:$0xff]  }
 0x1c4   :  { %3031 = vmatmul.mubr.bf16.gmra.mrb[208].mxu1 %v5065_v44  ;;  %2878 = vmatprep.mubr.bf16.mxu0 %v5066_v49  ;;  %v5071_v49 = vld [vmem:[%s6753_s3 + $0xa8] ss:$16 sps:$4 sm:$0xff]  }
 0x1c5   :  { %v6311_v22 = vadd.f32 %v4237_v46, %v4125_v37  ;;  %3038 = vmatprep.mubr.bf16.mxu1 %v5068_v16  ;;  %v5074_v37 = vld [vmem:[%s6753_s3 + $0xcc] ss:$16 sps:$4 sm:$0xff]  }
 0x1c6   :  { %v4126_v18 = vpop.f32.mrb[104].mxu0 }
 0x1c7   :  { %6783 = vst [vmem:[#allocation12_spill] sm:$0xff] %v6311_v22  ;;  %v4238_v39 = vpop.f32.mrb[104].mxu1  ;;  %v4127_v33 = vpop.f32.mrb[105].mxu0 }
 0x1c8   :  { %v4128_v48 = vadd.f32 %v4127_v33, %v4126_v18  ;;  %v4239_v19 = vpop.f32.mrb[105].mxu1  ;;  %v4129_v44 = vpop.f32.mrb[106].mxu0 }
 0x1c9   :  { %v4240_v32 = vadd.f32 %v4239_v19, %v4238_v39  ;;  %v4241_v7 = vpop.f32.mrb[106].mxu1  ;;  %v4130_v16 = vpop.f32.mrb[107].mxu0 }
 0x1ca   :  { %v4131_v15 = vadd.f32 %v4130_v16, %v4129_v44  ;;  %v4242_v46 = vpop.f32.mrb[107].mxu1 }
 0x1cb   :  { %v6327_v33 = vadd.f32 %v4240_v32, %v4128_v48  ;;  %v4243_v18 = vadd.f32 %v4242_v46, %v4241_v7  ;;  %2879 = vmatmul.mubr.bf16.gmra.mrb[212].mxu0 %v5070_v20  ;;  %v5076_v48 = vld [vmem:[%s6753_s3 + $0xc0] ss:$16 sps:$4 sm:$0xff]   ;;  %v5078_v32 = vld [vmem:[%s6753_s3 + $0xe4] ss:$16 sps:$4 sm:$0xff]  }
 0x1cc   :  { %3039 = vmatmul.mubr.bf16.gmra.mrb[212].mxu1 %v5071_v49  ;;  %2886 = vmatprep.mubr.bf16.mxu0 %v5072_v51  ;;  %v5077_v51 = vld [vmem:[%s6753_s3 + $0xc8] ss:$16 sps:$4 sm:$0xff]  }
 0x1cd   :  { %v6331_v26 = vadd.f32 %v4243_v18, %v4131_v15  ;;  %3046 = vmatprep.mubr.bf16.mxu1 %v5074_v37  ;;  %v5080_v15 = vld [vmem:[%s6753_s3 + $0xec] ss:$16 sps:$4 sm:$0xff]  }
 0x1ce   :  { %v4132_v39 = vpop.f32.mrb[108].mxu0 }
 0x1cf   :  { %6784 = vst [vmem:[#allocation13_spill] sm:$0xff] %v6331_v26  ;;  %v4244_v22 = vpop.f32.mrb[108].mxu1  ;;  %v4133_v29 = vpop.f32.mrb[109].mxu0 }
 0x1d0   :  { %v4134_v44 = vadd.f32 %v4133_v29, %v4132_v39  ;;  %v4245_v20 = vpop.f32.mrb[109].mxu1  ;;  %v4135_v49 = vpop.f32.mrb[110].mxu0 }
 0x1d1   :  { %v4246_v7 = vadd.f32 %v4245_v20, %v4244_v22  ;;  %v4247_v16 = vpop.f32.mrb[110].mxu1  ;;  %v4136_v37 = vpop.f32.mrb[111].mxu0 }
 0x1d2   :  { %v4137_v46 = vadd.f32 %v4136_v37, %v4135_v49  ;;  %v4248_v18 = vpop.f32.mrb[111].mxu1 }
 0x1d3   :  { %v6347_v29 = vadd.f32 %v4246_v7, %v4134_v44  ;;  %v4249_v39 = vadd.f32 %v4248_v18, %v4247_v16  ;;  %2887 = vmatmul.mubr.bf16.gmra.mrb[216].mxu0 %v5076_v48  ;;  %v5082_v44 = vld [vmem:[%s6753_s3 + $0xe0] ss:$16 sps:$4 sm:$0xff]   ;;  %v5084_v7 = vld [vmem:[%s6753_s3 + $0x104] ss:$16 sps:$4 sm:$0xff]  }
 0x1d4   :  { %3047 = vmatmul.mubr.bf16.gmra.mrb[216].mxu1 %v5077_v51  ;;  %2894 = vmatprep.mubr.bf16.mxu0 %v5078_v32  ;;  %v5083_v32 = vld [vmem:[%s6753_s3 + $0xe8] ss:$16 sps:$4 sm:$0xff]  }
 0x1d5   :  { %v6351_v13 = vadd.f32 %v4249_v39, %v4137_v46  ;;  %3054 = vmatprep.mubr.bf16.mxu1 %v5080_v15  ;;  %v5086_v46 = vld [vmem:[%s6753_s3 + $0x10c] ss:$16 sps:$4 sm:$0xff]  }
 0x1d6   :  { %v4138_v22 = vpop.f32.mrb[112].mxu0 }
 0x1d7   :  { %6785 = vst [vmem:[#allocation14_spill] sm:$0xff] %v6351_v13  ;;  %v4250_v26 = vpop.f32.mrb[112].mxu1  ;;  %v4139_v56 = vpop.f32.mrb[113].mxu0 }
 0x1d8   :  { %v4140_v49 = vadd.f32 %v4139_v56, %v4138_v22  ;;  %v4251_v48 = vpop.f32.mrb[113].mxu1  ;;  %v4141_v51 = vpop.f32.mrb[114].mxu0 }
 0x1d9   :  { %v4252_v16 = vadd.f32 %v4251_v48, %v4250_v26  ;;  %v4253_v37 = vpop.f32.mrb[114].mxu1  ;;  %v4142_v15 = vpop.f32.mrb[115].mxu0 }
 0x1da   :  { %v4143_v18 = vadd.f32 %v4142_v15, %v4141_v51  ;;  %v4254_v39 = vpop.f32.mrb[115].mxu1 }
 0x1db   :  { %v6367_v56 = vadd.f32 %v4252_v16, %v4140_v49  ;;  %v4255_v22 = vadd.f32 %v4254_v39, %v4253_v37  ;;  %2895 = vmatmul.mubr.bf16.gmra.mrb[220].mxu0 %v5082_v44  ;;  %v5088_v49 = vld [vmem:[%s6753_s3 + $0x100] ss:$16 sps:$4 sm:$0xff]   ;;  %v5090_v16 = vld [vmem:[%s6753_s3 + $0x124] ss:$16 sps:$4 sm:$0xff]  }
 0x1dc   :  { %3055 = vmatmul.mubr.bf16.gmra.mrb[220].mxu1 %v5083_v32  ;;  %2902 = vmatprep.mubr.bf16.mxu0 %v5084_v7  ;;  %v5089_v7 = vld [vmem:[%s6753_s3 + $0x108] ss:$16 sps:$4 sm:$0xff]  }
 0x1dd   :  { %v6371_v19 = vadd.f32 %v4255_v22, %v4143_v18  ;;  %3062 = vmatprep.mubr.bf16.mxu1 %v5086_v46  ;;  %v5092_v18 = vld [vmem:[%s6753_s3 + $0x12c] ss:$16 sps:$4 sm:$0xff]  }
 0x1de   :  { %v4144_v26 = vpop.f32.mrb[116].mxu0 }
 0x1df   :  { %6786 = vst [vmem:[#allocation15_spill] sm:$0xff] %v6371_v19  ;;  %v4256_v13 = vpop.f32.mrb[116].mxu1  ;;  %v4145_v14 = vpop.f32.mrb[117].mxu0 }
 0x1e0   :  { %v4146_v51 = vadd.f32 %v4145_v14, %v4144_v26  ;;  %v4257_v44 = vpop.f32.mrb[117].mxu1  ;;  %v4147_v32 = vpop.f32.mrb[118].mxu0 }
 0x1e1   :  { %v4258_v37 = vadd.f32 %v4257_v44, %v4256_v13  ;;  %v4259_v15 = vpop.f32.mrb[118].mxu1  ;;  %v4148_v46 = vpop.f32.mrb[119].mxu0  ;;  %v6790_v44 = vmax.f32 %v5795_v63, %v6133_v31  ;;  %v5113_v63 = vld [vmem:[%s6753_s3 + $0x188] ss:$16 sps:$4 sm:$0xff]   ;;  %v5114_v31 = vld [vmem:[%s6753_s3 + $0x1a4] ss:$16 sps:$4 sm:$0xff]  }
 0x1e2   :  { %v4149_v39 = vadd.f32 %v4148_v46, %v4147_v32  ;;  %v4260_v22 = vpop.f32.mrb[119].mxu1 }
 0x1e3   :  { %v6387_v14 = vadd.f32 %v4258_v37, %v4146_v51  ;;  %v4261_v26 = vadd.f32 %v4260_v22, %v4259_v15  ;;  %2903 = vmatmul.mubr.bf16.gmra.mrb[224].mxu0 %v5088_v49  ;;  %v5094_v51 = vld [vmem:[%s6753_s3 + $0x120] ss:$16 sps:$4 sm:$0xff]   ;;  %v5096_v37 = vld [vmem:[%s6753_s3 + $0x144] ss:$16 sps:$4 sm:$0xff]  }
 0x1e4   :  { %3063 = vmatmul.mubr.bf16.gmra.mrb[224].mxu1 %v5089_v7  ;;  %2910 = vmatprep.mubr.bf16.mxu0 %v5090_v16  ;;  %v5095_v16 = vld [vmem:[%s6753_s3 + $0x128] ss:$16 sps:$4 sm:$0xff]  }
 0x1e5   :  { %v6391_v20 = vadd.f32 %v4261_v26, %v4149_v39  ;;  %3070 = vmatprep.mubr.bf16.mxu1 %v5092_v18  ;;  %v5098_v39 = vld [vmem:[%s6753_s3 + $0x14c] ss:$16 sps:$4 sm:$0xff]  }
 0x1e6   :  { %v4150_v13 = vpop.f32.mrb[120].mxu0 }
 0x1e7   :  { %6787 = vst [vmem:[#allocation16_spill] sm:$0xff] %v6391_v20  ;;  %v4262_v19 = vpop.f32.mrb[120].mxu1  ;;  %v4151_v47 = vpop.f32.mrb[121].mxu0 }
 0x1e8   :  { %v4152_v32 = vadd.f32 %v4151_v47, %v4150_v13  ;;  %v4263_v49 = vpop.f32.mrb[121].mxu1  ;;  %v4153_v7 = vpop.f32.mrb[122].mxu0 }
 0x1e9   :  { %v4264_v15 = vadd.f32 %v4263_v49, %v4262_v19  ;;  %v4265_v46 = vpop.f32.mrb[122].mxu1  ;;  %v4154_v18 = vpop.f32.mrb[123].mxu0 }
 0x1ea   :  { %v4155_v22 = vadd.f32 %v4154_v18, %v4153_v7  ;;  %v4266_v26 = vpop.f32.mrb[123].mxu1 }
 0x1eb   :  { %v6407_v47 = vadd.f32 %v4264_v15, %v4152_v32  ;;  %v4267_v13 = vadd.f32 %v4266_v26, %v4265_v46  ;;  %2911 = vmatmul.mubr.bf16.gmra.mrb[228].mxu0 %v5094_v51  ;;  %v5100_v32 = vld [vmem:[%s6753_s3 + $0x140] ss:$16 sps:$4 sm:$0xff]   ;;  %v5102_v15 = vld [vmem:[%s6753_s3 + $0x164] ss:$16 sps:$4 sm:$0xff]  }
 0x1ec   :  { %3071 = vmatmul.mubr.bf16.gmra.mrb[228].mxu1 %v5095_v16  ;;  %2918 = vmatprep.mubr.bf16.mxu0 %v5096_v37  ;;  %v5101_v37 = vld [vmem:[%s6753_s3 + $0x148] ss:$16 sps:$4 sm:$0xff]  }
 0x1ed   :  { %v6411_v48 = vadd.f32 %v4267_v13, %v4155_v22  ;;  %3078 = vmatprep.mubr.bf16.mxu1 %v5098_v39  ;;  %v5104_v22 = vld [vmem:[%s6753_s3 + $0x16c] ss:$16 sps:$4 sm:$0xff]  }
 0x1ee   :  { %v4156_v19 = vpop.f32.mrb[124].mxu0 }
 0x1ef   :  { %6788 = vst [vmem:[#allocation17_spill] sm:$0xff] %v6411_v48  ;;  %v4268_v20 = vpop.f32.mrb[124].mxu1  ;;  %v4157_v5 = vpop.f32.mrb[125].mxu0 }
 0x1f0   :  { %v4158_v7 = vadd.f32 %v4157_v5, %v4156_v19  ;;  %v4269_v51 = vpop.f32.mrb[125].mxu1  ;;  %v4159_v16 = vpop.f32.mrb[126].mxu0 }
 0x1f1   :  { %v4270_v46 = vadd.f32 %v4269_v51, %v4268_v20  ;;  %v4271_v18 = vpop.f32.mrb[126].mxu1  ;;  %v4160_v39 = vpop.f32.mrb[127].mxu0  ;;  %v5106_v20 = vld [vmem:[%s6753_s3 + $0x160] ss:$16 sps:$4 sm:$0xff]  }
 0x1f2   :  { %v4272_v26 = vpop.f32.mrb[127].mxu1 }
 0x1f3   :  { %v6427_v13 = vadd.f32 %v4270_v46, %v4158_v7  ;;  %2919 = vmatmul.mubr.bf16.gmra.mrb[232].mxu0 %v5100_v32  ;;  %v5107_v32 = vld [vmem:[%s6753_s3 + $0x168] ss:$16 sps:$4 sm:$0xff]   ;;  %v5108_v7 = vld [vmem:[%s6753_s3 + $0x184] ss:$16 sps:$4 sm:$0xff]  }
 0x1f4   :  { %3079 = vmatmul.mubr.bf16.gmra.mrb[232].mxu1 %v5101_v37  ;;  %2926 = vmatprep.mubr.bf16.mxu0 %v5102_v15 }
 0x1f5   :  { %6789 = vst [vmem:[#allocation18_spill] sm:$0xff] %v6427_v13  ;;  %3086 = vmatprep.mubr.bf16.mxu1 %v5104_v22  ;;  %v5110_v22 = vld [vmem:[%s6753_s3 + $0x18c] ss:$16 sps:$4 sm:$0xff]  }
 0x1f6   :  { %v4290_v19 = vpop.f32.mrb[128].mxu0 }
 0x1f7   :  { %v4402_v16 = vpop.f32.mrb[128].mxu1  ;;  %v4291_v49 = vpop.f32.mrb[129].mxu0 }
 0x1f8   :  { %v4292_v51 = vadd.f32 %v4291_v49, %v4290_v19  ;;  %v4403_v18 = vpop.f32.mrb[129].mxu1  ;;  %v4293_v39 = vpop.f32.mrb[130].mxu0 }
 0x1f9   :  { %v4404_v37 = vadd.f32 %v4403_v18, %v4402_v16  ;;  %v4405_v15 = vpop.f32.mrb[130].mxu1  ;;  %v4294_v46 = vpop.f32.mrb[131].mxu0  ;;  %v6791_v18 = vmax.f32 %v5797_v1, %v6137_v42 }
 0x1fa   :  { %v4295_v26 = vadd.f32 %v4294_v46, %v4293_v39  ;;  %v4406_v5 = vpop.f32.mrb[131].mxu1 }
 0x1fb   :  { %v2274_v49 = vadd.f32 %v4404_v37, %v4292_v51  ;;  %v4407_v19 = vadd.f32 %v4406_v5, %v4405_v15  ;;  %2927 = vmatmul.mubr.bf16.gmra.mrb[236].mxu0 %v5106_v20  ;;  %v5112_v5 = vld [vmem:[%s6753_s3 + $0x180] ss:$16 sps:$4 sm:$0xff]  }
 0x1fc   :  { %3087 = vmatmul.mubr.bf16.gmra.mrb[236].mxu1 %v5107_v32  ;;  %2934 = vmatprep.mubr.bf16.mxu0 %v5108_v7 }
 0x1fd   :  { %v6446_v13 = vmax.f32 %v6790_v44, %v2274_v49  ;;  %v2277_v36 = vadd.f32 %v4407_v19, %v4295_v26  ;;  %3094 = vmatprep.mubr.bf16.mxu1 %v5110_v22  ;;  %v5116_v44 = vld [vmem:[%s6753_s3 + $0x1ac] ss:$16 sps:$4 sm:$0xff]   ;;  %v6792_v26 = vmax.f32 %v5811_v10, %v6153_v3  ;;  %v5119_v10 = vld [vmem:[%s6753_s3 + $0x1a8] ss:$16 sps:$4 sm:$0xff]   ;;  %v5120_v3 = vld [vmem:[%s6753_s3 + $0x1c4] ss:$16 sps:$4 sm:$0xff]  }
 0x1fe   :  { %v4296_v16 = vpop.f32.mrb[132].mxu0 }
 0x1ff   :  { %v6451_v48 = vmax.f32 %v6791_v18, %v2277_v36  ;;  %v4408_v39 = vpop.f32.mrb[132].mxu1  ;;  %v4297_v46 = vpop.f32.mrb[133].mxu0  ;;  %v6793_v18 = vmax.f32 %v5813_v12, %v6157_v9 }
 0x200   :  { %v4298_v20 = vadd.f32 %v4297_v46, %v4296_v16  ;;  %v4409_v51 = vpop.f32.mrb[133].mxu1  ;;  %v4299_v32 = vpop.f32.mrb[134].mxu0 }
 0x201   :  { %v4410_v1 = vadd.f32 %v4409_v51, %v4408_v39  ;;  %v4411_v36 = vpop.f32.mrb[134].mxu1  ;;  %v4300_v42 = vpop.f32.mrb[135].mxu0 }
 0x202   :  { %v4301_v7 = vadd.f32 %v4300_v42, %v4299_v32  ;;  %v4412_v37 = vpop.f32.mrb[135].mxu1 }
 0x203   :  { %v2282_v15 = vadd.f32 %v4410_v1, %v4298_v20  ;;  %v4413_v22 = vadd.f32 %v4412_v37, %v4411_v36  ;;  %2935 = vmatmul.mubr.bf16.gmra.mrb[240].mxu0 %v5112_v5  ;;  %v5118_v5 = vld [vmem:[%s6753_s3 + $0x1a0] ss:$16 sps:$4 sm:$0xff]   ;;  %v5122_v1 = vld [vmem:[%s6753_s3 + $0x1cc] ss:$16 sps:$4 sm:$0xff]   ;;  %v6794_v37 = vmax.f32 %v5827_v28, %v6173_v54 }
 0x204   :  { %3095 = vmatmul.mubr.bf16.gmra.mrb[240].mxu1 %v5113_v63  ;;  %2942 = vmatprep.mubr.bf16.mxu0 %v5114_v31  ;;  %v5124_v54 = vld [vmem:[%s6753_s3 + $0x1c0] ss:$16 sps:$4 sm:$0xff]  }
 0x205   :  { %v6468_v49 = vmax.f32 %v6792_v26, %v2282_v15  ;;  %v2285_v19 = vadd.f32 %v4413_v22, %v4301_v7  ;;  %3102 = vmatprep.mubr.bf16.mxu1 %v5116_v44  ;;  %v2490_v26 = vld [vmem:[%s6753_s3 + $0x1e0] sm:$0xff] }
 0x206   :  { %v4302_v16 = vpop.f32.mrb[136].mxu0 }
 0x207   :  { %v6473_v39 = vmax.f32 %v6793_v18, %v2285_v19  ;;  %v4414_v46 = vpop.f32.mrb[136].mxu1  ;;  %v4303_v51 = vpop.f32.mrb[137].mxu0  ;;  %v6795_v18 = vmax.f32 %v5829_v30, %v6177_v62 }
 0x208   :  { %v4304_v20 = vadd.f32 %v4303_v51, %v4302_v16  ;;  %v4415_v32 = vpop.f32.mrb[137].mxu1  ;;  %v4305_v63 = vpop.f32.mrb[138].mxu0  ;;  %v2491_v16 = vld [vmem:[%s6753_s3 + $0x1e8] sm:$0xff] }
 0x209   :  { %v4416_v12 = vadd.f32 %v4415_v32, %v4414_v46  ;;  %v4417_v9 = vpop.f32.mrb[138].mxu1  ;;  %v4306_v31 = vpop.f32.mrb[139].mxu0  ;;  %v3673_v30 = vcombine.high %v2491_v16, %v2491_v16 }
 0x20a   :  { %v4307_v36 = vadd.f32 %v4306_v31, %v4305_v63  ;;  %v4418_v42 = vpop.f32.mrb[139].mxu1  ;;  %v5125_v63 = vld [vmem:[%s6753_s3 + $0x1c8] ss:$16 sps:$4 sm:$0xff]  }
 0x20b   :  { %v2290_v44 = vadd.f32 %v4416_v12, %v4304_v20  ;;  %v4419_v7 = vadd.f32 %v4418_v42, %v4417_v9  ;;  %2943 = vmatmul.mubr.bf16.gmra.mrb[244].mxu0 %v5118_v5  ;;  %v6796_v42 = vmax.f32 %v5843_v55, %v6193_v50 }
 0x20c   :  { %3103 = vmatmul.mubr.bf16.gmra.mrb[244].mxu1 %v5119_v10  ;;  %2950 = vmatprep.mubr.bf16.mxu0 %v5120_v3  ;;  %v3671_v10 = vcombine.high %v2490_v26, %v2490_v26 }
 0x20d   :  { %v6490_v15 = vmax.f32 %v6794_v37, %v2290_v44  ;;  %v2293_v22 = vadd.f32 %v4419_v7, %v4307_v36  ;;  %3110 = vmatprep.mubr.bf16.mxu1 %v5122_v1 }
 0x20e   :  { %v4308_v19 = vpop.f32.mrb[140].mxu0 }
 0x20f   :  { %v6501_v46 = vmax.f32 %v6795_v18, %v2293_v22  ;;  %v4420_v51 = vpop.f32.mrb[140].mxu1  ;;  %v4309_v28 = vpop.f32.mrb[141].mxu0  ;;  %v6797_v22 = vmax.f32 %v5845_v57, %v6197_v58  ;;  %v6798_v57 = vmax.f32 %v5853_v4, %v6207_v38 }
 0x210   :  { %v4310_v5 = vadd.f32 %v4309_v28, %v4308_v19  ;;  %v4421_v20 = vpop.f32.mrb[141].mxu1  ;;  %v4311_v32 = vpop.f32.mrb[142].mxu0  ;;  %v3670_v28 = vcombine.low %v2490_v26, %v2490_v26 }
 0x211   :  { %v4422_v3 = vadd.f32 %v4421_v20, %v4420_v51  ;;  %v4423_v12 = vpop.f32.mrb[142].mxu1  ;;  %v4312_v9 = vpop.f32.mrb[143].mxu0 }
 0x212   :  { %v4313_v62 = vadd.f32 %v4312_v9, %v4311_v32  ;;  %v4424_v31 = vpop.f32.mrb[143].mxu1  ;;  %v3672_v32 = vcombine.low %v2491_v16, %v2491_v16 }
 0x213   :  { %v2298_v1 = vadd.f32 %v4422_v3, %v4310_v5  ;;  %v4425_v36 = vadd.f32 %v4424_v31, %v4423_v12  ;;  %2951 = vmatmul.mubr.bf16.gmra.mrb[248].mxu0 %v5124_v54 }
 0x214   :  { %3111 = vmatmul.mubr.bf16.gmra.mrb[248].mxu1 %v5125_v63  ;;  %2958 = vmatprep.mubr.bf16.mxu0 %v3671_v10 }
 0x215   :  { %v6512_v44 = vmax.f32 %v6796_v42, %v2298_v1  ;;  %v2301_v7 = vadd.f32 %v4425_v36, %v4313_v62  ;;  %3118 = vmatprep.mubr.bf16.mxu1 %v3673_v30  ;;  %v6799_v62 = vmax.f32 %v5855_v6, %v6211_v34 }
 0x216   :  { %v4314_v37 = vpop.f32.mrb[144].mxu0 }
 0x217   :  { %v6517_v19 = vmax.f32 %v6797_v22, %v2301_v7  ;;  %v4426_v18 = vpop.f32.mrb[144].mxu1  ;;  %v4315_v51 = vpop.f32.mrb[145].mxu0 }
 0x218   :  { %v4316_v5 = vadd.f32 %v4315_v51, %v4314_v37  ;;  %v4427_v54 = vpop.f32.mrb[145].mxu1  ;;  %v4317_v20 = vpop.f32.mrb[146].mxu0 }
 0x219   :  { %v4428_v63 = vadd.f32 %v4427_v54, %v4426_v18  ;;  %v4429_v10 = vpop.f32.mrb[146].mxu1  ;;  %v4318_v55 = vpop.f32.mrb[147].mxu0 }
 0x21a   :  { %v4319_v50 = vadd.f32 %v4318_v55, %v4317_v20  ;;  %v4430_v3 = vpop.f32.mrb[147].mxu1  ;;  %v6801_v20 = vmax.f32 %v5874_v27, %v6231_v35 }
 0x21b   :  { %v2306_v12 = vadd.f32 %v4428_v63, %v4316_v5  ;;  %v4431_v9 = vadd.f32 %v4430_v3, %v4429_v10  ;;  %2959 = vmatmul.mubr.bf16.gmra.mrb[252].mxu0 %v3670_v28  ;;  %v6800_v5 = vmax.f32 %v5869_v24, %v6227_v52 }
 0x21c   :  { %3119 = vmatmul.mubr.bf16.gmra.mrb[252].mxu1 %v3672_v32 }
 0x21d   :  { %v6522_v58 = vmax.f32 %v6798_v57, %v2306_v12  ;;  %v2309_v30 = vadd.f32 %v4431_v9, %v4319_v50 }
 0x21e   :  { %v4320_v26 = vpop.f32.mrb[148].mxu0 }
 0x21f   :  { %v6527_v16 = vmax.f32 %v6799_v62, %v2309_v30  ;;  %v4432_v31 = vpop.f32.mrb[148].mxu1  ;;  %v4321_v1 = vpop.f32.mrb[149].mxu0  ;;  %v6802_v62 = vmax.f32 %v5909_v61, %v6247_v59 }
 0x220   :  { %v4322_v36 = vadd.f32 %v4321_v1, %v4320_v26  ;;  %v4433_v42 = vpop.f32.mrb[149].mxu1  ;;  %v4323_v7 = vpop.f32.mrb[150].mxu0  ;;  %v6803_v1 = vmax.f32 %v5911_v0, %v6251_v17 }
 0x221   :  { %v4434_v37 = vadd.f32 %v4433_v42, %v4432_v31  ;;  %v4435_v22 = vpop.f32.mrb[150].mxu1  ;;  %v4324_v18 = vpop.f32.mrb[151].mxu0 }
 0x222   :  { %v4325_v51 = vadd.f32 %v4324_v18, %v4323_v7  ;;  %v4436_v28 = vpop.f32.mrb[151].mxu1 }
 0x223   :  { %v2314_v4 = vadd.f32 %v4434_v37, %v4322_v36  ;;  %v4437_v38 = vadd.f32 %v4436_v28, %v4435_v22 }
 0x225   :  { %v6532_v54 = vmax.f32 %v6800_v5, %v2314_v4  ;;  %v2317_v6 = vadd.f32 %v4437_v38, %v4325_v51 }
 0x226   :  { %v4326_v34 = vpop.f32.mrb[152].mxu0 }
 0x227   :  { %v6537_v32 = vmax.f32 %v6801_v20, %v2317_v6  ;;  %v4438_v63 = vpop.f32.mrb[152].mxu1  ;;  %v4327_v10 = vpop.f32.mrb[153].mxu0  ;;  %v6804_v6 = vmax.f32 %v5946_v21, %v6267_v8  ;;  %v6805_v20 = vld [vmem:[#allocation2_spill] sm:$0xff] }
 0x228   :  { %v4328_v55 = vadd.f32 %v4327_v10, %v4326_v34  ;;  %v4439_v50 = vpop.f32.mrb[153].mxu1  ;;  %v4329_v3 = vpop.f32.mrb[154].mxu0 }
 0x229   :  { %v4440_v12 = vadd.f32 %v4439_v50, %v4438_v63  ;;  %v4441_v9 = vpop.f32.mrb[154].mxu1  ;;  %v4330_v57 = vpop.f32.mrb[155].mxu0  ;;  %v6806_v63 = vld [vmem:[#allocation10_spill] sm:$0xff] }
 0x22a   :  { %v4331_v30 = vadd.f32 %v4330_v57, %v4329_v3  ;;  %v4442_v26 = vpop.f32.mrb[155].mxu1  ;;  %v6807_v10 = vmax.f32 %v6805_v20, %v6806_v63  ;;  %v6812_v20 = vmax.f32 %v6023_v23, %v6307_v25 }
 0x22b   :  { %v2322_v24 = vadd.f32 %v4440_v12, %v4328_v55  ;;  %v4443_v52 = vadd.f32 %v4442_v26, %v4441_v9 }
 0x22d   :  { %v6542_v31 = vmax.f32 %v6802_v62, %v2322_v24  ;;  %v2325_v27 = vadd.f32 %v4443_v52, %v4331_v30 }
 0x22e   :  { %v4332_v35 = vpop.f32.mrb[156].mxu0 }
 0x22f   :  { %v6547_v36 = vmax.f32 %v6803_v1, %v2325_v27  ;;  %v4444_v42 = vpop.f32.mrb[156].mxu1  ;;  %v4333_v7 = vpop.f32.mrb[157].mxu0  ;;  %v6808_v27 = vmax.f32 %v5986_v60, %v6287_v40 }
 0x230   :  { %v4334_v37 = vadd.f32 %v4333_v7, %v4332_v35  ;;  %v4445_v22 = vpop.f32.mrb[157].mxu1  ;;  %v4335_v18 = vpop.f32.mrb[158].mxu0  ;;  %v6809_v7 = vld [vmem:[#allocation3_spill] sm:$0xff] }
 0x231   :  { %v4446_v51 = vadd.f32 %v4445_v22, %v4444_v42  ;;  %v4447_v28 = vpop.f32.mrb[158].mxu1  ;;  %v4336_v4 = vpop.f32.mrb[159].mxu0 }
 0x232   :  { %v4337_v38 = vadd.f32 %v4336_v4, %v4335_v18  ;;  %v4448_v5 = vpop.f32.mrb[159].mxu1 }
 0x233   :  { %v2330_v61 = vadd.f32 %v4446_v51, %v4334_v37  ;;  %v4449_v59 = vadd.f32 %v4448_v5, %v4447_v28  ;;  %v6810_v37 = vld [vmem:[#allocation11_spill] sm:$0xff] }
 0x234   :  { %v6811_v22 = vmax.f32 %v6809_v7, %v6810_v37  ;;  %v6816_v7 = vmax.f32 %v6039_v53, %v6327_v33 }
 0x235   :  { %v6552_v34 = vmax.f32 %v6804_v6, %v2330_v61  ;;  %v2333_v0 = vadd.f32 %v4449_v59, %v4337_v38 }
 0x236   :  { %v4338_v17 = vpop.f32.mrb[160].mxu0 }
 0x237   :  { %v6557_v55 = vmax.f32 %v6807_v10, %v2333_v0  ;;  %v4450_v50 = vpop.f32.mrb[160].mxu1  ;;  %v4339_v3 = vpop.f32.mrb[161].mxu0 }
 0x238   :  { %v4340_v12 = vadd.f32 %v4339_v3, %v4338_v17  ;;  %v4451_v9 = vpop.f32.mrb[161].mxu1  ;;  %v4341_v57 = vpop.f32.mrb[162].mxu0  ;;  %v6813_v3 = vld [vmem:[#allocation4_spill] sm:$0xff] }
 0x239   :  { %v4452_v30 = vadd.f32 %v4451_v9, %v4450_v50  ;;  %v4453_v26 = vpop.f32.mrb[162].mxu1  ;;  %v4342_v24 = vpop.f32.mrb[163].mxu0 }
 0x23a   :  { %v4343_v52 = vadd.f32 %v4342_v24, %v4341_v57  ;;  %v4454_v62 = vpop.f32.mrb[163].mxu1 }
 0x23b   :  { %v2338_v21 = vadd.f32 %v4452_v30, %v4340_v12  ;;  %v4455_v8 = vadd.f32 %v4454_v62, %v4453_v26  ;;  %v6814_v12 = vld [vmem:[#allocation12_spill] sm:$0xff] }
 0x23c   :  { %v6815_v9 = vmax.f32 %v6813_v3, %v6814_v12  ;;  %v6820_v3 = vmax.f32 %v6055_v11, %v6347_v29 }
 0x23d   :  { %v6562_v35 = vmax.f32 %v6808_v27, %v2338_v21  ;;  %v2341_v1 = vadd.f32 %v4455_v8, %v4343_v52 }
 0x23e   :  { %v4344_v42 = vpop.f32.mrb[164].mxu0 }
 0x23f   :  { %v6567_v18 = vmax.f32 %v6811_v22, %v2341_v1  ;;  %v4456_v51 = vpop.f32.mrb[164].mxu1  ;;  %v4345_v28 = vpop.f32.mrb[165].mxu0 }
 0x240   :  { %v4346_v4 = vadd.f32 %v4345_v28, %v4344_v42  ;;  %v4457_v38 = vpop.f32.mrb[165].mxu1  ;;  %v4347_v5 = vpop.f32.mrb[166].mxu0  ;;  %v6817_v28 = vld [vmem:[#allocation5_spill] sm:$0xff] }
 0x241   :  { %v4458_v61 = vadd.f32 %v4457_v38, %v4456_v51  ;;  %v4459_v59 = vpop.f32.mrb[166].mxu1  ;;  %v4348_v6 = vpop.f32.mrb[167].mxu0 }
 0x242   :  { %v4349_v0 = vadd.f32 %v4348_v6, %v4347_v5  ;;  %v4460_v17 = vpop.f32.mrb[167].mxu1 }
 0x243   :  { %v2346_v60 = vadd.f32 %v4458_v61, %v4346_v4  ;;  %v4461_v40 = vadd.f32 %v4460_v17, %v4459_v59  ;;  %v6818_v4 = vld [vmem:[#allocation13_spill] sm:$0xff] }
 0x244   :  { %v6819_v38 = vmax.f32 %v6817_v28, %v6818_v4  ;;  %v6824_v28 = vmax.f32 %v6071_v45, %v6367_v56 }
 0x245   :  { %v6572_v63 = vmax.f32 %v6812_v20, %v2346_v60  ;;  %v2349_v10 = vadd.f32 %v4461_v40, %v4349_v0 }
 0x246   :  { %v4350_v50 = vpop.f32.mrb[168].mxu0 }
 0x247   :  { %v6577_v57 = vmax.f32 %v6815_v9, %v2349_v10  ;;  %v4462_v30 = vpop.f32.mrb[168].mxu1  ;;  %v4351_v26 = vpop.f32.mrb[169].mxu0 }
 0x248   :  { %v4352_v24 = vadd.f32 %v4351_v26, %v4350_v50  ;;  %v4463_v52 = vpop.f32.mrb[169].mxu1  ;;  %v4353_v62 = vpop.f32.mrb[170].mxu0  ;;  %v6821_v26 = vld [vmem:[#allocation6_spill] sm:$0xff] }
 0x249   :  { %v4464_v21 = vadd.f32 %v4463_v52, %v4462_v30  ;;  %v4465_v8 = vpop.f32.mrb[170].mxu1  ;;  %v4354_v27 = vpop.f32.mrb[171].mxu0 }
 0x24a   :  { %v4355_v1 = vadd.f32 %v4354_v27, %v4353_v62  ;;  %v4466_v42 = vpop.f32.mrb[171].mxu1 }
 0x24b   :  { %v2354_v23 = vadd.f32 %v4464_v21, %v4352_v24  ;;  %v4467_v25 = vadd.f32 %v4466_v42, %v4465_v8  ;;  %v6822_v24 = vld [vmem:[#allocation14_spill] sm:$0xff] }
 0x24c   :  { %v6823_v52 = vmax.f32 %v6821_v26, %v6822_v24  ;;  %v6828_v26 = vmax.f32 %v6087_v2, %v6387_v14 }
 0x24d   :  { %v6582_v37 = vmax.f32 %v6816_v7, %v2354_v23  ;;  %v2357_v22 = vadd.f32 %v4467_v25, %v4355_v1 }
 0x24e   :  { %v4356_v51 = vpop.f32.mrb[172].mxu0 }
 0x24f   :  { %v6587_v5 = vmax.f32 %v6819_v38, %v2357_v22  ;;  %v4468_v61 = vpop.f32.mrb[172].mxu1  ;;  %v4357_v59 = vpop.f32.mrb[173].mxu0 }
 0x250   :  { %v4358_v6 = vadd.f32 %v4357_v59, %v4356_v51  ;;  %v4469_v0 = vpop.f32.mrb[173].mxu1  ;;  %v4359_v17 = vpop.f32.mrb[174].mxu0  ;;  %v6825_v59 = vld [vmem:[#allocation7_spill] sm:$0xff] }
 0x251   :  { %v4470_v60 = vadd.f32 %v4469_v0, %v4468_v61  ;;  %v4471_v40 = vpop.f32.mrb[174].mxu1  ;;  %v4360_v20 = vpop.f32.mrb[175].mxu0 }
 0x252   :  { %v4361_v10 = vadd.f32 %v4360_v20, %v4359_v17  ;;  %v4472_v50 = vpop.f32.mrb[175].mxu1 }
 0x253   :  { %v2362_v53 = vadd.f32 %v4470_v60, %v4358_v6  ;;  %v4473_v33 = vadd.f32 %v4472_v50, %v4471_v40  ;;  %v6826_v6 = vld [vmem:[#allocation15_spill] sm:$0xff] }
 0x254   :  { %v6827_v0 = vmax.f32 %v6825_v59, %v6826_v6  ;;  %v6832_v59 = vmax.f32 %v6103_v41, %v6407_v47  ;;  %v6835_v41 = vld [vmem:[#allocation9_spill] sm:$0xff]  ;;  %v6836_v47 = vld [vmem:[#allocation18_spill] sm:$0xff] }
 0x255   :  { %v6592_v12 = vmax.f32 %v6820_v3, %v2362_v53  ;;  %v2365_v9 = vadd.f32 %v4473_v33, %v4361_v10 }
 0x256   :  { %v4362_v30 = vpop.f32.mrb[176].mxu0 }
 0x257   :  { %v6597_v62 = vmax.f32 %v6823_v52, %v2365_v9  ;;  %v4474_v21 = vpop.f32.mrb[176].mxu1  ;;  %v4363_v8 = vpop.f32.mrb[177].mxu0 }
 0x258   :  { %v4364_v27 = vadd.f32 %v4363_v8, %v4362_v30  ;;  %v4475_v1 = vpop.f32.mrb[177].mxu1  ;;  %v4365_v42 = vpop.f32.mrb[178].mxu0  ;;  %v6829_v8 = vld [vmem:[#allocation8_spill] sm:$0xff] }
 0x259   :  { %v4476_v23 = vadd.f32 %v4475_v1, %v4474_v21  ;;  %v4477_v25 = vpop.f32.mrb[178].mxu1  ;;  %v4366_v7 = vpop.f32.mrb[179].mxu0 }
 0x25a   :  { %v4367_v22 = vadd.f32 %v4366_v7, %v4365_v42  ;;  %v4478_v51 = vpop.f32.mrb[179].mxu1 }
 0x25b   :  { %v2370_v11 = vadd.f32 %v4476_v23, %v4364_v27  ;;  %v4479_v29 = vadd.f32 %v4478_v51, %v4477_v25  ;;  %v6830_v27 = vld [vmem:[#allocation16_spill] sm:$0xff] }
 0x25c   :  { %v6831_v1 = vmax.f32 %v6829_v8, %v6830_v27 }
 0x25d   :  { %v6602_v4 = vmax.f32 %v6824_v28, %v2370_v11  ;;  %v2373_v38 = vadd.f32 %v4479_v29, %v4367_v22 }
 0x25e   :  { %v4368_v61 = vpop.f32.mrb[180].mxu0 }
 0x25f   :  { %v6607_v17 = vmax.f32 %v6827_v0, %v2373_v38  ;;  %v4480_v60 = vpop.f32.mrb[180].mxu1  ;;  %v4369_v40 = vpop.f32.mrb[181].mxu0 }
 0x260   :  { %v4370_v20 = vadd.f32 %v4369_v40, %v4368_v61  ;;  %v4481_v10 = vpop.f32.mrb[181].mxu1  ;;  %v4371_v50 = vpop.f32.mrb[182].mxu0  ;;  %v6833_v40 = vld [vmem:[#allocation17_spill] sm:$0xff] }
 0x261   :  { %v4482_v53 = vadd.f32 %v4481_v10, %v4480_v60  ;;  %v4483_v33 = vpop.f32.mrb[182].mxu1  ;;  %v4372_v3 = vpop.f32.mrb[183].mxu0 }
 0x262   :  { %v4373_v9 = vadd.f32 %v4372_v3, %v4371_v50  ;;  %v4484_v30 = vpop.f32.mrb[183].mxu1 }
 0x263   :  { %v2378_v45 = vadd.f32 %v4482_v53, %v4370_v20  ;;  %v4485_v56 = vadd.f32 %v4484_v30, %v4483_v33  ;;  %v6834_v20 = vmax.f32 %v6105_v43, %v6833_v40 }
 0x265   :  { %v6612_v24 = vmax.f32 %v6828_v26, %v2378_v45  ;;  %v2381_v52 = vadd.f32 %v4485_v56, %v4373_v9 }
 0x266   :  { %v4374_v21 = vpop.f32.mrb[184].mxu0 }
 0x267   :  { %v6617_v42 = vmax.f32 %v6831_v1, %v2381_v52  ;;  %v4486_v23 = vpop.f32.mrb[184].mxu1  ;;  %v4375_v25 = vpop.f32.mrb[185].mxu0 }
 0x268   :  { %v4376_v7 = vadd.f32 %v4375_v25, %v4374_v21  ;;  %v4487_v22 = vpop.f32.mrb[185].mxu1  ;;  %v4377_v51 = vpop.f32.mrb[186].mxu0  ;;  %v6837_v21 = vmax.f32 %v6835_v41, %v6836_v47 }
 0x269   :  { %v4488_v11 = vadd.f32 %v4487_v22, %v4486_v23  ;;  %v4489_v29 = vpop.f32.mrb[186].mxu1  ;;  %v4378_v28 = vpop.f32.mrb[187].mxu0 }
 0x26a   :  { %v4379_v38 = vadd.f32 %v4378_v28, %v4377_v51  ;;  %v4490_v61 = vpop.f32.mrb[187].mxu1 }
 0x26b   :  { %v2386_v2 = vadd.f32 %v4488_v11, %v4376_v7  ;;  %v4491_v14 = vadd.f32 %v4490_v61, %v4489_v29 }
 0x26d   :  { %v6622_v6 = vmax.f32 %v6832_v59, %v2386_v2  ;;  %v2389_v0 = vadd.f32 %v4491_v14, %v4379_v38  ;;  %v6637_v2 = vld [vmem:[%s6754_s5] ss:$0 sm:$0xff] }
 0x26e   :  { %v4380_v60 = vpop.f32.mrb[188].mxu0 }
 0x26f   :  { %v6627_v10 = vmax.f32 %v6834_v20, %v2389_v0  ;;  %v4492_v50 = vpop.f32.mrb[188].mxu1  ;;  %v4381_v53 = vpop.f32.mrb[189].mxu0 }
 0x270   :  { %v4382_v33 = vadd.f32 %v4381_v53, %v4380_v60  ;;  %v4493_v3 = vpop.f32.mrb[189].mxu1  ;;  %v4383_v9 = vpop.f32.mrb[190].mxu0 }
 0x271   :  { %v4494_v30 = vadd.f32 %v4493_v3, %v4492_v50  ;;  %v4495_v45 = vpop.f32.mrb[190].mxu1  ;;  %v4384_v56 = vpop.f32.mrb[191].mxu0 }
 0x272   :  { %v4496_v26 = vpop.f32.mrb[191].mxu1 }
 0x273   :  { %v2394_v52 = vadd.f32 %v4494_v30, %v4382_v33 }
 0x275   :  { %v6632_v8 = vmax.f32 %v6837_v21, %v2394_v52 }
 0x276   :  { %v4514_v27 = vpop.f32.mrb[192].mxu0 }
 0x277   :  { %v4626_v1 = vpop.f32.mrb[192].mxu1  ;;  %v4515_v43 = vpop.f32.mrb[193].mxu0 }
 0x278   :  { %v4516_v23 = vadd.f32 %v4515_v43, %v4514_v27  ;;  %v4627_v25 = vpop.f32.mrb[193].mxu1  ;;  %v4517_v7 = vpop.f32.mrb[194].mxu0 }
 0x279   :  { %v4628_v22 = vadd.f32 %v4627_v25, %v4626_v1  ;;  %v4629_v51 = vpop.f32.mrb[194].mxu1  ;;  %v4518_v11 = vpop.f32.mrb[195].mxu0 }
 0x27a   :  { %v4519_v29 = vadd.f32 %v4518_v11, %v4517_v7  ;;  %v4630_v28 = vpop.f32.mrb[195].mxu1 }
 0x27b   :  { %v3001_v38 = vadd.f32 %v4628_v22, %v4516_v23  ;;  %v4631_v61 = vadd.f32 %v4630_v28, %v4629_v51 }
 0x27d   :  { %v3126_v14 = vmax.f32 %v6446_v13, %v3001_v38  ;;  %v3004_v59 = vadd.f32 %v4631_v61, %v4519_v29 }
 0x27e   :  { %v4520_v0 = vpop.f32.mrb[196].mxu0 }
 0x27f   :  { %v3164_v60 = vadd.f32 %v6637_v2, %v3126_v14  ;;  %v3127_v40 = vmax.f32 %v6451_v48, %v3004_v59  ;;  %v4632_v20 = vpop.f32.mrb[196].mxu1  ;;  %v4521_v50 = vpop.f32.mrb[197].mxu0 }
 0x280   :  { %v4522_v53 = vadd.f32 %v4521_v50, %v4520_v0  ;;  %v4633_v33 = vpop.f32.mrb[197].mxu1  ;;  %v4523_v3 = vpop.f32.mrb[198].mxu0 }
 0x281   :  { %v3165_v9 = vadd.f32 %v6637_v2, %v3127_v40  ;;  %v4634_v30 = vadd.f32 %v4633_v33, %v4632_v20  ;;  %v4635_v45 = vpop.f32.mrb[198].mxu1  ;;  %v4524_v56 = vpop.f32.mrb[199].mxu0  ;;  %v3195_v41 = vmax.f32 %v3164_v60, 0.0 }
 0x282   :  { %v4525_v26 = vadd.f32 %v4524_v56, %v4523_v3  ;;  %v4636_v52 = vpop.f32.mrb[199].mxu1 }
 0x283   :  { %v3196_v13 = vmax.f32 %v3165_v9, 0.0  ;;  %v3009_v47 = vadd.f32 %v4634_v30, %v4522_v53  ;;  %v4637_v21 = vadd.f32 %v4636_v52, %v4635_v45 }
 0x285   :  { %v3740_v27 = vpack.c.bf16 %v3196_v13, %v3195_v41  ;;  %v3128_v1 = vmax.f32 %v6468_v49, %v3009_v47  ;;  %v3012_v48 = vadd.f32 %v4637_v21, %v4525_v26 }
 0x286   :  { %v4526_v43 = vpop.f32.mrb[200].mxu0 }
 0x287   :  { %3741 = vst [vmem:[%s6755_s6] sm:$0xff] %v3740_v27   ;;  %v3166_v23 = vadd.f32 %v6637_v2, %v3128_v1  ;;  %v3129_v25 = vmax.f32 %v6473_v39, %v3012_v48  ;;  %v4638_v7 = vpop.f32.mrb[200].mxu1  ;;  %v4527_v22 = vpop.f32.mrb[201].mxu0 }
 0x288   :  { %v4528_v51 = vadd.f32 %v4527_v22, %v4526_v43  ;;  %v4639_v11 = vpop.f32.mrb[201].mxu1  ;;  %v4529_v29 = vpop.f32.mrb[202].mxu0 }
 0x289   :  { %v3167_v28 = vadd.f32 %v6637_v2, %v3129_v25  ;;  %v4640_v38 = vadd.f32 %v4639_v11, %v4638_v7  ;;  %v4641_v61 = vpop.f32.mrb[202].mxu1  ;;  %v4530_v49 = vpop.f32.mrb[203].mxu0  ;;  %v3197_v0 = vmax.f32 %v3166_v23, 0.0 }
 0x28a   :  { %v4531_v14 = vadd.f32 %v4530_v49, %v4529_v29  ;;  %v4642_v59 = vpop.f32.mrb[203].mxu1 }
 0x28b   :  { %v3198_v60 = vmax.f32 %v3167_v28, 0.0  ;;  %v3017_v40 = vadd.f32 %v4640_v38, %v4528_v51  ;;  %v4643_v20 = vadd.f32 %v4642_v59, %v4641_v61 }
 0x28d   :  { %v3745_v50 = vpack.c.bf16 %v3198_v60, %v3197_v0  ;;  %v3130_v53 = vmax.f32 %v6490_v15, %v3017_v40  ;;  %v3020_v39 = vadd.f32 %v4643_v20, %v4531_v14 }
 0x28e   :  { %v4532_v33 = vpop.f32.mrb[204].mxu0 }
 0x28f   :  { %3812 = vst [vmem:[%s6755_s6 + $0x8] sm:$0xff] %v3745_v50   ;;  %v3168_v3 = vadd.f32 %v6637_v2, %v3130_v53  ;;  %v3131_v9 = vmax.f32 %v6501_v46, %v3020_v39  ;;  %v4644_v30 = vpop.f32.mrb[204].mxu1  ;;  %v4533_v45 = vpop.f32.mrb[205].mxu0 }
 0x290   :  { %v4534_v56 = vadd.f32 %v4533_v45, %v4532_v33  ;;  %v4645_v26 = vpop.f32.mrb[205].mxu1  ;;  %v4535_v52 = vpop.f32.mrb[206].mxu0 }
 0x291   :  { %v3169_v41 = vadd.f32 %v6637_v2, %v3131_v9  ;;  %v4646_v13 = vadd.f32 %v4645_v26, %v4644_v30  ;;  %v4647_v47 = vpop.f32.mrb[206].mxu1  ;;  %v4536_v15 = vpop.f32.mrb[207].mxu0  ;;  %v3199_v1 = vmax.f32 %v3168_v3, 0.0 }
 0x292   :  { %v4537_v21 = vadd.f32 %v4536_v15, %v4535_v52  ;;  %v4648_v27 = vpop.f32.mrb[207].mxu1 }
 0x293   :  { %v3200_v48 = vmax.f32 %v3169_v41, 0.0  ;;  %v3025_v43 = vadd.f32 %v4646_v13, %v4534_v56  ;;  %v4649_v23 = vadd.f32 %v4648_v27, %v4647_v47 }
 0x295   :  { %v3750_v25 = vpack.c.bf16 %v3200_v48, %v3199_v1  ;;  %v3132_v7 = vmax.f32 %v6512_v44, %v3025_v43  ;;  %v3028_v46 = vadd.f32 %v4649_v23, %v4537_v21 }
 0x296   :  { %v4538_v22 = vpop.f32.mrb[208].mxu0 }
 0x297   :  { %3813 = vst [vmem:[%s6755_s6 + $0x10] sm:$0xff] %v3750_v25   ;;  %v3170_v51 = vadd.f32 %v6637_v2, %v3132_v7  ;;  %v3133_v11 = vmax.f32 %v6517_v19, %v3028_v46  ;;  %v4650_v29 = vpop.f32.mrb[208].mxu1  ;;  %v4539_v28 = vpop.f32.mrb[209].mxu0 }
 0x298   :  { %v4540_v38 = vadd.f32 %v4539_v28, %v4538_v22  ;;  %v4651_v61 = vpop.f32.mrb[209].mxu1  ;;  %v4541_v49 = vpop.f32.mrb[210].mxu0 }
 0x299   :  { %v3171_v14 = vadd.f32 %v6637_v2, %v3133_v11  ;;  %v4652_v59 = vadd.f32 %v4651_v61, %v4650_v29  ;;  %v4653_v0 = vpop.f32.mrb[210].mxu1  ;;  %v4542_v44 = vpop.f32.mrb[211].mxu0  ;;  %v3201_v20 = vmax.f32 %v3170_v51, 0.0 }
 0x29a   :  { %v4543_v60 = vadd.f32 %v4542_v44, %v4541_v49  ;;  %v4654_v40 = vpop.f32.mrb[211].mxu1 }
 0x29b   :  { %v3202_v50 = vmax.f32 %v3171_v14, 0.0  ;;  %v3033_v53 = vadd.f32 %v4652_v59, %v4540_v38  ;;  %v4655_v39 = vadd.f32 %v4654_v40, %v4653_v0 }
 0x29d   :  { %v3755_v33 = vpack.c.bf16 %v3202_v50, %v3201_v20  ;;  %v3134_v3 = vmax.f32 %v6522_v58, %v3033_v53  ;;  %v3036_v19 = vadd.f32 %v4655_v39, %v4543_v60 }
 0x29e   :  { %v4544_v9 = vpop.f32.mrb[212].mxu0 }
 0x29f   :  { %3814 = vst [vmem:[%s6755_s6 + $0x18] sm:$0xff] %v3755_v33   ;;  %v3172_v30 = vadd.f32 %v6637_v2, %v3134_v3  ;;  %v3135_v45 = vmax.f32 %v6527_v16, %v3036_v19  ;;  %v4656_v56 = vpop.f32.mrb[212].mxu1  ;;  %v4545_v26 = vpop.f32.mrb[213].mxu0 }
 0x2a0   :  { %v4546_v52 = vadd.f32 %v4545_v26, %v4544_v9  ;;  %v4657_v41 = vpop.f32.mrb[213].mxu1  ;;  %v4547_v13 = vpop.f32.mrb[214].mxu0 }
 0x2a1   :  { %v3173_v47 = vadd.f32 %v6637_v2, %v3135_v45  ;;  %v4658_v15 = vadd.f32 %v4657_v41, %v4656_v56  ;;  %v4659_v21 = vpop.f32.mrb[214].mxu1  ;;  %v4548_v58 = vpop.f32.mrb[215].mxu0  ;;  %v3203_v48 = vmax.f32 %v3172_v30, 0.0 }
 0x2a2   :  { %v4549_v27 = vadd.f32 %v4548_v58, %v4547_v13  ;;  %v4660_v1 = vpop.f32.mrb[215].mxu1 }
 0x2a3   :  { %v3204_v43 = vmax.f32 %v3173_v47, 0.0  ;;  %v3041_v23 = vadd.f32 %v4658_v15, %v4546_v52  ;;  %v4661_v25 = vadd.f32 %v4660_v1, %v4659_v21 }
 0x2a5   :  { %v3760_v7 = vpack.c.bf16 %v3204_v43, %v3203_v48  ;;  %v3136_v46 = vmax.f32 %v6532_v54, %v3041_v23  ;;  %v3044_v16 = vadd.f32 %v4661_v25, %v4549_v27 }
 0x2a6   :  { %v4550_v22 = vpop.f32.mrb[216].mxu0 }
 0x2a7   :  { %3815 = vst [vmem:[%s6755_s6 + $0x20] sm:$0xff] %v3760_v7   ;;  %v3174_v51 = vadd.f32 %v6637_v2, %v3136_v46  ;;  %v3137_v11 = vmax.f32 %v6537_v32, %v3044_v16  ;;  %v4662_v29 = vpop.f32.mrb[216].mxu1  ;;  %v4551_v28 = vpop.f32.mrb[217].mxu0 }
 0x2a8   :  { %v4552_v38 = vadd.f32 %v4551_v28, %v4550_v22  ;;  %v4663_v61 = vpop.f32.mrb[217].mxu1  ;;  %v4553_v49 = vpop.f32.mrb[218].mxu0 }
 0x2a9   :  { %v3175_v14 = vadd.f32 %v6637_v2, %v3137_v11  ;;  %v4664_v59 = vadd.f32 %v4663_v61, %v4662_v29  ;;  %v4665_v0 = vpop.f32.mrb[218].mxu1  ;;  %v4554_v54 = vpop.f32.mrb[219].mxu0  ;;  %v3205_v40 = vmax.f32 %v3174_v51, 0.0 }
 0x2aa   :  { %v4555_v44 = vadd.f32 %v4554_v54, %v4553_v49  ;;  %v4666_v60 = vpop.f32.mrb[219].mxu1 }
 0x2ab   :  { %v3206_v20 = vmax.f32 %v3175_v14, 0.0  ;;  %v3049_v50 = vadd.f32 %v4664_v59, %v4552_v38  ;;  %v4667_v53 = vadd.f32 %v4666_v60, %v4665_v0 }
 0x2ad   :  { %v3765_v39 = vpack.c.bf16 %v3206_v20, %v3205_v40  ;;  %v3138_v33 = vmax.f32 %v6542_v31, %v3049_v50  ;;  %v3052_v32 = vadd.f32 %v4667_v53, %v4555_v44 }
 0x2ae   :  { %v4556_v3 = vpop.f32.mrb[220].mxu0 }
 0x2af   :  { %3816 = vst [vmem:[%s6755_s6 + $0x28] sm:$0xff] %v3765_v39   ;;  %v3176_v19 = vadd.f32 %v6637_v2, %v3138_v33  ;;  %v3139_v9 = vmax.f32 %v6547_v36, %v3052_v32  ;;  %v4668_v30 = vpop.f32.mrb[220].mxu1  ;;  %v4557_v45 = vpop.f32.mrb[221].mxu0 }
 0x2b0   :  { %v4558_v56 = vadd.f32 %v4557_v45, %v4556_v3  ;;  %v4669_v26 = vpop.f32.mrb[221].mxu1  ;;  %v4559_v52 = vpop.f32.mrb[222].mxu0 }
 0x2b1   :  { %v3177_v41 = vadd.f32 %v6637_v2, %v3139_v9  ;;  %v4670_v13 = vadd.f32 %v4669_v26, %v4668_v30  ;;  %v4671_v47 = vpop.f32.mrb[222].mxu1  ;;  %v4560_v31 = vpop.f32.mrb[223].mxu0  ;;  %v3207_v58 = vmax.f32 %v3176_v19, 0.0 }
 0x2b2   :  { %v4561_v15 = vadd.f32 %v4560_v31, %v4559_v52  ;;  %v4672_v21 = vpop.f32.mrb[223].mxu1 }
 0x2b3   :  { %v3208_v27 = vmax.f32 %v3177_v41, 0.0  ;;  %v3057_v1 = vadd.f32 %v4670_v13, %v4558_v56  ;;  %v4673_v48 = vadd.f32 %v4672_v21, %v4671_v47 }
 0x2b5   :  { %v3770_v43 = vpack.c.bf16 %v3208_v27, %v3207_v58  ;;  %v3140_v23 = vmax.f32 %v6552_v34, %v3057_v1  ;;  %v3060_v36 = vadd.f32 %v4673_v48, %v4561_v15 }
 0x2b6   :  { %v4562_v25 = vpop.f32.mrb[224].mxu0 }
 0x2b7   :  { %3817 = vst [vmem:[%s6755_s6 + $0x30] sm:$0xff] %v3770_v43   ;;  %v3178_v7 = vadd.f32 %v6637_v2, %v3140_v23  ;;  %v3141_v46 = vmax.f32 %v6557_v55, %v3060_v36  ;;  %v4674_v16 = vpop.f32.mrb[224].mxu1  ;;  %v4563_v22 = vpop.f32.mrb[225].mxu0 }
 0x2b8   :  { %v4564_v51 = vadd.f32 %v4563_v22, %v4562_v25  ;;  %v4675_v11 = vpop.f32.mrb[225].mxu1  ;;  %v4565_v29 = vpop.f32.mrb[226].mxu0 }
 0x2b9   :  { %v3179_v28 = vadd.f32 %v6637_v2, %v3141_v46  ;;  %v4676_v38 = vadd.f32 %v4675_v11, %v4674_v16  ;;  %v4677_v61 = vpop.f32.mrb[226].mxu1  ;;  %v4566_v34 = vpop.f32.mrb[227].mxu0  ;;  %v3209_v59 = vmax.f32 %v3178_v7, 0.0 }
 0x2ba   :  { %v4567_v49 = vadd.f32 %v4566_v34, %v4565_v29  ;;  %v4678_v14 = vpop.f32.mrb[227].mxu1 }
 0x2bb   :  { %v3210_v0 = vmax.f32 %v3179_v28, 0.0  ;;  %v3065_v54 = vadd.f32 %v4676_v38, %v4564_v51  ;;  %v4679_v44 = vadd.f32 %v4678_v14, %v4677_v61 }
 0x2bd   :  { %v3775_v60 = vpack.c.bf16 %v3210_v0, %v3209_v59  ;;  %v3142_v40 = vmax.f32 %v6562_v35, %v3065_v54  ;;  %v3068_v55 = vadd.f32 %v4679_v44, %v4567_v49 }
 0x2be   :  { %v4568_v20 = vpop.f32.mrb[228].mxu0 }
 0x2bf   :  { %3818 = vst [vmem:[%s6755_s6 + $0x38] sm:$0xff] %v3775_v60   ;;  %v3180_v50 = vadd.f32 %v6637_v2, %v3142_v40  ;;  %v3143_v53 = vmax.f32 %v6567_v18, %v3068_v55  ;;  %v4680_v39 = vpop.f32.mrb[228].mxu1  ;;  %v4569_v33 = vpop.f32.mrb[229].mxu0 }
 0x2c0   :  { %v4570_v32 = vadd.f32 %v4569_v33, %v4568_v20  ;;  %v4681_v3 = vpop.f32.mrb[229].mxu1  ;;  %v4571_v19 = vpop.f32.mrb[230].mxu0 }
 0x2c1   :  { %v3181_v9 = vadd.f32 %v6637_v2, %v3143_v53  ;;  %v4682_v30 = vadd.f32 %v4681_v3, %v4680_v39  ;;  %v4683_v45 = vpop.f32.mrb[230].mxu1  ;;  %v4572_v35 = vpop.f32.mrb[231].mxu0  ;;  %v3211_v52 = vmax.f32 %v3180_v50, 0.0 }
 0x2c2   :  { %v4573_v56 = vadd.f32 %v4572_v35, %v4571_v19  ;;  %v4684_v26 = vpop.f32.mrb[231].mxu1 }
 0x2c3   :  { %v3212_v41 = vmax.f32 %v3181_v9, 0.0  ;;  %v3073_v13 = vadd.f32 %v4682_v30, %v4570_v32  ;;  %v4685_v47 = vadd.f32 %v4684_v26, %v4683_v45 }
 0x2c5   :  { %v3780_v31 = vpack.c.bf16 %v3212_v41, %v3211_v52  ;;  %v3144_v15 = vmax.f32 %v6572_v63, %v3073_v13  ;;  %v3076_v18 = vadd.f32 %v4685_v47, %v4573_v56 }
 0x2c6   :  { %v4574_v21 = vpop.f32.mrb[232].mxu0 }
 0x2c7   :  { %3819 = vst [vmem:[%s6755_s6 + $0x40] sm:$0xff] %v3780_v31   ;;  %v3182_v58 = vadd.f32 %v6637_v2, %v3144_v15  ;;  %v3145_v27 = vmax.f32 %v6577_v57, %v3076_v18  ;;  %v4686_v1 = vpop.f32.mrb[232].mxu1  ;;  %v4575_v48 = vpop.f32.mrb[233].mxu0 }
 0x2c8   :  { %v4576_v43 = vadd.f32 %v4575_v48, %v4574_v21  ;;  %v4687_v23 = vpop.f32.mrb[233].mxu1  ;;  %v4577_v36 = vpop.f32.mrb[234].mxu0 }
 0x2c9   :  { %v3183_v25 = vadd.f32 %v6637_v2, %v3145_v27  ;;  %v4688_v7 = vadd.f32 %v4687_v23, %v4686_v1  ;;  %v4689_v46 = vpop.f32.mrb[234].mxu1  ;;  %v4578_v63 = vpop.f32.mrb[235].mxu0  ;;  %v3213_v51 = vmax.f32 %v3182_v58, 0.0 }
 0x2ca   :  { %v4579_v16 = vadd.f32 %v4578_v63, %v4577_v36  ;;  %v4690_v22 = vpop.f32.mrb[235].mxu1 }
 0x2cb   :  { %v3214_v11 = vmax.f32 %v3183_v25, 0.0  ;;  %v3081_v29 = vadd.f32 %v4688_v7, %v4576_v43  ;;  %v4691_v28 = vadd.f32 %v4690_v22, %v4689_v46 }
 0x2cd   :  { %v3785_v38 = vpack.c.bf16 %v3214_v11, %v3213_v51  ;;  %v3146_v61 = vmax.f32 %v6582_v37, %v3081_v29  ;;  %v3084_v57 = vadd.f32 %v4691_v28, %v4579_v16 }
 0x2ce   :  { %v4580_v34 = vpop.f32.mrb[236].mxu0 }
 0x2cf   :  { %3820 = vst [vmem:[%s6755_s6 + $0x48] sm:$0xff] %v3785_v38   ;;  %v3184_v49 = vadd.f32 %v6637_v2, %v3146_v61  ;;  %v3147_v14 = vmax.f32 %v6587_v5, %v3084_v57  ;;  %v4692_v59 = vpop.f32.mrb[236].mxu1  ;;  %v4581_v0 = vpop.f32.mrb[237].mxu0 }
 0x2d0   :  { %v4582_v54 = vadd.f32 %v4581_v0, %v4580_v34  ;;  %v4693_v44 = vpop.f32.mrb[237].mxu1  ;;  %v4583_v60 = vpop.f32.mrb[238].mxu0 }
 0x2d1   :  { %v3185_v40 = vadd.f32 %v6637_v2, %v3147_v14  ;;  %v4694_v55 = vadd.f32 %v4693_v44, %v4692_v59  ;;  %v4695_v20 = vpop.f32.mrb[238].mxu1  ;;  %v4584_v37 = vpop.f32.mrb[239].mxu0  ;;  %v3215_v39 = vmax.f32 %v3184_v49, 0.0 }
 0x2d2   :  { %v4585_v50 = vadd.f32 %v4584_v37, %v4583_v60  ;;  %v4696_v53 = vpop.f32.mrb[239].mxu1 }
 0x2d3   :  { %v3216_v33 = vmax.f32 %v3185_v40, 0.0  ;;  %v3089_v32 = vadd.f32 %v4694_v55, %v4582_v54  ;;  %v4697_v3 = vadd.f32 %v4696_v53, %v4695_v20 }
 0x2d5   :  { %v3790_v19 = vpack.c.bf16 %v3216_v33, %v3215_v39  ;;  %v3148_v9 = vmax.f32 %v6592_v12, %v3089_v32  ;;  %v3092_v5 = vadd.f32 %v4697_v3, %v4585_v50 }
 0x2d6   :  { %v4586_v30 = vpop.f32.mrb[240].mxu0 }
 0x2d7   :  { %3821 = vst [vmem:[%s6755_s6 + $0x50] sm:$0xff] %v3790_v19   ;;  %v3186_v45 = vadd.f32 %v6637_v2, %v3148_v9  ;;  %v3149_v35 = vmax.f32 %v6597_v62, %v3092_v5  ;;  %v4698_v56 = vpop.f32.mrb[240].mxu1  ;;  %v4587_v26 = vpop.f32.mrb[241].mxu0 }
 0x2d8   :  { %v4588_v52 = vadd.f32 %v4587_v26, %v4586_v30  ;;  %v4699_v41 = vpop.f32.mrb[241].mxu1  ;;  %v4589_v13 = vpop.f32.mrb[242].mxu0 }
 0x2d9   :  { %v3187_v47 = vadd.f32 %v6637_v2, %v3149_v35  ;;  %v4700_v31 = vadd.f32 %v4699_v41, %v4698_v56  ;;  %v4701_v15 = vpop.f32.mrb[242].mxu1  ;;  %v4590_v12 = vpop.f32.mrb[243].mxu0  ;;  %v3217_v58 = vmax.f32 %v3186_v45, 0.0 }
 0x2da   :  { %v4591_v18 = vadd.f32 %v4590_v12, %v4589_v13  ;;  %v4702_v21 = vpop.f32.mrb[243].mxu1 }
 0x2db   :  { %v3218_v27 = vmax.f32 %v3187_v47, 0.0  ;;  %v3097_v1 = vadd.f32 %v4700_v31, %v4588_v52  ;;  %v4703_v48 = vadd.f32 %v4702_v21, %v4701_v15 }
 0x2dd   :  { %v3795_v43 = vpack.c.bf16 %v3218_v27, %v3217_v58  ;;  %v3150_v23 = vmax.f32 %v6602_v4, %v3097_v1  ;;  %v3100_v62 = vadd.f32 %v4703_v48, %v4591_v18 }
 0x2de   :  { %v4592_v36 = vpop.f32.mrb[244].mxu0 }
 0x2df   :  { %3822 = vst [vmem:[%s6755_s6 + $0x58] sm:$0xff] %v3795_v43   ;;  %v3188_v25 = vadd.f32 %v6637_v2, %v3150_v23  ;;  %v3151_v7 = vmax.f32 %v6607_v17, %v3100_v62  ;;  %v4704_v46 = vpop.f32.mrb[244].mxu1  ;;  %v4593_v63 = vpop.f32.mrb[245].mxu0 }
 0x2e0   :  { %v4594_v16 = vadd.f32 %v4593_v63, %v4592_v36  ;;  %v4705_v22 = vpop.f32.mrb[245].mxu1  ;;  %v4595_v51 = vpop.f32.mrb[246].mxu0 }
 0x2e1   :  { %v3189_v11 = vadd.f32 %v6637_v2, %v3151_v7  ;;  %v4706_v29 = vadd.f32 %v4705_v22, %v4704_v46  ;;  %v4707_v28 = vpop.f32.mrb[246].mxu1  ;;  %v4596_v4 = vpop.f32.mrb[247].mxu0  ;;  %v3219_v57 = vmax.f32 %v3188_v25, 0.0 }
 0x2e2   :  { %v4597_v38 = vadd.f32 %v4596_v4, %v4595_v51  ;;  %v4708_v61 = vpop.f32.mrb[247].mxu1 }
 0x2e3   :  { %v3220_v34 = vmax.f32 %v3189_v11, 0.0  ;;  %v3105_v49 = vadd.f32 %v4706_v29, %v4594_v16  ;;  %v4709_v14 = vadd.f32 %v4708_v61, %v4707_v28 }
 0x2e5   :  { %v3800_v59 = vpack.c.bf16 %v3220_v34, %v3219_v57  ;;  %v3152_v0 = vmax.f32 %v6612_v24, %v3105_v49  ;;  %v3108_v17 = vadd.f32 %v4709_v14, %v4597_v38 }
 0x2e6   :  { %v4598_v54 = vpop.f32.mrb[248].mxu0 }
 0x2e7   :  { %3823 = vst [vmem:[%s6755_s6 + $0x60] sm:$0xff] %v3800_v59   ;;  %v3190_v44 = vadd.f32 %v6637_v2, %v3152_v0  ;;  %v3153_v60 = vmax.f32 %v6617_v42, %v3108_v17  ;;  %v4710_v40 = vpop.f32.mrb[248].mxu1  ;;  %v4599_v55 = vpop.f32.mrb[249].mxu0 }
 0x2e8   :  { %v4600_v20 = vadd.f32 %v4599_v55, %v4598_v54  ;;  %v4711_v37 = vpop.f32.mrb[249].mxu1  ;;  %v4601_v50 = vpop.f32.mrb[250].mxu0 }
 0x2e9   :  { %v3191_v53 = vadd.f32 %v6637_v2, %v3153_v60  ;;  %v4712_v39 = vadd.f32 %v4711_v37, %v4710_v40  ;;  %v4713_v33 = vpop.f32.mrb[250].mxu1  ;;  %v4602_v24 = vpop.f32.mrb[251].mxu0  ;;  %v3221_v19 = vmax.f32 %v3190_v44, 0.0 }
 0x2ea   :  { %v4603_v32 = vadd.f32 %v4602_v24, %v4601_v50  ;;  %v4714_v3 = vpop.f32.mrb[251].mxu1 }
 0x2eb   :  { %v3222_v9 = vmax.f32 %v3191_v53, 0.0  ;;  %v3113_v5 = vadd.f32 %v4712_v39, %v4600_v20  ;;  %v4715_v30 = vadd.f32 %v4714_v3, %v4713_v33 }
 0x2ed   :  { %v3805_v45 = vpack.c.bf16 %v3222_v9, %v3221_v19  ;;  %v3154_v35 = vmax.f32 %v6622_v6, %v3113_v5  ;;  %v3116_v42 = vadd.f32 %v4715_v30, %v4603_v32 }
 0x2ee   :  { %v4604_v56 = vpop.f32.mrb[252].mxu0 }
 0x2ef   :  { %3824 = vst [vmem:[%s6755_s6 + $0x68] sm:$0xff] %v3805_v45   ;;  %v3192_v26 = vadd.f32 %v6637_v2, %v3154_v35  ;;  %v3155_v52 = vmax.f32 %v6627_v10, %v3116_v42  ;;  %v4716_v41 = vpop.f32.mrb[252].mxu1  ;;  %v4605_v13 = vpop.f32.mrb[253].mxu0 }
 0x2f0   :  { %v4606_v47 = vadd.f32 %v4605_v13, %v4604_v56  ;;  %v4717_v31 = vpop.f32.mrb[253].mxu1  ;;  %v4607_v15 = vpop.f32.mrb[254].mxu0 }
 0x2f1   :  { %v3193_v12 = vadd.f32 %v6637_v2, %v3155_v52  ;;  %v4718_v18 = vadd.f32 %v4717_v31, %v4716_v41  ;;  %v4719_v21 = vpop.f32.mrb[254].mxu1  ;;  %v4608_v6 = vpop.f32.mrb[255].mxu0  ;;  %v3223_v27 = vmax.f32 %v3192_v26, 0.0 }
 0x2f2   :  { %v4720_v58 = vpop.f32.mrb[255].mxu1 }
 0x2f3   :  { %v3224_v1 = vmax.f32 %v3193_v12, 0.0  ;;  %v3121_v48 = vadd.f32 %v4718_v18, %v4606_v47 }
 0x2f5   :  { %v3810_v43 = vpack.c.bf16 %v3224_v1, %v3223_v27  ;;  %v3156_v23 = vmax.f32 %v6632_v8, %v3121_v48 }
 0x2f7   :  { %3825 = vst [vmem:[%s6755_s6 + $0x70] sm:$0xff] %v3810_v43   ;;  %v3194_v10 = vadd.f32 %v6637_v2, %v3156_v23 }
 0x2f9   :  { %v3225_v62 = vmax.f32 %v3194_v10, 0.0 }
 0x2fb   :  { %v3736_v36 = vpack.c.bf16 %v3225_v62, %v3225_v62 }
 0x2fd   :  { %3381 = vst [vmem:[%s6755_s6 + $0x78] sm:$0xf] %v3736_v36 }

// kernel: cnn_forward.7
= control target key start
LH: loop header
LB: loop body
LE: loop exit
PB: predicated region body
PF: predicated region fallthrough
CT: control target
= control target key end

     0   :  { %s2369_s4 = inlined_call_operand.vmem [shape: bf16[512,128], index: 4, kind: input, shape index: {}]   ;;  %s2370_s0 = inlined_call_operand.vmem [shape: bf16[56,512], index: 0, kind: input, shape index: {}]   ;;  %s2371_s1 = inlined_call_operand.vmem [shape: bf16[56,512], index: 1, kind: input, shape index: {}]   ;;  %s2372_s2 = inlined_call_operand.vmem [shape: bf16[56,512], index: 2, kind: input, shape index: {}]   ;;  %s2373_s3 = inlined_call_operand.vmem [shape: bf16[56,512], index: 3, kind: input, shape index: {}]   ;;  %s2374_s5 = inlined_call_operand.vmem [shape: f32[1,128], index: 5, kind: input, shape index: {}]   ;;  %s2375_s6 = inlined_call_operand.vmem [shape: bf16[56,128], index: 6, kind: output, shape index: {}]  }
   0x1   :  { %v1832_v0 = vld [vmem:[%s2369_s4 + $0x40] sm:$0xff]   ;;  %v1855_v4 = vld [vmem:[%s2369_s4 + $0x48] sm:$0xff]   ;;  %v1879_v8 = vld [vmem:[%s2369_s4 + $0x50] sm:$0xff]  }
   0x2   :  { %v1837_v1 = vld [vmem:[%s2369_s4 + $0xc0] sm:$0xff]   ;;  %1354 = vmatprep.subr.bf16.mxu0 %v1832_v0  ;;  %v1861_v5 = vld [vmem:[%s2369_s4 + $0xc8] sm:$0xff]   ;;  %v1885_v9 = vld [vmem:[%s2369_s4 + $0xd0] sm:$0xff]  }
   0x3   :  { %v1843_v2 = vld [vmem:[%s2369_s4] sm:$0xff]   ;;  %1394 = vmatprep.subr.bf16.mxu1 %v1837_v1  ;;  %v1867_v6 = vld [vmem:[%s2369_s4 + $0x8] sm:$0xff]   ;;  %v1891_v10 = vld [vmem:[%s2369_s4 + $0x10] sm:$0xff]  }
   0x4   :  { %v1849_v3 = vld [vmem:[%s2369_s4 + $0x80] sm:$0xff]   ;;  %1355 = vmatpush3.bf16.msra.mxu0 %v1843_v2  ;;  %v1873_v7 = vld [vmem:[%s2369_s4 + $0x88] sm:$0xff]   ;;  %v1897_v11 = vld [vmem:[%s2369_s4 + $0x90] sm:$0xff]  }
   0x5   :  { %1395 = vmatpush3.bf16.msra.mxu1 %v1849_v3  ;;  %1356 = vmatprep.subr.bf16.mxu0 %v1855_v4  ;;  %v1903_v12 = vld [vmem:[%s2369_s4 + $0x58] sm:$0xff]   ;;  %v1927_v16 = vld [vmem:[%s2369_s4 + $0x60] sm:$0xff]   ;;  %v1951_v20 = vld [vmem:[%s2369_s4 + $0x68] sm:$0xff]  }
   0x6   :  { %1396 = vmatprep.subr.bf16.mxu1 %v1861_v5  ;;  %v1909_v13 = vld [vmem:[%s2369_s4 + $0xd8] sm:$0xff]   ;;  %v1933_v17 = vld [vmem:[%s2369_s4 + $0xe0] sm:$0xff]   ;;  %v1957_v21 = vld [vmem:[%s2369_s4 + $0xe8] sm:$0xff]  }
   0x7   :  { %v1915_v14 = vld [vmem:[%s2369_s4 + $0x18] sm:$0xff]   ;;  %v1939_v18 = vld [vmem:[%s2369_s4 + $0x20] sm:$0xff]   ;;  %v1963_v22 = vld [vmem:[%s2369_s4 + $0x28] sm:$0xff]  }
   0x8   :  { %1357 = vmatpush3.bf16.msra.mxu0 %v1867_v6  ;;  %v1921_v15 = vld [vmem:[%s2369_s4 + $0x98] sm:$0xff]   ;;  %v1945_v19 = vld [vmem:[%s2369_s4 + $0xa0] sm:$0xff]   ;;  %v1969_v23 = vld [vmem:[%s2369_s4 + $0xa8] sm:$0xff]  }
   0x9   :  { %1397 = vmatpush3.bf16.msra.mxu1 %v1873_v7  ;;  %1358 = vmatprep.subr.bf16.mxu0 %v1879_v8  ;;  %v1975_v24 = vld [vmem:[%s2369_s4 + $0x70] sm:$0xff]   ;;  %v1999_v28 = vld [vmem:[%s2369_s4 + $0x78] sm:$0xff]   ;;  %v100_v44 = vld [vmem:[%s2370_s0 + $0x60] sm:$0xff] }
   0xa   :  { %1398 = vmatprep.subr.bf16.mxu1 %v1885_v9  ;;  %v1981_v25 = vld [vmem:[%s2369_s4 + $0xf0] sm:$0xff]   ;;  %v2005_v29 = vld [vmem:[%s2369_s4 + $0xf8] sm:$0xff]   ;;  %v101_v45 = vld [vmem:[%s2370_s0 + $0x68] sm:$0xff]  ;;  %v1239_v46 = vcombine.high %v100_v44, %v100_v44  ;;  %v1238_v48 = vcombine.low %v100_v44, %v100_v44 }
   0xb   :  { %v1987_v26 = vld [vmem:[%s2369_s4 + $0x30] sm:$0xff]   ;;  %v2011_v30 = vld [vmem:[%s2369_s4 + $0x38] sm:$0xff]   ;;  %v1241_v47 = vcombine.high %v101_v45, %v101_v45  ;;  %v1240_v49 = vcombine.low %v101_v45, %v101_v45  ;;  %v508_v61 = vld [vmem:[%s2371_s1 + $0x60] sm:$0xff] }
   0xc   :  { %1359 = vmatpush3.bf16.msra.mxu0 %v1891_v10  ;;  %v1993_v27 = vld [vmem:[%s2369_s4 + $0xb0] sm:$0xff]   ;;  %v2017_v31 = vld [vmem:[%s2369_s4 + $0xb8] sm:$0xff]   ;;  %v509_v63 = vld [vmem:[%s2371_s1 + $0x68] sm:$0xff] }
   0xd   :  { %1399 = vmatpush3.bf16.msra.mxu1 %v1897_v11  ;;  %1360 = vmatprep.subr.bf16.mxu0 %v1903_v12  ;;  %v1706_v32 = vld [vmem:[%s2370_s0] ss:$16 sps:$4 sm:$0xff]   ;;  %v1708_v33 = vld [vmem:[%s2370_s0 + $0x4] ss:$16 sps:$4 sm:$0xff]   ;;  %v1709_v34 = vld [vmem:[%s2370_s0 + $0x8] ss:$16 sps:$4 sm:$0xff]  }
   0xe   :  { %1400 = vmatprep.subr.bf16.mxu1 %v1909_v13  ;;  %v1711_v35 = vld [vmem:[%s2370_s0 + $0xc] ss:$16 sps:$4 sm:$0xff]   ;;  %400 = vmatprep.mubr.bf16.mxu0 %v1708_v33  ;;  %v1712_v36 = vld [vmem:[%s2370_s0 + $0x24] ss:$16 sps:$4 sm:$0xff]   ;;  %v1716_v38 = vld [vmem:[%s2370_s0 + $0x20] ss:$16 sps:$4 sm:$0xff]   ;;  %v1289_v33 = vcombine.high %v509_v63, %v509_v63 }
   0xf   :  { %464 = vmatprep.mubr.bf16.mxu1 %v1711_v35  ;;  %v1714_v37 = vld [vmem:[%s2370_s0 + $0x2c] ss:$16 sps:$4 sm:$0xff]   ;;  %v1717_v39 = vld [vmem:[%s2370_s0 + $0x28] ss:$16 sps:$4 sm:$0xff]   ;;  %v1718_v40 = vld [vmem:[%s2370_s0 + $0x44] ss:$16 sps:$4 sm:$0xff]   ;;  %v1288_v35 = vcombine.low %v509_v63, %v509_v63 }
  0x10   :  { %1361 = vmatpush3.bf16.msra.mxu0 %v1915_v14  ;;  %v1720_v41 = vld [vmem:[%s2370_s0 + $0x4c] ss:$16 sps:$4 sm:$0xff]   ;;  %v1722_v42 = vld [vmem:[%s2370_s0 + $0x40] ss:$16 sps:$4 sm:$0xff]   ;;  %v1723_v43 = vld [vmem:[%s2370_s0 + $0x48] ss:$16 sps:$4 sm:$0xff]  }
  0x11   :  { %1401 = vmatpush3.bf16.msra.mxu1 %v1921_v15  ;;  %1362 = vmatprep.subr.bf16.mxu0 %v1927_v16  ;;  %v1730_v50 = vld [vmem:[%s2371_s1 + $0x4] ss:$16 sps:$4 sm:$0xff]   ;;  %v1733_v51 = vld [vmem:[%s2371_s1 + $0xc] ss:$16 sps:$4 sm:$0xff]   ;;  %v1728_v52 = vld [vmem:[%s2371_s1] ss:$16 sps:$4 sm:$0xff]  }
  0x12   :  { %1402 = vmatprep.subr.bf16.mxu1 %v1933_v17  ;;  %v1731_v53 = vld [vmem:[%s2371_s1 + $0x8] ss:$16 sps:$4 sm:$0xff]   ;;  %v1734_v54 = vld [vmem:[%s2371_s1 + $0x24] ss:$16 sps:$4 sm:$0xff]   ;;  %v1736_v55 = vld [vmem:[%s2371_s1 + $0x2c] ss:$16 sps:$4 sm:$0xff]  }
  0x13   :  { %v1738_v56 = vld [vmem:[%s2371_s1 + $0x20] ss:$16 sps:$4 sm:$0xff]   ;;  %v1739_v57 = vld [vmem:[%s2371_s1 + $0x28] ss:$16 sps:$4 sm:$0xff]   ;;  %v1740_v58 = vld [vmem:[%s2371_s1 + $0x44] ss:$16 sps:$4 sm:$0xff]  }
  0x14   :  { %1363 = vmatpush3.bf16.msra.mxu0 %v1939_v18  ;;  %v1742_v59 = vld [vmem:[%s2371_s1 + $0x4c] ss:$16 sps:$4 sm:$0xff]   ;;  %v1744_v60 = vld [vmem:[%s2371_s1 + $0x40] ss:$16 sps:$4 sm:$0xff]   ;;  %v1745_v62 = vld [vmem:[%s2371_s1 + $0x48] ss:$16 sps:$4 sm:$0xff]  }
  0x15   :  { %1403 = vmatpush3.bf16.msra.mxu1 %v1945_v19  ;;  %1364 = vmatprep.subr.bf16.mxu0 %v1951_v20 }
  0x16   :  { %1404 = vmatprep.subr.bf16.mxu1 %v1957_v21 }
  0x18   :  { %1365 = vmatpush3.bf16.msra.mxu0 %v1963_v22 }
  0x19   :  { %1405 = vmatpush3.bf16.msra.mxu1 %v1969_v23  ;;  %1366 = vmatprep.subr.bf16.mxu0 %v1975_v24 }
  0x1a   :  { %1406 = vmatprep.subr.bf16.mxu1 %v1981_v25 }
  0x1c   :  { %1367 = vmatpush3.bf16.msra.mxu0 %v1987_v26 }
  0x1d   :  { %1407 = vmatpush3.bf16.msra.mxu1 %v1993_v27  ;;  %1368 = vmatprep.subr.bf16.mxu0 %v1999_v28 }
  0x1e   :  { %1408 = vmatprep.subr.bf16.mxu1 %v2005_v29 }
  0x20   :  { %1369 = vmatpush3.bf16.msra.mxu0 %v2011_v30 }
  0x21   :  { %1409 = vmatpush3.bf16.msra.mxu1 %v2017_v31  ;;  %1434 = vmatprep.subr.bf16.mxu0 %v1832_v0 }
  0x22   :  { %1474 = vmatprep.subr.bf16.mxu1 %v1837_v1 }
  0x23   :  { %401 = vmatmul.mubr.bf16.vlgmr.msra.gmra.mrb[0].mxu0 %v1706_v32  ;;  %v1287_v32 = vcombine.high %v508_v61, %v508_v61 }
  0x24   :  { %465 = vmatmul.mubr.bf16.vlgmr.msra.gmra.mrb[0].mxu1 %v1709_v34  ;;  %1435 = vmatpush3.bf16.msra.mxu0 %v1843_v2  ;;  %v1286_v34 = vcombine.low %v508_v61, %v508_v61 }
  0x25   :  { %1475 = vmatpush3.bf16.msra.mxu1 %v1849_v3  ;;  %1436 = vmatprep.subr.bf16.mxu0 %v1855_v4 }
  0x26   :  { %1476 = vmatprep.subr.bf16.mxu1 %v1861_v5  ;;  %408 = vmatprep.mubr.bf16.mxu0 %v1712_v36  ;;  %v1752_v36 = vld [vmem:[%s2372_s2 + $0x4] ss:$16 sps:$4 sm:$0xff]  }
  0x27   :  { %472 = vmatprep.mubr.bf16.mxu1 %v1714_v37  ;;  %v1755_v37 = vld [vmem:[%s2372_s2 + $0xc] ss:$16 sps:$4 sm:$0xff]  }
  0x28   :  { %1437 = vmatpush3.bf16.msra.mxu0 %v1867_v6 }
  0x29   :  { %1477 = vmatpush3.bf16.msra.mxu1 %v1873_v7  ;;  %1438 = vmatprep.subr.bf16.mxu0 %v1879_v8 }
  0x2a   :  { %1478 = vmatprep.subr.bf16.mxu1 %v1885_v9 }
  0x2b   :  { %409 = vmatmul.mubr.bf16.gmra.mrb[4].mxu0 %v1716_v38  ;;  %v1750_v38 = vld [vmem:[%s2372_s2] ss:$16 sps:$4 sm:$0xff]  }
  0x2c   :  { %473 = vmatmul.mubr.bf16.gmra.mrb[4].mxu1 %v1717_v39  ;;  %1439 = vmatpush3.bf16.msra.mxu0 %v1891_v10  ;;  %v1753_v39 = vld [vmem:[%s2372_s2 + $0x8] ss:$16 sps:$4 sm:$0xff]  }
  0x2d   :  { %1479 = vmatpush3.bf16.msra.mxu1 %v1897_v11  ;;  %1440 = vmatprep.subr.bf16.mxu0 %v1903_v12 }
  0x2e   :  { %1480 = vmatprep.subr.bf16.mxu1 %v1909_v13  ;;  %416 = vmatprep.mubr.bf16.mxu0 %v1718_v40  ;;  %v1756_v40 = vld [vmem:[%s2372_s2 + $0x24] ss:$16 sps:$4 sm:$0xff]  }
  0x2f   :  { %480 = vmatprep.mubr.bf16.mxu1 %v1720_v41  ;;  %v1758_v41 = vld [vmem:[%s2372_s2 + $0x2c] ss:$16 sps:$4 sm:$0xff]  }
  0x30   :  { %1441 = vmatpush3.bf16.msra.mxu0 %v1915_v14 }
  0x31   :  { %1481 = vmatpush3.bf16.msra.mxu1 %v1921_v15  ;;  %1442 = vmatprep.subr.bf16.mxu0 %v1927_v16 }
  0x32   :  { %1482 = vmatprep.subr.bf16.mxu1 %v1933_v17 }
  0x33   :  { %417 = vmatmul.mubr.bf16.gmra.mrb[8].mxu0 %v1722_v42 }
  0x34   :  { %481 = vmatmul.mubr.bf16.gmra.mrb[8].mxu1 %v1723_v43  ;;  %1443 = vmatpush3.bf16.msra.mxu0 %v1939_v18 }
  0x35   :  { %1483 = vmatpush3.bf16.msra.mxu1 %v1945_v19  ;;  %1444 = vmatprep.subr.bf16.mxu0 %v1951_v20 }
  0x36   :  { %1484 = vmatprep.subr.bf16.mxu1 %v1957_v21  ;;  %424 = vmatprep.mubr.bf16.mxu0 %v1239_v46 }
  0x37   :  { %488 = vmatprep.mubr.bf16.mxu1 %v1241_v47 }
  0x38   :  { %1445 = vmatpush3.bf16.msra.mxu0 %v1963_v22 }
  0x39   :  { %1485 = vmatpush3.bf16.msra.mxu1 %v1969_v23  ;;  %1446 = vmatprep.subr.bf16.mxu0 %v1975_v24 }
  0x3a   :  { %1486 = vmatprep.subr.bf16.mxu1 %v1981_v25 }
  0x3b   :  { %425 = vmatmul.mubr.bf16.gmra.mrb[12].mxu0 %v1238_v48 }
  0x3c   :  { %489 = vmatmul.mubr.bf16.gmra.mrb[12].mxu1 %v1240_v49  ;;  %1447 = vmatpush3.bf16.msra.mxu0 %v1987_v26 }
  0x3d   :  { %1487 = vmatpush3.bf16.msra.mxu1 %v1993_v27  ;;  %1448 = vmatprep.subr.bf16.mxu0 %v1999_v28 }
  0x3e   :  { %1488 = vmatprep.subr.bf16.mxu1 %v2005_v29  ;;  %616 = vmatprep.mubr.bf16.mxu0 %v1730_v50 }
  0x3f   :  { %680 = vmatprep.mubr.bf16.mxu1 %v1733_v51 }
  0x40   :  { %1449 = vmatpush3.bf16.msra.mxu0 %v2011_v30 }
  0x41   :  { %1489 = vmatpush3.bf16.msra.mxu1 %v2017_v31  ;;  %1514 = vmatprep.subr.bf16.mxu0 %v1832_v0 }
  0x42   :  { %1554 = vmatprep.subr.bf16.mxu1 %v1837_v1 }
  0x43   :  { %617 = vmatmul.mubr.bf16.vlgmr.msra.gmra.mrb[16].mxu0 %v1728_v52 }
  0x44   :  { %681 = vmatmul.mubr.bf16.vlgmr.msra.gmra.mrb[16].mxu1 %v1731_v53  ;;  %1515 = vmatpush3.bf16.msra.mxu0 %v1843_v2 }
  0x45   :  { %1555 = vmatpush3.bf16.msra.mxu1 %v1849_v3  ;;  %1516 = vmatprep.subr.bf16.mxu0 %v1855_v4 }
  0x46   :  { %1556 = vmatprep.subr.bf16.mxu1 %v1861_v5  ;;  %624 = vmatprep.mubr.bf16.mxu0 %v1734_v54 }
  0x47   :  { %688 = vmatprep.mubr.bf16.mxu1 %v1736_v55 }
  0x48   :  { %1517 = vmatpush3.bf16.msra.mxu0 %v1867_v6 }
  0x49   :  { %1557 = vmatpush3.bf16.msra.mxu1 %v1873_v7  ;;  %1518 = vmatprep.subr.bf16.mxu0 %v1879_v8 }
  0x4a   :  { %1558 = vmatprep.subr.bf16.mxu1 %v1885_v9 }
  0x4b   :  { %625 = vmatmul.mubr.bf16.gmra.mrb[20].mxu0 %v1738_v56 }
  0x4c   :  { %689 = vmatmul.mubr.bf16.gmra.mrb[20].mxu1 %v1739_v57  ;;  %1519 = vmatpush3.bf16.msra.mxu0 %v1891_v10 }
  0x4d   :  { %1559 = vmatpush3.bf16.msra.mxu1 %v1897_v11  ;;  %1520 = vmatprep.subr.bf16.mxu0 %v1903_v12 }
  0x4e   :  { %1560 = vmatprep.subr.bf16.mxu1 %v1909_v13  ;;  %632 = vmatprep.mubr.bf16.mxu0 %v1740_v58 }
  0x4f   :  { %696 = vmatprep.mubr.bf16.mxu1 %v1742_v59 }
  0x50   :  { %1521 = vmatpush3.bf16.msra.mxu0 %v1915_v14 }
  0x51   :  { %1561 = vmatpush3.bf16.msra.mxu1 %v1921_v15  ;;  %1522 = vmatprep.subr.bf16.mxu0 %v1927_v16 }
  0x52   :  { %1562 = vmatprep.subr.bf16.mxu1 %v1933_v17 }
  0x53   :  { %633 = vmatmul.mubr.bf16.gmra.mrb[24].mxu0 %v1744_v60 }
  0x54   :  { %697 = vmatmul.mubr.bf16.gmra.mrb[24].mxu1 %v1745_v62  ;;  %1523 = vmatpush3.bf16.msra.mxu0 %v1939_v18 }
  0x55   :  { %1563 = vmatpush3.bf16.msra.mxu1 %v1945_v19  ;;  %1524 = vmatprep.subr.bf16.mxu0 %v1951_v20 }
  0x56   :  { %1564 = vmatprep.subr.bf16.mxu1 %v1957_v21  ;;  %640 = vmatprep.mubr.bf16.mxu0 %v1287_v32 }
  0x57   :  { %704 = vmatprep.mubr.bf16.mxu1 %v1289_v33 }
  0x58   :  { %1525 = vmatpush3.bf16.msra.mxu0 %v1963_v22 }
  0x59   :  { %1565 = vmatpush3.bf16.msra.mxu1 %v1969_v23  ;;  %1526 = vmatprep.subr.bf16.mxu0 %v1975_v24 }
  0x5a   :  { %1566 = vmatprep.subr.bf16.mxu1 %v1981_v25 }
  0x5b   :  { %641 = vmatmul.mubr.bf16.gmra.mrb[28].mxu0 %v1286_v34 }
  0x5c   :  { %705 = vmatmul.mubr.bf16.gmra.mrb[28].mxu1 %v1288_v35  ;;  %1527 = vmatpush3.bf16.msra.mxu0 %v1987_v26 }
  0x5d   :  { %1567 = vmatpush3.bf16.msra.mxu1 %v1993_v27  ;;  %1528 = vmatprep.subr.bf16.mxu0 %v1999_v28 }
  0x5e   :  { %1568 = vmatprep.subr.bf16.mxu1 %v2005_v29  ;;  %839 = vmatprep.mubr.bf16.mxu0 %v1752_v36 }
  0x5f   :  { %903 = vmatprep.mubr.bf16.mxu1 %v1755_v37 }
  0x60   :  { %1529 = vmatpush3.bf16.msra.mxu0 %v2011_v30 }
  0x61   :  { %1569 = vmatpush3.bf16.msra.mxu1 %v2017_v31  ;;  %1594 = vmatprep.subr.bf16.mxu0 %v1832_v0  ;;  %v1760_v0 = vld [vmem:[%s2372_s2 + $0x20] ss:$16 sps:$4 sm:$0xff]  }
  0x62   :  { %1634 = vmatprep.subr.bf16.mxu1 %v1837_v1  ;;  %v1761_v1 = vld [vmem:[%s2372_s2 + $0x28] ss:$16 sps:$4 sm:$0xff]  }
  0x63   :  { %840 = vmatmul.mubr.bf16.vlgmr.msra.gmra.mrb[32].mxu0 %v1750_v38 }
  0x64   :  { %904 = vmatmul.mubr.bf16.vlgmr.msra.gmra.mrb[32].mxu1 %v1753_v39  ;;  %1595 = vmatpush3.bf16.msra.mxu0 %v1843_v2  ;;  %v1762_v2 = vld [vmem:[%s2372_s2 + $0x44] ss:$16 sps:$4 sm:$0xff]  }
  0x65   :  { %1635 = vmatpush3.bf16.msra.mxu1 %v1849_v3  ;;  %1596 = vmatprep.subr.bf16.mxu0 %v1855_v4  ;;  %v1764_v3 = vld [vmem:[%s2372_s2 + $0x4c] ss:$16 sps:$4 sm:$0xff]   ;;  %v1766_v4 = vld [vmem:[%s2372_s2 + $0x40] ss:$16 sps:$4 sm:$0xff]  }
  0x66   :  { %1636 = vmatprep.subr.bf16.mxu1 %v1861_v5  ;;  %847 = vmatprep.mubr.bf16.mxu0 %v1756_v40  ;;  %v731_v5 = vld [vmem:[%s2372_s2 + $0x60] sm:$0xff] }
  0x67   :  { %911 = vmatprep.mubr.bf16.mxu1 %v1758_v41 }
  0x68   :  { %1597 = vmatpush3.bf16.msra.mxu0 %v1867_v6  ;;  %v1767_v6 = vld [vmem:[%s2372_s2 + $0x48] ss:$16 sps:$4 sm:$0xff]  }
  0x69   :  { %1637 = vmatpush3.bf16.msra.mxu1 %v1873_v7  ;;  %1598 = vmatprep.subr.bf16.mxu0 %v1879_v8  ;;  %v732_v7 = vld [vmem:[%s2372_s2 + $0x68] sm:$0xff]  ;;  %v1303_v8 = vcombine.high %v731_v5, %v731_v5 }
  0x6a   :  { %1638 = vmatprep.subr.bf16.mxu1 %v1885_v9  ;;  %v1305_v9 = vcombine.high %v732_v7, %v732_v7 }
  0x6b   :  { %848 = vmatmul.mubr.bf16.gmra.mrb[36].mxu0 %v1760_v0 }
  0x6c   :  { %912 = vmatmul.mubr.bf16.gmra.mrb[36].mxu1 %v1761_v1  ;;  %1599 = vmatpush3.bf16.msra.mxu0 %v1891_v10  ;;  %v1302_v10 = vcombine.low %v731_v5, %v731_v5 }
  0x6d   :  { %1639 = vmatpush3.bf16.msra.mxu1 %v1897_v11  ;;  %1600 = vmatprep.subr.bf16.mxu0 %v1903_v12  ;;  %v1304_v11 = vcombine.low %v732_v7, %v732_v7  ;;  %v1774_v12 = vld [vmem:[%s2373_s3 + $0x4] ss:$16 sps:$4 sm:$0xff]  }
  0x6e   :  { %1640 = vmatprep.subr.bf16.mxu1 %v1909_v13  ;;  %855 = vmatprep.mubr.bf16.mxu0 %v1762_v2  ;;  %v1777_v13 = vld [vmem:[%s2373_s3 + $0xc] ss:$16 sps:$4 sm:$0xff]  }
  0x6f   :  { %919 = vmatprep.mubr.bf16.mxu1 %v1764_v3 }
  0x70   :  { %1601 = vmatpush3.bf16.msra.mxu0 %v1915_v14  ;;  %v1772_v14 = vld [vmem:[%s2373_s3] ss:$16 sps:$4 sm:$0xff]  }
  0x71   :  { %1641 = vmatpush3.bf16.msra.mxu1 %v1921_v15  ;;  %1602 = vmatprep.subr.bf16.mxu0 %v1927_v16  ;;  %v1775_v15 = vld [vmem:[%s2373_s3 + $0x8] ss:$16 sps:$4 sm:$0xff]   ;;  %v1778_v16 = vld [vmem:[%s2373_s3 + $0x24] ss:$16 sps:$4 sm:$0xff]  }
  0x72   :  { %1642 = vmatprep.subr.bf16.mxu1 %v1933_v17  ;;  %v1780_v17 = vld [vmem:[%s2373_s3 + $0x2c] ss:$16 sps:$4 sm:$0xff]  }
  0x73   :  { %856 = vmatmul.mubr.bf16.gmra.mrb[40].mxu0 %v1766_v4 }
  0x74   :  { %920 = vmatmul.mubr.bf16.gmra.mrb[40].mxu1 %v1767_v6  ;;  %1603 = vmatpush3.bf16.msra.mxu0 %v1939_v18  ;;  %v1782_v18 = vld [vmem:[%s2373_s3 + $0x20] ss:$16 sps:$4 sm:$0xff]  }
  0x75   :  { %1643 = vmatpush3.bf16.msra.mxu1 %v1945_v19  ;;  %1604 = vmatprep.subr.bf16.mxu0 %v1951_v20  ;;  %v1783_v19 = vld [vmem:[%s2373_s3 + $0x28] ss:$16 sps:$4 sm:$0xff]   ;;  %v1784_v20 = vld [vmem:[%s2373_s3 + $0x44] ss:$16 sps:$4 sm:$0xff]  }
  0x76   :  { %1644 = vmatprep.subr.bf16.mxu1 %v1957_v21  ;;  %863 = vmatprep.mubr.bf16.mxu0 %v1303_v8  ;;  %v1786_v21 = vld [vmem:[%s2373_s3 + $0x4c] ss:$16 sps:$4 sm:$0xff]  }
  0x77   :  { %927 = vmatprep.mubr.bf16.mxu1 %v1305_v9 }
  0x78   :  { %1605 = vmatpush3.bf16.msra.mxu0 %v1963_v22  ;;  %v954_v22 = vld [vmem:[%s2373_s3 + $0x60] sm:$0xff] }
  0x79   :  { %1645 = vmatpush3.bf16.msra.mxu1 %v1969_v23  ;;  %1606 = vmatprep.subr.bf16.mxu0 %v1975_v24  ;;  %v955_v23 = vld [vmem:[%s2373_s3 + $0x68] sm:$0xff]  ;;  %v1788_v24 = vld [vmem:[%s2373_s3 + $0x40] ss:$16 sps:$4 sm:$0xff]  }
  0x7a   :  { %1646 = vmatprep.subr.bf16.mxu1 %v1981_v25  ;;  %v1789_v25 = vld [vmem:[%s2373_s3 + $0x48] ss:$16 sps:$4 sm:$0xff]  }
  0x7b   :  { %864 = vmatmul.mubr.bf16.gmra.mrb[44].mxu0 %v1302_v10 }
  0x7c   :  { %928 = vmatmul.mubr.bf16.gmra.mrb[44].mxu1 %v1304_v11  ;;  %1607 = vmatpush3.bf16.msra.mxu0 %v1987_v26  ;;  %v1319_v26 = vcombine.high %v954_v22, %v954_v22 }
  0x7d   :  { %1647 = vmatpush3.bf16.msra.mxu1 %v1993_v27  ;;  %1608 = vmatprep.subr.bf16.mxu0 %v1999_v28  ;;  %v1321_v27 = vcombine.high %v955_v23, %v955_v23  ;;  %v1318_v28 = vcombine.low %v954_v22, %v954_v22 }
  0x7e   :  { %1648 = vmatprep.subr.bf16.mxu1 %v2005_v29  ;;  %1062 = vmatprep.mubr.bf16.mxu0 %v1774_v12  ;;  %v1320_v29 = vcombine.low %v955_v23, %v955_v23 }
  0x7f   :  { %1126 = vmatprep.mubr.bf16.mxu1 %v1777_v13 }
  0x80   :  { %1609 = vmatpush3.bf16.msra.mxu0 %v2011_v30 }
  0x81   :  { %1649 = vmatpush3.bf16.msra.mxu1 %v2017_v31 }
  0x83   :  { %1063 = vmatmul.mubr.bf16.vlgmr.msra.gmra.mrb[48].mxu0 %v1772_v14 }
  0x84   :  { %1127 = vmatmul.mubr.bf16.vlgmr.msra.gmra.mrb[48].mxu1 %v1775_v15  ;;  %1070 = vmatprep.mubr.bf16.mxu0 %v1778_v16 }
  0x85   :  { %1134 = vmatprep.mubr.bf16.mxu1 %v1780_v17 }
  0x8b   :  { %1071 = vmatmul.mubr.bf16.gmra.mrb[52].mxu0 %v1782_v18 }
  0x8c   :  { %1135 = vmatmul.mubr.bf16.gmra.mrb[52].mxu1 %v1783_v19  ;;  %1078 = vmatprep.mubr.bf16.mxu0 %v1784_v20 }
  0x8d   :  { %1142 = vmatprep.mubr.bf16.mxu1 %v1786_v21 }
  0x93   :  { %1079 = vmatmul.mubr.bf16.gmra.mrb[56].mxu0 %v1788_v24 }
  0x94   :  { %1143 = vmatmul.mubr.bf16.gmra.mrb[56].mxu1 %v1789_v25  ;;  %1086 = vmatprep.mubr.bf16.mxu0 %v1319_v26 }
  0x95   :  { %1150 = vmatprep.mubr.bf16.mxu1 %v1321_v27 }
  0x9b   :  { %1087 = vmatmul.mubr.bf16.gmra.mrb[60].mxu0 %v1318_v28 }
  0x9c   :  { %1151 = vmatmul.mubr.bf16.gmra.mrb[60].mxu1 %v1320_v29 }
  0xf6   :  { %v1370_v30 = vpop.f32.mrb[0].mxu0 }
  0xf7   :  { %v1410_v31 = vpop.f32.mrb[0].mxu1  ;;  %v1371_v42 = vpop.f32.mrb[1].mxu0 }
  0xf8   :  { %v1372_v43 = vadd.f32 %v1371_v42, %v1370_v30  ;;  %v1411_v44 = vpop.f32.mrb[1].mxu1  ;;  %v1373_v45 = vpop.f32.mrb[2].mxu0 }
  0xf9   :  { %v1412_v46 = vadd.f32 %v1411_v44, %v1410_v31  ;;  %v1413_v47 = vpop.f32.mrb[2].mxu1  ;;  %v1374_v48 = vpop.f32.mrb[3].mxu0 }
  0xfa   :  { %v1375_v49 = vadd.f32 %v1374_v48, %v1373_v45  ;;  %v1414_v50 = vpop.f32.mrb[3].mxu1 }
  0xfb   :  { %v2285_v51 = vadd.f32 %v1412_v46, %v1372_v43  ;;  %v1415_v52 = vadd.f32 %v1414_v50, %v1413_v47 }
  0xfd   :  { %v2287_v53 = vadd.f32 %v1415_v52, %v1375_v49 }
  0xfe   :  { %v1376_v54 = vpop.f32.mrb[4].mxu0 }
  0xff   :  { %v1416_v55 = vpop.f32.mrb[4].mxu1  ;;  %v1377_v56 = vpop.f32.mrb[5].mxu0 }
 0x100   :  { %v1378_v57 = vadd.f32 %v1377_v56, %v1376_v54  ;;  %v1417_v58 = vpop.f32.mrb[5].mxu1  ;;  %v1379_v59 = vpop.f32.mrb[6].mxu0 }
 0x101   :  { %v1418_v60 = vadd.f32 %v1417_v58, %v1416_v55  ;;  %v1419_v61 = vpop.f32.mrb[6].mxu1  ;;  %v1380_v62 = vpop.f32.mrb[7].mxu0 }
 0x102   :  { %v1381_v63 = vadd.f32 %v1380_v62, %v1379_v59  ;;  %v1420_v32 = vpop.f32.mrb[7].mxu1 }
 0x103   :  { %v2289_v33 = vadd.f32 %v1418_v60, %v1378_v57  ;;  %v1421_v34 = vadd.f32 %v1420_v32, %v1419_v61 }
 0x105   :  { %v2291_v35 = vadd.f32 %v1421_v34, %v1381_v63 }
 0x106   :  { %v1382_v36 = vpop.f32.mrb[8].mxu0 }
 0x107   :  { %v1422_v37 = vpop.f32.mrb[8].mxu1  ;;  %v1383_v38 = vpop.f32.mrb[9].mxu0 }
 0x108   :  { %v1384_v39 = vadd.f32 %v1383_v38, %v1382_v36  ;;  %v1423_v40 = vpop.f32.mrb[9].mxu1  ;;  %v1385_v41 = vpop.f32.mrb[10].mxu0 }
 0x109   :  { %v1424_v0 = vadd.f32 %v1423_v40, %v1422_v37  ;;  %v1425_v1 = vpop.f32.mrb[10].mxu1  ;;  %v1386_v2 = vpop.f32.mrb[11].mxu0 }
 0x10a   :  { %v1387_v3 = vadd.f32 %v1386_v2, %v1385_v41  ;;  %v1426_v4 = vpop.f32.mrb[11].mxu1 }
 0x10b   :  { %v2293_v5 = vadd.f32 %v1424_v0, %v1384_v39  ;;  %v1427_v6 = vadd.f32 %v1426_v4, %v1425_v1 }
 0x10d   :  { %v2295_v7 = vadd.f32 %v1427_v6, %v1387_v3 }
 0x10e   :  { %v1388_v8 = vpop.f32.mrb[12].mxu0 }
 0x10f   :  { %v1428_v9 = vpop.f32.mrb[12].mxu1  ;;  %v1389_v10 = vpop.f32.mrb[13].mxu0 }
 0x110   :  { %v1390_v11 = vadd.f32 %v1389_v10, %v1388_v8  ;;  %v1429_v12 = vpop.f32.mrb[13].mxu1  ;;  %v1391_v13 = vpop.f32.mrb[14].mxu0 }
 0x111   :  { %v1430_v14 = vadd.f32 %v1429_v12, %v1428_v9  ;;  %v1431_v15 = vpop.f32.mrb[14].mxu1  ;;  %v1392_v16 = vpop.f32.mrb[15].mxu0 }
 0x112   :  { %v1432_v17 = vpop.f32.mrb[15].mxu1 }
 0x113   :  { %v2297_v18 = vadd.f32 %v1430_v14, %v1390_v11 }
 0x116   :  { %v1450_v19 = vpop.f32.mrb[16].mxu0 }
 0x117   :  { %v1490_v20 = vpop.f32.mrb[16].mxu1  ;;  %v1451_v21 = vpop.f32.mrb[17].mxu0 }
 0x118   :  { %v1452_v22 = vadd.f32 %v1451_v21, %v1450_v19  ;;  %v1491_v23 = vpop.f32.mrb[17].mxu1  ;;  %v1453_v24 = vpop.f32.mrb[18].mxu0 }
 0x119   :  { %v1492_v25 = vadd.f32 %v1491_v23, %v1490_v20  ;;  %v1493_v26 = vpop.f32.mrb[18].mxu1  ;;  %v1454_v27 = vpop.f32.mrb[19].mxu0 }
 0x11a   :  { %v1455_v28 = vadd.f32 %v1454_v27, %v1453_v24  ;;  %v1494_v29 = vpop.f32.mrb[19].mxu1 }
 0x11b   :  { %v2299_v30 = vadd.f32 %v1492_v25, %v1452_v22  ;;  %v1495_v31 = vadd.f32 %v1494_v29, %v1493_v26 }
 0x11d   :  { %v712_v42 = vmax.f32 %v2285_v51, %v2299_v30  ;;  %v2303_v43 = vadd.f32 %v1495_v31, %v1455_v28 }
 0x11e   :  { %v1456_v44 = vpop.f32.mrb[20].mxu0 }
 0x11f   :  { %v713_v45 = vmax.f32 %v2287_v53, %v2303_v43  ;;  %v1496_v46 = vpop.f32.mrb[20].mxu1  ;;  %v1457_v47 = vpop.f32.mrb[21].mxu0 }
 0x120   :  { %v1458_v48 = vadd.f32 %v1457_v47, %v1456_v44  ;;  %v1497_v49 = vpop.f32.mrb[21].mxu1  ;;  %v1459_v50 = vpop.f32.mrb[22].mxu0 }
 0x121   :  { %v1498_v52 = vadd.f32 %v1497_v49, %v1496_v46  ;;  %v1499_v54 = vpop.f32.mrb[22].mxu1  ;;  %v1460_v55 = vpop.f32.mrb[23].mxu0 }
 0x122   :  { %v1461_v56 = vadd.f32 %v1460_v55, %v1459_v50  ;;  %v1500_v57 = vpop.f32.mrb[23].mxu1 }
 0x123   :  { %v2307_v58 = vadd.f32 %v1498_v52, %v1458_v48  ;;  %v1501_v59 = vadd.f32 %v1500_v57, %v1499_v54 }
 0x125   :  { %v714_v51 = vmax.f32 %v2289_v33, %v2307_v58  ;;  %v2311_v60 = vadd.f32 %v1501_v59, %v1461_v56 }
 0x126   :  { %v1462_v61 = vpop.f32.mrb[24].mxu0 }
 0x127   :  { %v715_v53 = vmax.f32 %v2291_v35, %v2311_v60  ;;  %v1502_v62 = vpop.f32.mrb[24].mxu1  ;;  %v1463_v63 = vpop.f32.mrb[25].mxu0 }
 0x128   :  { %v1464_v32 = vadd.f32 %v1463_v63, %v1462_v61  ;;  %v1503_v34 = vpop.f32.mrb[25].mxu1  ;;  %v1465_v36 = vpop.f32.mrb[26].mxu0 }
 0x129   :  { %v1504_v37 = vadd.f32 %v1503_v34, %v1502_v62  ;;  %v1505_v38 = vpop.f32.mrb[26].mxu1  ;;  %v1466_v39 = vpop.f32.mrb[27].mxu0 }
 0x12a   :  { %v1467_v40 = vadd.f32 %v1466_v39, %v1465_v36  ;;  %v1506_v41 = vpop.f32.mrb[27].mxu1 }
 0x12b   :  { %v2315_v0 = vadd.f32 %v1504_v37, %v1464_v32  ;;  %v1507_v1 = vadd.f32 %v1506_v41, %v1505_v38 }
 0x12d   :  { %v716_v33 = vmax.f32 %v2293_v5, %v2315_v0  ;;  %v2319_v2 = vadd.f32 %v1507_v1, %v1467_v40 }
 0x12e   :  { %v1468_v3 = vpop.f32.mrb[28].mxu0 }
 0x12f   :  { %v717_v35 = vmax.f32 %v2295_v7, %v2319_v2  ;;  %v1508_v4 = vpop.f32.mrb[28].mxu1  ;;  %v1469_v6 = vpop.f32.mrb[29].mxu0 }
 0x130   :  { %v1470_v8 = vadd.f32 %v1469_v6, %v1468_v3  ;;  %v1509_v9 = vpop.f32.mrb[29].mxu1  ;;  %v1471_v10 = vpop.f32.mrb[30].mxu0 }
 0x131   :  { %v1510_v11 = vadd.f32 %v1509_v9, %v1508_v4  ;;  %v1511_v12 = vpop.f32.mrb[30].mxu1  ;;  %v1472_v13 = vpop.f32.mrb[31].mxu0 }
 0x132   :  { %v1512_v14 = vpop.f32.mrb[31].mxu1 }
 0x133   :  { %v707_v15 = vadd.f32 %v1510_v11, %v1470_v8 }
 0x135   :  { %v718_v16 = vmax.f32 %v2297_v18, %v707_v15 }
 0x136   :  { %v1530_v17 = vpop.f32.mrb[32].mxu0 }
 0x137   :  { %v1570_v5 = vpop.f32.mrb[32].mxu1  ;;  %v1531_v19 = vpop.f32.mrb[33].mxu0 }
 0x138   :  { %v1532_v20 = vadd.f32 %v1531_v19, %v1530_v17  ;;  %v1571_v21 = vpop.f32.mrb[33].mxu1  ;;  %v1533_v22 = vpop.f32.mrb[34].mxu0 }
 0x139   :  { %v1572_v23 = vadd.f32 %v1571_v21, %v1570_v5  ;;  %v1573_v7 = vpop.f32.mrb[34].mxu1  ;;  %v1534_v24 = vpop.f32.mrb[35].mxu0 }
 0x13a   :  { %v1535_v25 = vadd.f32 %v1534_v24, %v1533_v22  ;;  %v1574_v26 = vpop.f32.mrb[35].mxu1 }
 0x13b   :  { %v906_v27 = vadd.f32 %v1572_v23, %v1532_v20  ;;  %v1575_v28 = vadd.f32 %v1574_v26, %v1573_v7  ;;  %v2341_v26 = vld [vmem:[%s2374_s5] ss:$0 sm:$0xff] }
 0x13d   :  { %v2324_v29 = vmax.f32 %v712_v42, %v906_v27  ;;  %v909_v30 = vadd.f32 %v1575_v28, %v1535_v25 }
 0x13e   :  { %v1536_v31 = vpop.f32.mrb[36].mxu0 }
 0x13f   :  { %v2326_v43 = vmax.f32 %v713_v45, %v909_v30  ;;  %v1576_v18 = vpop.f32.mrb[36].mxu1  ;;  %v1537_v44 = vpop.f32.mrb[37].mxu0 }
 0x140   :  { %v1538_v46 = vadd.f32 %v1537_v44, %v1536_v31  ;;  %v1577_v47 = vpop.f32.mrb[37].mxu1  ;;  %v1539_v48 = vpop.f32.mrb[38].mxu0 }
 0x141   :  { %v1578_v49 = vadd.f32 %v1577_v47, %v1576_v18  ;;  %v1579_v50 = vpop.f32.mrb[38].mxu1  ;;  %v1540_v52 = vpop.f32.mrb[39].mxu0 }
 0x142   :  { %v1541_v54 = vadd.f32 %v1540_v52, %v1539_v48  ;;  %v1580_v55 = vpop.f32.mrb[39].mxu1 }
 0x143   :  { %v914_v56 = vadd.f32 %v1578_v49, %v1538_v46  ;;  %v1581_v57 = vadd.f32 %v1580_v55, %v1579_v50 }
 0x145   :  { %v2328_v58 = vmax.f32 %v714_v51, %v914_v56  ;;  %v917_v42 = vadd.f32 %v1581_v57, %v1541_v54 }
 0x146   :  { %v1542_v59 = vpop.f32.mrb[40].mxu0 }
 0x147   :  { %v2330_v60 = vmax.f32 %v715_v53, %v917_v42  ;;  %v1582_v45 = vpop.f32.mrb[40].mxu1  ;;  %v1543_v61 = vpop.f32.mrb[41].mxu0 }
 0x148   :  { %v1544_v62 = vadd.f32 %v1543_v61, %v1542_v59  ;;  %v1583_v63 = vpop.f32.mrb[41].mxu1  ;;  %v1545_v32 = vpop.f32.mrb[42].mxu0 }
 0x149   :  { %v1584_v34 = vadd.f32 %v1583_v63, %v1582_v45  ;;  %v1585_v36 = vpop.f32.mrb[42].mxu1  ;;  %v1546_v37 = vpop.f32.mrb[43].mxu0 }
 0x14a   :  { %v1547_v38 = vadd.f32 %v1546_v37, %v1545_v32  ;;  %v1586_v39 = vpop.f32.mrb[43].mxu1 }
 0x14b   :  { %v922_v40 = vadd.f32 %v1584_v34, %v1544_v62  ;;  %v1587_v41 = vadd.f32 %v1586_v39, %v1585_v36 }
 0x14d   :  { %v2332_v0 = vmax.f32 %v716_v33, %v922_v40  ;;  %v925_v51 = vadd.f32 %v1587_v41, %v1547_v38 }
 0x14e   :  { %v1548_v1 = vpop.f32.mrb[44].mxu0 }
 0x14f   :  { %v2334_v2 = vmax.f32 %v717_v35, %v925_v51  ;;  %v1588_v53 = vpop.f32.mrb[44].mxu1  ;;  %v1549_v3 = vpop.f32.mrb[45].mxu0 }
 0x150   :  { %v1550_v4 = vadd.f32 %v1549_v3, %v1548_v1  ;;  %v1589_v6 = vpop.f32.mrb[45].mxu1  ;;  %v1551_v8 = vpop.f32.mrb[46].mxu0 }
 0x151   :  { %v1590_v9 = vadd.f32 %v1589_v6, %v1588_v53  ;;  %v1591_v10 = vpop.f32.mrb[46].mxu1  ;;  %v1552_v11 = vpop.f32.mrb[47].mxu0 }
 0x152   :  { %v1592_v12 = vpop.f32.mrb[47].mxu1 }
 0x153   :  { %v930_v13 = vadd.f32 %v1590_v9, %v1550_v4 }
 0x155   :  { %v2336_v14 = vmax.f32 %v718_v16, %v930_v13 }
 0x156   :  { %v1610_v15 = vpop.f32.mrb[48].mxu0 }
 0x157   :  { %v1650_v17 = vpop.f32.mrb[48].mxu1  ;;  %v1611_v33 = vpop.f32.mrb[49].mxu0 }
 0x158   :  { %v1612_v5 = vadd.f32 %v1611_v33, %v1610_v15  ;;  %v1651_v19 = vpop.f32.mrb[49].mxu1  ;;  %v1613_v20 = vpop.f32.mrb[50].mxu0 }
 0x159   :  { %v1652_v35 = vadd.f32 %v1651_v19, %v1650_v17  ;;  %v1653_v21 = vpop.f32.mrb[50].mxu1  ;;  %v1614_v22 = vpop.f32.mrb[51].mxu0 }
 0x15a   :  { %v1615_v23 = vadd.f32 %v1614_v22, %v1613_v20  ;;  %v1654_v7 = vpop.f32.mrb[51].mxu1 }
 0x15b   :  { %v1129_v24 = vadd.f32 %v1652_v35, %v1612_v5  ;;  %v1655_v25 = vadd.f32 %v1654_v7, %v1653_v21 }
 0x15d   :  { %v1158_v16 = vmax.f32 %v2324_v29, %v1129_v24  ;;  %v1132_v27 = vadd.f32 %v1655_v25, %v1615_v23 }
 0x15e   :  { %v1616_v28 = vpop.f32.mrb[52].mxu0 }
 0x15f   :  { %v1172_v30 = vadd.f32 %v2341_v26, %v1158_v16  ;;  %v1159_v31 = vmax.f32 %v2326_v43, %v1132_v27  ;;  %v1656_v18 = vpop.f32.mrb[52].mxu1  ;;  %v1617_v44 = vpop.f32.mrb[53].mxu0 }
 0x160   :  { %v1618_v46 = vadd.f32 %v1617_v44, %v1616_v28  ;;  %v1657_v47 = vpop.f32.mrb[53].mxu1  ;;  %v1619_v48 = vpop.f32.mrb[54].mxu0 }
 0x161   :  { %v1173_v49 = vadd.f32 %v2341_v26, %v1159_v31  ;;  %v1658_v50 = vadd.f32 %v1657_v47, %v1656_v18  ;;  %v1659_v52 = vpop.f32.mrb[54].mxu1  ;;  %v1620_v54 = vpop.f32.mrb[55].mxu0  ;;  %v1179_v57 = vmax.f32 %v1172_v30, 0.0 }
 0x162   :  { %v1621_v55 = vadd.f32 %v1620_v54, %v1619_v48  ;;  %v1660_v56 = vpop.f32.mrb[55].mxu1 }
 0x163   :  { %v1180_v29 = vmax.f32 %v1173_v49, 0.0  ;;  %v1137_v42 = vadd.f32 %v1658_v50, %v1618_v46  ;;  %v1661_v59 = vadd.f32 %v1660_v56, %v1659_v52 }
 0x165   :  { %v1340_v45 = vpack.c.bf16 %v1180_v29, %v1179_v57  ;;  %v1160_v61 = vmax.f32 %v2328_v58, %v1137_v42  ;;  %v1140_v43 = vadd.f32 %v1661_v59, %v1621_v55 }
 0x166   :  { %v1622_v62 = vpop.f32.mrb[56].mxu0 }
 0x167   :  { %1341 = vst [vmem:[%s2375_s6] sm:$0xff] %v1340_v45   ;;  %v1174_v63 = vadd.f32 %v2341_v26, %v1160_v61  ;;  %v1161_v32 = vmax.f32 %v2330_v60, %v1140_v43  ;;  %v1662_v34 = vpop.f32.mrb[56].mxu1  ;;  %v1623_v36 = vpop.f32.mrb[57].mxu0 }
 0x168   :  { %v1624_v37 = vadd.f32 %v1623_v36, %v1622_v62  ;;  %v1663_v38 = vpop.f32.mrb[57].mxu1  ;;  %v1625_v39 = vpop.f32.mrb[58].mxu0 }
 0x169   :  { %v1175_v40 = vadd.f32 %v2341_v26, %v1161_v32  ;;  %v1664_v41 = vadd.f32 %v1663_v38, %v1662_v34  ;;  %v1665_v51 = vpop.f32.mrb[58].mxu1  ;;  %v1626_v58 = vpop.f32.mrb[59].mxu0  ;;  %v1181_v3 = vmax.f32 %v1174_v63, 0.0 }
 0x16a   :  { %v1627_v1 = vadd.f32 %v1626_v58, %v1625_v39  ;;  %v1666_v53 = vpop.f32.mrb[59].mxu1 }
 0x16b   :  { %v1182_v4 = vmax.f32 %v1175_v40, 0.0  ;;  %v1145_v6 = vadd.f32 %v1664_v41, %v1624_v37  ;;  %v1667_v8 = vadd.f32 %v1666_v53, %v1665_v51 }
 0x16d   :  { %v1345_v9 = vpack.c.bf16 %v1182_v4, %v1181_v3  ;;  %v1162_v10 = vmax.f32 %v2332_v0, %v1145_v6  ;;  %v1148_v60 = vadd.f32 %v1667_v8, %v1627_v1 }
 0x16e   :  { %v1628_v11 = vpop.f32.mrb[60].mxu0 }
 0x16f   :  { %1352 = vst [vmem:[%s2375_s6 + $0x8] sm:$0xff] %v1345_v9   ;;  %v1176_v12 = vadd.f32 %v2341_v26, %v1162_v10  ;;  %v1163_v13 = vmax.f32 %v2334_v2, %v1148_v60  ;;  %v1668_v15 = vpop.f32.mrb[60].mxu1  ;;  %v1629_v17 = vpop.f32.mrb[61].mxu0 }
 0x170   :  { %v1630_v33 = vadd.f32 %v1629_v17, %v1628_v11  ;;  %v1669_v5 = vpop.f32.mrb[61].mxu1  ;;  %v1631_v19 = vpop.f32.mrb[62].mxu0 }
 0x171   :  { %v1177_v20 = vadd.f32 %v2341_v26, %v1163_v13  ;;  %v1670_v35 = vadd.f32 %v1669_v5, %v1668_v15  ;;  %v1671_v21 = vpop.f32.mrb[62].mxu1  ;;  %v1632_v0 = vpop.f32.mrb[63].mxu0  ;;  %v1183_v23 = vmax.f32 %v1176_v12, 0.0 }
 0x172   :  { %v1672_v22 = vpop.f32.mrb[63].mxu1 }
 0x173   :  { %v1184_v7 = vmax.f32 %v1177_v20, 0.0  ;;  %v1153_v24 = vadd.f32 %v1670_v35, %v1630_v33 }
 0x175   :  { %v1350_v25 = vpack.c.bf16 %v1184_v7, %v1183_v23  ;;  %v1164_v16 = vmax.f32 %v2336_v14, %v1153_v24 }
 0x177   :  { %1353 = vst [vmem:[%s2375_s6 + $0x10] sm:$0xff] %v1350_v25   ;;  %v1178_v2 = vadd.f32 %v2341_v26, %v1164_v16 }
 0x179   :  { %v1185_v27 = vmax.f32 %v1178_v2, 0.0 }
 0x17b   :  { %v1336_v28 = vpack.c.bf16 %v1185_v27, %v1185_v27 }
 0x17d   :  { %1221 = vst [vmem:[%s2375_s6 + $0x18] sm:$0xf] %v1336_v28 }

// kernel: cnn_forward.9
= control target key start
LH: loop header
LB: loop body
LE: loop exit
PB: predicated region body
PF: predicated region fallthrough
CT: control target
= control target key end

     0   :  { %v252_v3 = vmov 0.0|0.0   ;;  %vm253_vm0 = vmmov 0   ;;  %v254_v6 = vmov 0.0   ;;  %vm19_vm1 = vcmask 1043456   ;;  %s345_s0 = inlined_call_operand.vmem [shape: bf16[2,4,128], index: 0, kind: input, shape index: {}]   ;;  %s346_s1 = inlined_call_operand.vmem [shape: f32[128,128], index: 1, kind: input, shape index: {}]   ;;  %s347_s2 = inlined_call_operand.vmem [shape: f32[1,128], index: 2, kind: input, shape index: {}]   ;;  %s348_s3 = inlined_call_operand.hbm [shape: f32[2,128], index: 3, kind: output, shape index: {}]  }
   0x1   :  { %v34_v0 = vld [vmem:[%s346_s1] sm:$0xff]  ;;  %v35_v1 = vld [vmem:[%s346_s1 + $0x8] sm:$0xff]  ;;  %v36_v2 = vld [vmem:[%s346_s1 + $0x10] sm:$0xff]  ;;  %200 = vmatprep.subr.bf16.mxu0 %v252_v3  ;;  %197 = vmatprep.mubr.msk.f32.mxu0 %vm253_vm0, %v254_v6 }
   0x2   :  { %v201_v4 = vpack.c.bf16 %v35_v1, %v34_v0  ;;  %v37_v5 = vld [vmem:[%s346_s1 + $0x18] sm:$0xff]  ;;  %v38_v8 = vld [vmem:[%s346_s1 + $0x20] sm:$0xff]  ;;  %v39_v9 = vld [vmem:[%s346_s1 + $0x28] sm:$0xff] }
   0x3   :  { %v204_v7 = vpack.c.bf16 %v37_v5, %v36_v2  ;;  %v15_v10 = vld [vmem:[%s345_s0] sm:$0x3]  ;;  %v16_v11 = vld [vmem:[%s345_s0 + $0x2] sm:$0x3] }
   0x4   :  { %202 = vmatpush3.bf16.msra.mxu0 %v201_v4  ;;  %v17_v12 = vunpack.c.l.bf16 %v15_v10  ;;  %v18_v13 = vunpack.c.l.bf16 %v16_v11 }
   0x5   :  { %203 = vmatprep.subr.bf16.mxu0 %v252_v3 }
   0x6   :  { %8 = vsyncpa [#allocation3], 0  ;;  %v207_v14 = vpack.c.bf16 %v39_v9, %v38_v8  ;;  %v40_v15 = vld [vmem:[%s346_s1 + $0x30] sm:$0xff]  ;;  %v41_v16 = vld [vmem:[%s346_s1 + $0x38] sm:$0xff]  ;;  %v20_v17 = vsel %vm19_vm1, %v17_v12, 0.0  ;;  %v27_v18 = vsel %vm19_vm1, %v18_v13, 0.0 }
   0x7   :  { %v21_v19 = vrot.slane %v20_v17, 4  ;;  %v28_v20 = vrot.slane %v27_v18, 4  ;;  %v210_v21 = vpack.c.bf16 %v41_v16, %v40_v15  ;;  %v42_v24 = vld [vmem:[%s346_s1 + $0x40] sm:$0xff]  ;;  %v43_v25 = vld [vmem:[%s346_s1 + $0x48] sm:$0xff]  ;;  %v44_v29 = vld [vmem:[%s346_s1 + $0x50] sm:$0xff]  ;;  %vm59_vm2 = vcmask 1041409  }
   0x8   :  { %205 = vmatpush3.bf16.msra.mxu0 %v204_v7  ;;  %v213_v26 = vpack.c.bf16 %v43_v25, %v42_v24  ;;  %v45_v30 = vld [vmem:[%s346_s1 + $0x58] sm:$0xff]  ;;  %v46_v34 = vld [vmem:[%s346_s1 + $0x60] sm:$0xff]  ;;  %v47_v35 = vld [vmem:[%s346_s1 + $0x68] sm:$0xff]  ;;  %s255_s22 = smov [#allocation2]  }
   0x9   :  { %206 = vmatprep.subr.bf16.mxu0 %v252_v3  ;;  %v22_v22 = vadd.f32 %v21_v19, %v20_v17  ;;  %v29_v23 = vadd.f32 %v28_v20, %v27_v18  ;;  %v216_v31 = vpack.c.bf16 %v45_v30, %v44_v29  ;;  %v219_v36 = vpack.c.bf16 %v47_v35, %v46_v34  ;;  %v48_v39 = vld [vmem:[%s346_s1 + $0x70] sm:$0xff]  ;;  %v49_v40 = vld [vmem:[%s346_s1 + $0x78] sm:$0xff]  ;;  %v147_v45 = vld [vmem:[%s347_s2] ss:$0 sm:$0xff]  ;;  %s139_s23 = sshll.u32 %s255_s22, 4  ;;  %s140_s23 = int_to_ptr.vmem [resolvable:$true] %s139_s23 }
   0xa   :  { %v222_v41 = vpack.c.bf16 %v49_v40, %v48_v39  ;;  %s228_s1 = scalar_lea.vmem %s140_s23, 32  ;;  %p233_p1 = scmp.lt.s32.totalorder %s140_s23, %s140_s23 }
   0xb   :  { %v23_v27 = vrot.slane %v22_v22, 2  ;;  %v30_v28 = vrot.slane %v29_v23, 2  ;;  %p229_p0 = scmp.ne.s32.totalorder %s140_s23, %s228_s1  ;;  %p234_p2 = scmp.lt.s32.totalorder %s228_s1, %s228_s1 }
   0xc   :  { %208 = vmatpush3.bf16.msra.mxu0 %v207_v14 }
   0xd   :  { %209 = vmatprep.subr.bf16.mxu0 %v252_v3  ;;  %v24_v32 = vadd.f32 %v23_v27, %v22_v22  ;;  %v31_v33 = vadd.f32 %v30_v28, %v29_v23  ;;  %p235_p3 = por %p234_p2, %p233_p1 }
   0xf   :  { %v25_v37 = vrot.slane %v24_v32, 1  ;;  %v32_v38 = vrot.slane %v31_v33, 1  ;;  %p236_p4 = pnand %p235_p3, %p229_p0 }
  0x10   :  { %211 = vmatpush3.bf16.msra.mxu0 %v210_v21 }
  0x11   :  { %212 = vmatprep.subr.bf16.mxu0 %v252_v3  ;;  %v26_v42 = vadd.f32 %v25_v37, %v24_v32  ;;  %v33_v43 = vadd.f32 %v32_v38, %v31_v33 }
  0x13   :  { %v60_v44 = vsel %vm59_vm2, %v33_v43, %v26_v42 }
  0x14   :  { %214 = vmatpush3.bf16.msra.mxu0 %v213_v26 }
  0x15   :  { %215 = vmatprep.subr.bf16.mxu0 %v252_v3 }
  0x18   :  { %217 = vmatpush3.bf16.msra.mxu0 %v216_v31 }
  0x19   :  { %218 = vmatprep.subr.bf16.mxu0 %v252_v3 }
  0x1c   :  { %220 = vmatpush3.bf16.msra.mxu0 %v219_v36 }
  0x1d   :  { %221 = vmatprep.subr.bf16.mxu0 %v252_v3 }
  0x20   :  { %223 = vmatpush3.bf16.msra.mxu0 %v222_v41 }
  0x23   :  { %198 = vmatmul.mubr.f32.vlgmr.msra.gmra.mrb[0].mxu0 %v60_v44 }
  0xf6   :  { %v128_v46 = vpop.f32.mrb[0].mxu0 }
  0xf7   :  { %v129_v47 = vadd.f32 %v147_v45, %v128_v46  ;;  %v199_v48 = vpop.f32.mrb[1].mxu0 }
  0xf9   :  { %132 = vst [vmem:[#allocation2] sm:$0x3] %v129_v47 }
  0xfa   :  { %239 = shalt.err (!%p236_p4)
}
  0xfb   :  { %s240_s26 = scalar_lea.hbm %s348_s3, 32 }
  0xfc   :  { %p241_p5 = scmp.ne.s32.totalorder %s348_s3, %s240_s26  ;;  %p244_p6 = scmp.lt.u32.totalorder %s240_s26, %s348_s3 }
  0xfe   :  { %p246_p7 = pnand %p244_p6, %p241_p5 }
 0x100   :  { %249 = shalt.err (!%p246_p7)
}
 0x101   :  { %142 = dma.vmem_to_hbm [thread:$0]  %s140_s23, 32, %s348_s3, [#allocation3]  }
 0x102   :  { %250 = dma.done.wait [#allocation3], 32  }
 0x103   :  { %251 = vsyncadd [#allocation3], 4294967264 }
 0x104   :  { %146 = vsyncpa [#allocation3], 1 }

// kernel: cnn_forward.8
= control target key start
LH: loop header
LB: loop body
LE: loop exit
PB: predicated region body
PF: predicated region fallthrough
CT: control target
= control target key end

     0   :  { %s1308_s4 = inlined_call_operand.vmem [shape: bf16[512,128], index: 4, kind: input, shape index: {}]   ;;  %s1309_s0 = inlined_call_operand.vmem [shape: bf16[8,512], index: 0, kind: input, shape index: {}]   ;;  %s1310_s1 = inlined_call_operand.vmem [shape: bf16[8,512], index: 1, kind: input, shape index: {}]   ;;  %s1311_s2 = inlined_call_operand.vmem [shape: bf16[8,512], index: 2, kind: input, shape index: {}]   ;;  %s1312_s3 = inlined_call_operand.vmem [shape: bf16[8,512], index: 3, kind: input, shape index: {}]   ;;  %s1313_s5 = inlined_call_operand.vmem [shape: f32[1,128], index: 5, kind: input, shape index: {}]   ;;  %s1314_s6 = inlined_call_operand.vmem [shape: bf16[8,128], index: 6, kind: output, shape index: {}]  }
   0x1   :  { %v993_v0 = vld [vmem:[%s1308_s4 + $0x40] sm:$0xff]   ;;  %v1016_v4 = vld [vmem:[%s1308_s4 + $0x48] sm:$0xff]   ;;  %v1040_v8 = vld [vmem:[%s1308_s4 + $0x50] sm:$0xff]  }
   0x2   :  { %v998_v1 = vld [vmem:[%s1308_s4 + $0xc0] sm:$0xff]   ;;  %731 = vmatprep.subr.bf16.mxu0 %v993_v0  ;;  %v1022_v5 = vld [vmem:[%s1308_s4 + $0xc8] sm:$0xff]   ;;  %v1046_v9 = vld [vmem:[%s1308_s4 + $0xd0] sm:$0xff]  }
   0x3   :  { %v1004_v2 = vld [vmem:[%s1308_s4] sm:$0xff]   ;;  %753 = vmatprep.subr.bf16.mxu1 %v998_v1  ;;  %v1028_v6 = vld [vmem:[%s1308_s4 + $0x8] sm:$0xff]   ;;  %v1052_v10 = vld [vmem:[%s1308_s4 + $0x10] sm:$0xff]  }
   0x4   :  { %v1010_v3 = vld [vmem:[%s1308_s4 + $0x80] sm:$0xff]   ;;  %732 = vmatpush3.bf16.msra.mxu0 %v1004_v2  ;;  %v1034_v7 = vld [vmem:[%s1308_s4 + $0x88] sm:$0xff]   ;;  %v1058_v11 = vld [vmem:[%s1308_s4 + $0x90] sm:$0xff]  }
   0x5   :  { %754 = vmatpush3.bf16.msra.mxu1 %v1010_v3  ;;  %733 = vmatprep.subr.bf16.mxu0 %v1016_v4  ;;  %v1064_v12 = vld [vmem:[%s1308_s4 + $0x58] sm:$0xff]   ;;  %v1088_v16 = vld [vmem:[%s1308_s4 + $0x60] sm:$0xff]   ;;  %v1112_v20 = vld [vmem:[%s1308_s4 + $0x68] sm:$0xff]  }
   0x6   :  { %755 = vmatprep.subr.bf16.mxu1 %v1022_v5  ;;  %v1070_v13 = vld [vmem:[%s1308_s4 + $0xd8] sm:$0xff]   ;;  %v1094_v17 = vld [vmem:[%s1308_s4 + $0xe0] sm:$0xff]   ;;  %v1118_v21 = vld [vmem:[%s1308_s4 + $0xe8] sm:$0xff]  }
   0x7   :  { %v1076_v14 = vld [vmem:[%s1308_s4 + $0x18] sm:$0xff]   ;;  %v1100_v18 = vld [vmem:[%s1308_s4 + $0x20] sm:$0xff]   ;;  %v1124_v22 = vld [vmem:[%s1308_s4 + $0x28] sm:$0xff]  }
   0x8   :  { %734 = vmatpush3.bf16.msra.mxu0 %v1028_v6  ;;  %v1082_v15 = vld [vmem:[%s1308_s4 + $0x98] sm:$0xff]   ;;  %v1106_v19 = vld [vmem:[%s1308_s4 + $0xa0] sm:$0xff]   ;;  %v1130_v23 = vld [vmem:[%s1308_s4 + $0xa8] sm:$0xff]  }
   0x9   :  { %756 = vmatpush3.bf16.msra.mxu1 %v1034_v7  ;;  %735 = vmatprep.subr.bf16.mxu0 %v1040_v8  ;;  %v1136_v24 = vld [vmem:[%s1308_s4 + $0x70] sm:$0xff]   ;;  %v1160_v28 = vld [vmem:[%s1308_s4 + $0x78] sm:$0xff]   ;;  %v88_v32 = vld [vmem:[%s1309_s0] sm:$0xff] }
   0xa   :  { %757 = vmatprep.subr.bf16.mxu1 %v1046_v9  ;;  %v1142_v25 = vld [vmem:[%s1308_s4 + $0xf0] sm:$0xff]   ;;  %v1166_v29 = vld [vmem:[%s1308_s4 + $0xf8] sm:$0xff]   ;;  %v89_v33 = vld [vmem:[%s1309_s0 + $0x8] sm:$0xff]  ;;  %v682_v35 = vcombine.low %v88_v32, %v88_v32  ;;  %v683_v36 = vcombine.high %v88_v32, %v88_v32 }
   0xb   :  { %v1148_v26 = vld [vmem:[%s1308_s4 + $0x30] sm:$0xff]   ;;  %v1172_v30 = vld [vmem:[%s1308_s4 + $0x38] sm:$0xff]   ;;  %v376_v34 = vld [vmem:[%s1310_s1] sm:$0xff]  ;;  %v684_v37 = vcombine.low %v89_v33, %v89_v33  ;;  %v685_v38 = vcombine.high %v89_v33, %v89_v33 }
   0xc   :  { %736 = vmatpush3.bf16.msra.mxu0 %v1052_v10  ;;  %v1154_v27 = vld [vmem:[%s1308_s4 + $0xb0] sm:$0xff]   ;;  %v1178_v31 = vld [vmem:[%s1308_s4 + $0xb8] sm:$0xff]   ;;  %v377_v39 = vld [vmem:[%s1310_s1 + $0x8] sm:$0xff]  ;;  %328 = vmatprep.mubr.bf16.mxu0 %v683_v36  ;;  %v719_v40 = vcombine.high %v376_v34, %v376_v34  ;;  %v718_v42 = vcombine.low %v376_v34, %v376_v34 }
   0xd   :  { %758 = vmatpush3.bf16.msra.mxu1 %v1058_v11  ;;  %737 = vmatprep.subr.bf16.mxu0 %v1064_v12  ;;  %v721_v41 = vcombine.high %v377_v39, %v377_v39  ;;  %v720_v43 = vcombine.low %v377_v39, %v377_v39  ;;  %v473_v44 = vld [vmem:[%s1311_s2] sm:$0xff]  ;;  %v474_v45 = vld [vmem:[%s1311_s2 + $0x8] sm:$0xff] }
   0xe   :  { %759 = vmatprep.subr.bf16.mxu1 %v1070_v13  ;;  %368 = vmatprep.mubr.bf16.mxu1 %v685_v38  ;;  %v723_v46 = vcombine.high %v473_v44, %v473_v44  ;;  %v725_v47 = vcombine.high %v474_v45, %v474_v45  ;;  %v722_v48 = vcombine.low %v473_v44, %v473_v44  ;;  %v570_v50 = vld [vmem:[%s1312_s3] sm:$0xff]  ;;  %v571_v51 = vld [vmem:[%s1312_s3 + $0x8] sm:$0xff] }
   0xf   :  { %v724_v49 = vcombine.low %v474_v45, %v474_v45  ;;  %v727_v52 = vcombine.high %v570_v50, %v570_v50  ;;  %v729_v53 = vcombine.high %v571_v51, %v571_v51  ;;  %v726_v54 = vcombine.low %v570_v50, %v570_v50  ;;  %v730_v38 = vld [vmem:[%s1313_s5] ss:$0 sm:$0xff] }
  0x10   :  { %738 = vmatpush3.bf16.msra.mxu0 %v1076_v14  ;;  %v728_v55 = vcombine.low %v571_v51, %v571_v51 }
  0x11   :  { %760 = vmatpush3.bf16.msra.mxu1 %v1082_v15  ;;  %739 = vmatprep.subr.bf16.mxu0 %v1088_v16 }
  0x12   :  { %761 = vmatprep.subr.bf16.mxu1 %v1094_v17 }
  0x14   :  { %740 = vmatpush3.bf16.msra.mxu0 %v1100_v18 }
  0x15   :  { %762 = vmatpush3.bf16.msra.mxu1 %v1106_v19  ;;  %741 = vmatprep.subr.bf16.mxu0 %v1112_v20 }
  0x16   :  { %763 = vmatprep.subr.bf16.mxu1 %v1118_v21 }
  0x18   :  { %742 = vmatpush3.bf16.msra.mxu0 %v1124_v22 }
  0x19   :  { %764 = vmatpush3.bf16.msra.mxu1 %v1130_v23  ;;  %743 = vmatprep.subr.bf16.mxu0 %v1136_v24 }
  0x1a   :  { %765 = vmatprep.subr.bf16.mxu1 %v1142_v25 }
  0x1c   :  { %744 = vmatpush3.bf16.msra.mxu0 %v1148_v26 }
  0x1d   :  { %766 = vmatpush3.bf16.msra.mxu1 %v1154_v27  ;;  %745 = vmatprep.subr.bf16.mxu0 %v1160_v28 }
  0x1e   :  { %767 = vmatprep.subr.bf16.mxu1 %v1166_v29 }
  0x20   :  { %746 = vmatpush3.bf16.msra.mxu0 %v1172_v30 }
  0x21   :  { %768 = vmatpush3.bf16.msra.mxu1 %v1178_v31  ;;  %775 = vmatprep.subr.bf16.mxu0 %v993_v0 }
  0x22   :  { %797 = vmatprep.subr.bf16.mxu1 %v998_v1 }
  0x23   :  { %329 = vmatmul.mubr.bf16.vlgmr.msra.gmra.mrb[0].mxu0 %v682_v35 }
  0x24   :  { %369 = vmatmul.mubr.bf16.vlgmr.msra.gmra.mrb[0].mxu1 %v684_v37  ;;  %776 = vmatpush3.bf16.msra.mxu0 %v1004_v2 }
  0x25   :  { %798 = vmatpush3.bf16.msra.mxu1 %v1010_v3  ;;  %777 = vmatprep.subr.bf16.mxu0 %v1016_v4 }
  0x26   :  { %799 = vmatprep.subr.bf16.mxu1 %v1022_v5  ;;  %424 = vmatprep.mubr.bf16.mxu0 %v719_v40 }
  0x27   :  { %464 = vmatprep.mubr.bf16.mxu1 %v721_v41 }
  0x28   :  { %778 = vmatpush3.bf16.msra.mxu0 %v1028_v6 }
  0x29   :  { %800 = vmatpush3.bf16.msra.mxu1 %v1034_v7  ;;  %779 = vmatprep.subr.bf16.mxu0 %v1040_v8 }
  0x2a   :  { %801 = vmatprep.subr.bf16.mxu1 %v1046_v9 }
  0x2c   :  { %780 = vmatpush3.bf16.msra.mxu0 %v1052_v10 }
  0x2d   :  { %802 = vmatpush3.bf16.msra.mxu1 %v1058_v11  ;;  %781 = vmatprep.subr.bf16.mxu0 %v1064_v12 }
  0x2e   :  { %803 = vmatprep.subr.bf16.mxu1 %v1070_v13 }
  0x30   :  { %782 = vmatpush3.bf16.msra.mxu0 %v1076_v14 }
  0x31   :  { %804 = vmatpush3.bf16.msra.mxu1 %v1082_v15  ;;  %783 = vmatprep.subr.bf16.mxu0 %v1088_v16 }
  0x32   :  { %805 = vmatprep.subr.bf16.mxu1 %v1094_v17 }
  0x34   :  { %784 = vmatpush3.bf16.msra.mxu0 %v1100_v18 }
  0x35   :  { %806 = vmatpush3.bf16.msra.mxu1 %v1106_v19  ;;  %785 = vmatprep.subr.bf16.mxu0 %v1112_v20 }
  0x36   :  { %807 = vmatprep.subr.bf16.mxu1 %v1118_v21 }
  0x38   :  { %786 = vmatpush3.bf16.msra.mxu0 %v1124_v22 }
  0x39   :  { %808 = vmatpush3.bf16.msra.mxu1 %v1130_v23  ;;  %787 = vmatprep.subr.bf16.mxu0 %v1136_v24 }
  0x3a   :  { %809 = vmatprep.subr.bf16.mxu1 %v1142_v25 }
  0x3c   :  { %788 = vmatpush3.bf16.msra.mxu0 %v1148_v26 }
  0x3d   :  { %810 = vmatpush3.bf16.msra.mxu1 %v1154_v27  ;;  %789 = vmatprep.subr.bf16.mxu0 %v1160_v28 }
  0x3e   :  { %811 = vmatprep.subr.bf16.mxu1 %v1166_v29 }
  0x40   :  { %790 = vmatpush3.bf16.msra.mxu0 %v1172_v30 }
  0x41   :  { %812 = vmatpush3.bf16.msra.mxu1 %v1178_v31  ;;  %819 = vmatprep.subr.bf16.mxu0 %v993_v0 }
  0x42   :  { %841 = vmatprep.subr.bf16.mxu1 %v998_v1 }
  0x43   :  { %425 = vmatmul.mubr.bf16.vlgmr.msra.gmra.mrb[4].mxu0 %v718_v42 }
  0x44   :  { %465 = vmatmul.mubr.bf16.vlgmr.msra.gmra.mrb[4].mxu1 %v720_v43  ;;  %820 = vmatpush3.bf16.msra.mxu0 %v1004_v2 }
  0x45   :  { %842 = vmatpush3.bf16.msra.mxu1 %v1010_v3  ;;  %821 = vmatprep.subr.bf16.mxu0 %v1016_v4 }
  0x46   :  { %843 = vmatprep.subr.bf16.mxu1 %v1022_v5  ;;  %521 = vmatprep.mubr.bf16.mxu0 %v723_v46 }
  0x47   :  { %561 = vmatprep.mubr.bf16.mxu1 %v725_v47 }
  0x48   :  { %822 = vmatpush3.bf16.msra.mxu0 %v1028_v6 }
  0x49   :  { %844 = vmatpush3.bf16.msra.mxu1 %v1034_v7  ;;  %823 = vmatprep.subr.bf16.mxu0 %v1040_v8 }
  0x4a   :  { %845 = vmatprep.subr.bf16.mxu1 %v1046_v9 }
  0x4c   :  { %824 = vmatpush3.bf16.msra.mxu0 %v1052_v10 }
  0x4d   :  { %846 = vmatpush3.bf16.msra.mxu1 %v1058_v11  ;;  %825 = vmatprep.subr.bf16.mxu0 %v1064_v12 }
  0x4e   :  { %847 = vmatprep.subr.bf16.mxu1 %v1070_v13 }
  0x50   :  { %826 = vmatpush3.bf16.msra.mxu0 %v1076_v14 }
  0x51   :  { %848 = vmatpush3.bf16.msra.mxu1 %v1082_v15  ;;  %827 = vmatprep.subr.bf16.mxu0 %v1088_v16 }
  0x52   :  { %849 = vmatprep.subr.bf16.mxu1 %v1094_v17 }
  0x54   :  { %828 = vmatpush3.bf16.msra.mxu0 %v1100_v18 }
  0x55   :  { %850 = vmatpush3.bf16.msra.mxu1 %v1106_v19  ;;  %829 = vmatprep.subr.bf16.mxu0 %v1112_v20 }
  0x56   :  { %851 = vmatprep.subr.bf16.mxu1 %v1118_v21 }
  0x58   :  { %830 = vmatpush3.bf16.msra.mxu0 %v1124_v22 }
  0x59   :  { %852 = vmatpush3.bf16.msra.mxu1 %v1130_v23  ;;  %831 = vmatprep.subr.bf16.mxu0 %v1136_v24 }
  0x5a   :  { %853 = vmatprep.subr.bf16.mxu1 %v1142_v25 }
  0x5c   :  { %832 = vmatpush3.bf16.msra.mxu0 %v1148_v26 }
  0x5d   :  { %854 = vmatpush3.bf16.msra.mxu1 %v1154_v27  ;;  %833 = vmatprep.subr.bf16.mxu0 %v1160_v28 }
  0x5e   :  { %855 = vmatprep.subr.bf16.mxu1 %v1166_v29 }
  0x60   :  { %834 = vmatpush3.bf16.msra.mxu0 %v1172_v30 }
  0x61   :  { %856 = vmatpush3.bf16.msra.mxu1 %v1178_v31  ;;  %863 = vmatprep.subr.bf16.mxu0 %v993_v0 }
  0x62   :  { %885 = vmatprep.subr.bf16.mxu1 %v998_v1 }
  0x63   :  { %522 = vmatmul.mubr.bf16.vlgmr.msra.gmra.mrb[8].mxu0 %v722_v48 }
  0x64   :  { %562 = vmatmul.mubr.bf16.vlgmr.msra.gmra.mrb[8].mxu1 %v724_v49  ;;  %864 = vmatpush3.bf16.msra.mxu0 %v1004_v2 }
  0x65   :  { %886 = vmatpush3.bf16.msra.mxu1 %v1010_v3  ;;  %865 = vmatprep.subr.bf16.mxu0 %v1016_v4 }
  0x66   :  { %887 = vmatprep.subr.bf16.mxu1 %v1022_v5  ;;  %618 = vmatprep.mubr.bf16.mxu0 %v727_v52 }
  0x67   :  { %658 = vmatprep.mubr.bf16.mxu1 %v729_v53 }
  0x68   :  { %866 = vmatpush3.bf16.msra.mxu0 %v1028_v6 }
  0x69   :  { %888 = vmatpush3.bf16.msra.mxu1 %v1034_v7  ;;  %867 = vmatprep.subr.bf16.mxu0 %v1040_v8 }
  0x6a   :  { %889 = vmatprep.subr.bf16.mxu1 %v1046_v9 }
  0x6c   :  { %868 = vmatpush3.bf16.msra.mxu0 %v1052_v10 }
  0x6d   :  { %890 = vmatpush3.bf16.msra.mxu1 %v1058_v11  ;;  %869 = vmatprep.subr.bf16.mxu0 %v1064_v12 }
  0x6e   :  { %891 = vmatprep.subr.bf16.mxu1 %v1070_v13 }
  0x70   :  { %870 = vmatpush3.bf16.msra.mxu0 %v1076_v14 }
  0x71   :  { %892 = vmatpush3.bf16.msra.mxu1 %v1082_v15  ;;  %871 = vmatprep.subr.bf16.mxu0 %v1088_v16 }
  0x72   :  { %893 = vmatprep.subr.bf16.mxu1 %v1094_v17 }
  0x74   :  { %872 = vmatpush3.bf16.msra.mxu0 %v1100_v18 }
  0x75   :  { %894 = vmatpush3.bf16.msra.mxu1 %v1106_v19  ;;  %873 = vmatprep.subr.bf16.mxu0 %v1112_v20 }
  0x76   :  { %895 = vmatprep.subr.bf16.mxu1 %v1118_v21 }
  0x78   :  { %874 = vmatpush3.bf16.msra.mxu0 %v1124_v22 }
  0x79   :  { %896 = vmatpush3.bf16.msra.mxu1 %v1130_v23  ;;  %875 = vmatprep.subr.bf16.mxu0 %v1136_v24 }
  0x7a   :  { %897 = vmatprep.subr.bf16.mxu1 %v1142_v25 }
  0x7c   :  { %876 = vmatpush3.bf16.msra.mxu0 %v1148_v26 }
  0x7d   :  { %898 = vmatpush3.bf16.msra.mxu1 %v1154_v27  ;;  %877 = vmatprep.subr.bf16.mxu0 %v1160_v28 }
  0x7e   :  { %899 = vmatprep.subr.bf16.mxu1 %v1166_v29 }
  0x80   :  { %878 = vmatpush3.bf16.msra.mxu0 %v1172_v30 }
  0x81   :  { %900 = vmatpush3.bf16.msra.mxu1 %v1178_v31 }
  0x83   :  { %619 = vmatmul.mubr.bf16.vlgmr.msra.gmra.mrb[12].mxu0 %v726_v54 }
  0x84   :  { %659 = vmatmul.mubr.bf16.vlgmr.msra.gmra.mrb[12].mxu1 %v728_v55 }
  0xf6   :  { %v747_v56 = vpop.f32.mrb[0].mxu0 }
  0xf7   :  { %v769_v57 = vpop.f32.mrb[0].mxu1  ;;  %v748_v58 = vpop.f32.mrb[1].mxu0 }
  0xf8   :  { %v770_v59 = vpop.f32.mrb[1].mxu1  ;;  %v749_v60 = vadd.f32 %v748_v58, %v747_v56  ;;  %v750_v62 = vpop.f32.mrb[2].mxu0 }
  0xf9   :  { %v771_v61 = vadd.f32 %v770_v59, %v769_v57  ;;  %v772_v63 = vpop.f32.mrb[2].mxu1  ;;  %v751_v0 = vpop.f32.mrb[3].mxu0 }
  0xfa   :  { %v773_v1 = vpop.f32.mrb[3].mxu1 }
  0xfb   :  { %v371_v2 = vadd.f32 %v771_v61, %v749_v60 }
 0x116   :  { %v791_v3 = vpop.f32.mrb[4].mxu0 }
 0x117   :  { %v813_v4 = vpop.f32.mrb[4].mxu1  ;;  %v792_v5 = vpop.f32.mrb[5].mxu0 }
 0x118   :  { %v814_v6 = vpop.f32.mrb[5].mxu1  ;;  %v793_v7 = vadd.f32 %v792_v5, %v791_v3  ;;  %v794_v9 = vpop.f32.mrb[6].mxu0 }
 0x119   :  { %v815_v8 = vadd.f32 %v814_v6, %v813_v4  ;;  %v816_v10 = vpop.f32.mrb[6].mxu1  ;;  %v795_v11 = vpop.f32.mrb[7].mxu0 }
 0x11a   :  { %v817_v12 = vpop.f32.mrb[7].mxu1 }
 0x11b   :  { %v467_v13 = vadd.f32 %v815_v8, %v793_v7 }
 0x11d   :  { %v472_v14 = vmax.f32 %v371_v2, %v467_v13 }
 0x136   :  { %v835_v15 = vpop.f32.mrb[8].mxu0 }
 0x137   :  { %v857_v16 = vpop.f32.mrb[8].mxu1  ;;  %v836_v17 = vpop.f32.mrb[9].mxu0 }
 0x138   :  { %v858_v18 = vpop.f32.mrb[9].mxu1  ;;  %v837_v19 = vadd.f32 %v836_v17, %v835_v15  ;;  %v838_v21 = vpop.f32.mrb[10].mxu0 }
 0x139   :  { %v859_v20 = vadd.f32 %v858_v18, %v857_v16  ;;  %v860_v22 = vpop.f32.mrb[10].mxu1  ;;  %v839_v23 = vpop.f32.mrb[11].mxu0 }
 0x13a   :  { %v861_v24 = vpop.f32.mrb[11].mxu1 }
 0x13b   :  { %v564_v25 = vadd.f32 %v859_v20, %v837_v19 }
 0x13d   :  { %v569_v26 = vmax.f32 %v472_v14, %v564_v25 }
 0x156   :  { %v879_v27 = vpop.f32.mrb[12].mxu0 }
 0x157   :  { %v901_v28 = vpop.f32.mrb[12].mxu1  ;;  %v880_v29 = vpop.f32.mrb[13].mxu0 }
 0x158   :  { %v902_v30 = vpop.f32.mrb[13].mxu1  ;;  %v881_v31 = vadd.f32 %v880_v29, %v879_v27  ;;  %v882_v33 = vpop.f32.mrb[14].mxu0 }
 0x159   :  { %v903_v32 = vadd.f32 %v902_v30, %v901_v28  ;;  %v904_v34 = vpop.f32.mrb[14].mxu1  ;;  %v883_v35 = vpop.f32.mrb[15].mxu0 }
 0x15a   :  { %v905_v36 = vpop.f32.mrb[15].mxu1 }
 0x15b   :  { %v661_v37 = vadd.f32 %v903_v32, %v881_v31 }
 0x15d   :  { %v666_v39 = vmax.f32 %v569_v26, %v661_v37 }
 0x15f   :  { %v674_v40 = vadd.f32 %v730_v38, %v666_v39 }
 0x161   :  { %v675_v41 = vmax.f32 %v674_v40, 0.0 }
 0x163   :  { %v676_v42 = vpack.c.bf16 %v675_v41, %v675_v41 }
 0x165   :  { %677 = vst [vmem:[%s1314_s6] sm:$0xf] %v676_v42 }

</bundles_post_ra>
